<compile_context>
chip_gen: v6e
topology: v6e:2x2x1
jax: 0.10.0
libtpu: 0.0.40
codegen_flags: <defaults>
</compile_context>

<pallas_src>
import math

import jax
import jax.numpy as jnp
from jax.experimental import pallas as pl
from jax.experimental.pallas import tpu as pltpu

_GEOM_PAD = 16  # geometry feature (4-d) zero-padded to 16 for bf16 sublane-tile alignment


def _relation_kernel(fa_ref, g_ref, w_ref, b_ref, out_ref):
    """One tile of TM relation pairs.

    fa_ref : (TM, D)            bf16  flattened ROI appearance features
    g_ref  : (TM, 16)           bf16  4-d relative-geometry feature, zero-padded to 16
    w_ref  : (3*D + 16, D)      bf16  [Wv1; Wv2; We2; We1 (4 -> 16 zero-padded rows)]
    b_ref  : (1, 4*D)           f32   [bv1 | bv2 | be1 | be2]
    out_ref: (TM, 128)          f32   per-pair scalar f_R broadcast across the lane dim
    """
    D = fa_ref.shape[1]

    fa = fa_ref[...]
    g = g_ref[...]

    # VMEM-resident packed weights (all slice offsets are bf16 sublane-tile aligned).
    wv1 = w_ref[0:D, :]
    wv2 = w_ref[D:2 * D, :]
    we2 = w_ref[2 * D:3 * D, :]
    we1 = w_ref[3 * D:, :]          # (16, D); rows 4..15 are zero

    bv1 = b_ref[:, 0:D]
    bv2 = b_ref[:, D:2 * D]
    be1 = b_ref[:, 2 * D:3 * D]
    be2 = b_ref[:, 3 * D:4 * D]

    def two_mlp_head(x, w1, b1, w2, b2):
        # bf16 operands on the MXU, f32 accumulation; elementwise math stays f32.
        h = jnp.dot(x, w1, preferred_element_type=jnp.float32) + b1
        h = jnp.maximum(h, 0.0)
        o = jnp.dot(h.astype(jnp.bfloat16), w2, preferred_element_type=jnp.float32) + b2
        return jnp.maximum(o, 0.0)

    v = two_mlp_head(fa, wv1, bv1, wv2, bv2)        # (TM, D)  V network
    f_r_mn = two_mlp_head(g, we1, be1, we2, be2)    # (TM, D)  embedding network

    # Original: w_A = (Q . K) / sqrt(D) (per-pair scalar); scores = ReLU(f_R_mn) * exp(w_A);
    #           scores /= sum(scores).  exp(w_A) is a positive per-pair scalar, so it cancels
    #           exactly in the normalization -> the Q/K TwoMLPHeads are dead code and dropped.
    w_g = f_r_mn                                     # ReLU(f_R_mn); already post-ReLU
    s = jnp.sum(w_g, axis=-1, keepdims=True)
    s = jnp.where(s == 0.0, 1.0, s)                  # guard: original would produce NaN here
    scores = w_g / s

    # p_attn = softmax(scores, axis=-1)
    m = jnp.max(scores, axis=-1, keepdims=True)
    e = jnp.exp(scores - m)
    p_attn = e / jnp.sum(e, axis=-1, keepdims=True)
    # TODO(synk): nn.Dropout() on p_attn omitted (eval-mode identity) — stochastic op.

    # f_R = p_attn . V   (scalar per pair)
    f_r = jnp.sum(p_attn * v, axis=-1, keepdims=True)        # (TM, 1)
    out_ref[...] = jnp.broadcast_to(f_r, out_ref.shape)      # lane-dense unmasked store


def _geometry_feature(f_G_n, f_G_m):
    # TODO(synk): the project-local TwoMLPHead(f_G_n, f_G_m) combiner is not provided; the
    # standard 4-d relative-geometry feature (Relation Networks, Hu et al. 2018) is used,
    # matching the embedding network's in_features == 4.
    xn, yn, wn, hn = f_G_n[..., 0], f_G_n[..., 1], f_G_n[..., 2], f_G_n[..., 3]
    xm, ym, wm, hm = f_G_m[..., 0], f_G_m[..., 1], f_G_m[..., 2], f_G_m[..., 3]
    eps = 1e-6
    g = jnp.stack([
        jnp.log(jnp.abs(xm - xn) / wn + eps),
        jnp.log(jnp.abs(ym - yn) / hn + eps),
        jnp.log(wm / wn),
        jnp.log(hm / hn),
    ], axis=-1)
    return g.astype(jnp.float32)                     # (..., 4)


def _pack_params(params):
    """Pack 8 weight/bias arrays into two slabs (fewer DMAs, bf16 weights)."""
    D = params["wv1"].shape[0]
    we1 = params["we1"]                              # (4, D)
    we1_pad = jnp.concatenate(
        [we1, jnp.zeros((_GEOM_PAD - we1.shape[0], D), we1.dtype)], axis=0)
    w_slab = jnp.concatenate(
        [params["wv1"], params["wv2"], params["we2"], we1_pad],
        axis=0).astype(jnp.bfloat16)                 # (3*D + 16, D)
    b_slab = jnp.concatenate(
        [params["bv1"], params["bv2"], params["be1"], params["be2"]],
        axis=1).astype(jnp.float32)                  # (1, 4*D)
    return w_slab, b_slab


def relation_forward_batched(f_A, f_G_n, f_G_m, params, tile_m=256):
    """Per-pair f_R for a batch of relation pairs.

    f_A   : (P, C, H, W) or (P, D)   ROI appearance feature per pair
    f_G_n : (P, 4), f_G_m : (P, 4)   boxes (x, y, w, h) per pair
    returns (P,) float32.
    tile_m: pair-tile rows per grid step (multiple of 256 for v6e/v7x, 128 for v5e).
    """
    P = f_A.shape[0]
    D = params["wv1"].shape[0]
    assert tile_m % 8 == 0

    fa = f_A.reshape(P, -1).astype(jnp.float32)
    assert fa.shape[1] == D
    g = _geometry_feature(f_G_n, f_G_m)                              # (P, 4)

    num_tiles = (P + tile_m - 1) // tile_m
    pp = num_tiles * tile_m
    fa = jnp.pad(fa, ((0, pp - P), (0, 0))).astype(jnp.bfloat16)     # (pp, D)
    g = jnp.pad(g, ((0, pp - P), (0, _GEOM_PAD - 4))).astype(jnp.bfloat16)  # (pp, 16)

    w_slab, b_slab = _pack_params(params)

    out = pl.pallas_call(
        _relation_kernel,
        out_shape=jax.ShapeDtypeStruct((pp, 128), jnp.float32),
        grid_spec=pltpu.PrefetchScalarGridSpec(
            num_scalar_prefetch=0,
            grid=(num_tiles,),
            in_specs=[
                pl.BlockSpec((tile_m, D), lambda i: (i, 0)),          # streamed pair tiles
                pl.BlockSpec((tile_m, _GEOM_PAD), lambda i: (i, 0)),  # streamed geometry
                pl.BlockSpec((3 * D + _GEOM_PAD, D), lambda i: (0, 0)),  # VMEM-resident weights
                pl.BlockSpec((1, 4 * D), lambda i: (0, 0)),              # VMEM-resident biases
            ],
            out_specs=pl.BlockSpec((tile_m, 128), lambda i: (i, 0)),
        ),
        compiler_params=pltpu.CompilerParams(
            dimension_semantics=("parallel",)),      # megacore-shard the pair axis (v7x)
    )(fa, g, w_slab, b_slab)
    return out[:P, 0]


def relation_forward(f_A, f_G_n, f_G_m, params):
    """Single-pair API matching Relation.forward(f_A, f_G_n, f_G_m) -> scalar f_R."""
    out = relation_forward_batched(
        f_A.reshape(1, -1), f_G_n.reshape(1, 4), f_G_m.reshape(1, 4), params, tile_m=8)
    return out[0]


def reference_forward_batched(f_A, f_G_n, f_G_m, params):
    """Pure-JAX reference with the same bf16-matmul / f32-accumulate math."""
    P = f_A.shape[0]
    fa = f_A.reshape(P, -1).astype(jnp.float32)
    g = _geometry_feature(f_G_n, f_G_m)

    def head(x, w1, b1, w2, b2):
        h = jnp.dot(x.astype(jnp.bfloat16), w1.astype(jnp.bfloat16),
                    preferred_element_type=jnp.float32) + b1
        h = jnp.maximum(h, 0.0)
        o = jnp.dot(h.astype(jnp.bfloat16), w2.astype(jnp.bfloat16),
                    preferred_element_type=jnp.float32) + b2
        return jnp.maximum(o, 0.0)

    v = head(fa, params["wv1"], params["bv1"], params["wv2"], params["bv2"])
    w_g = head(g, params["we1"], params["be1"], params["we2"], params["be2"])
    s = jnp.sum(w_g, axis=-1, keepdims=True)
    s = jnp.where(s == 0.0, 1.0, s)
    scores = w_g / s
    p = jax.nn.softmax(scores, axis=-1)
    return jnp.sum(p * v, axis=-1)


def init_params(key, D):
    """Deterministic init (uniform +-1/sqrt(fan_in), like nn.Linear), weights as (in, out).

    The Q/K networks of the original module are not materialized: their only effect,
    exp(w_A), cancels exactly in the scores normalization and never changes f_R.
    """
    keys = jax.random.split(key, 8)

    def lin_w(k, fin, fout):
        s = 1.0 / math.sqrt(fin)
        return jax.random.uniform(k, (fin, fout), jnp.float32, -s, s)

    def lin_b(k, fin, fout):
        s = 1.0 / math.sqrt(fin)
        return jax.random.uniform(k, (1, fout), jnp.float32, -s, s)

    p = {}
    names = [("wv1", "bv1", D, D), ("wv2", "bv2", D, D),
             ("we1", "be1", 4, D), ("we2", "be2", D, D)]
    for i, (wn_, bn_, fin, fout) in enumerate(names):
        p[wn_] = lin_w(keys[2 * i], fin, fout)
        p[bn_] = lin_b(keys[2 * i + 1], fin, fout)
    return p


if __name__ == "__main__":
    # f_A_shape = C * roi_out_size * roi_out_size = 4 * 8 * 8 = 256
    C, roi_out_size = 4, 8
    D = C * roi_out_size * roi_out_size

    P = 300  # relation pairs in one batched call (pads to 2 x 256-row tiles)

    key = jax.random.PRNGKey(0)
    k_fa, k_xy1, k_wh1, k_xy2, k_wh2, k_p = jax.random.split(key, 6)

    f_A = jax.random.normal(k_fa, (P, C, roi_out_size, roi_out_size), jnp.float32)
    f_G_n = jnp.concatenate(
        [jax.random.uniform(k_xy1, (P, 2), jnp.float32, 0.0, 64.0),
         jax.random.uniform(k_wh1, (P, 2), jnp.float32, 4.0, 32.0)], axis=-1)
    f_G_m = jnp.concatenate(
        [jax.random.uniform(k_xy2, (P, 2), jnp.float32, 0.0, 64.0),
         jax.random.uniform(k_wh2, (P, 2), jnp.float32, 4.0, 32.0)], axis=-1)

    params = init_params(k_p, D)

    # Batched kernel call (the primary, optimized path).
    f_R = jax.block_until_ready(jax.jit(relation_forward_batched)(f_A, f_G_n, f_G_m, params))
    assert f_R.shape == (P,)
    assert bool(jnp.all(jnp.isfinite(f_R)))

    ref = reference_forward_batched(f_A, f_G_n, f_G_m, params)
    assert jnp.allclose(f_R, ref, rtol=1e-2, atol=1e-3), (f_R[:4], ref[:4])

    # Single-pair API (matches Relation.forward semantics: one scalar f_R per pair).
    f_R0 = jax.block_until_ready(jax.jit(relation_forward)(f_A[0], f_G_n[0], f_G_m[0], params))
    assert f_R0.shape == ()
    assert bool(jnp.isfinite(f_R0))
    assert jnp.allclose(f_R0, f_R[0], rtol=1e-2, atol=1e-3)

    print("KERNEL_OK")
</pallas_src>

<mosaic_0001>
module attributes {stable_mosaic.version = 11 : i64} {
  func.func @_relation_kernel(%arg0: i32, %arg1: memref<256x256xbf16, #tpu.memory_space<vmem>>, %arg2: memref<256x16xbf16, #tpu.memory_space<vmem>>, %arg3: memref<784x256xbf16, #tpu.memory_space<vmem>>, %arg4: memref<1x1024xf32, #tpu.memory_space<vmem>>, %arg5: memref<256x128xf32, #tpu.memory_space<vmem>>) attributes {dimension_semantics = [#tpu.dimension_semantics<parallel>], iteration_bounds = array<i64: 2>, scalar_prefetch = 0 : i64, scratch_operands = 0 : i64, tpu.core_type = #tpu.core_type<tc>, window_params = [{transform_indices = @transform_0, window_bounds = array<i64: 256, 256>}, {transform_indices = @transform_1, window_bounds = array<i64: 256, 16>}, {pipeline_mode = #tpu.pipeline_mode<synchronous>, transform_indices = @transform_2, window_bounds = array<i64: 784, 256>}, {pipeline_mode = #tpu.pipeline_mode<synchronous>, transform_indices = @transform_3, window_bounds = array<i64: 1, 1024>}, {transform_indices = @transform_4, window_bounds = array<i64: 256, 128>}]} {
    %c0 = arith.constant 0 : index
    %c0_0 = arith.constant 0 : index
    %0 = vector.load %arg1[%c0, %c0_0] : memref<256x256xbf16, #tpu.memory_space<vmem>>, vector<256x256xbf16>
    %c0_1 = arith.constant 0 : index
    %c0_2 = arith.constant 0 : index
    %1 = vector.load %arg2[%c0_1, %c0_2] : memref<256x16xbf16, #tpu.memory_space<vmem>>, vector<256x16xbf16>
    %c0_3 = arith.constant 0 : index
    %c0_4 = arith.constant 0 : index
    %2 = vector.load %arg3[%c0_3, %c0_4] : memref<784x256xbf16, #tpu.memory_space<vmem>>, vector<256x256xbf16>
    %c256 = arith.constant 256 : index
    %c0_5 = arith.constant 0 : index
    %3 = vector.load %arg3[%c256, %c0_5] : memref<784x256xbf16, #tpu.memory_space<vmem>>, vector<256x256xbf16>
    %c512 = arith.constant 512 : index
    %c0_6 = arith.constant 0 : index
    %4 = vector.load %arg3[%c512, %c0_6] : memref<784x256xbf16, #tpu.memory_space<vmem>>, vector<256x256xbf16>
    %c768 = arith.constant 768 : index
    %c0_7 = arith.constant 0 : index
    %5 = vector.load %arg3[%c768, %c0_7] : memref<784x256xbf16, #tpu.memory_space<vmem>>, vector<16x256xbf16>
    %c0_8 = arith.constant 0 : index
    %c0_9 = arith.constant 0 : index
    %6 = vector.load %arg4[%c0_8, %c0_9] : memref<1x1024xf32, #tpu.memory_space<vmem>>, vector<1x256xf32>
    %c0_10 = arith.constant 0 : index
    %c256_11 = arith.constant 256 : index
    %7 = vector.load %arg4[%c0_10, %c256_11] : memref<1x1024xf32, #tpu.memory_space<vmem>>, vector<1x256xf32>
    %c0_12 = arith.constant 0 : index
    %c512_13 = arith.constant 512 : index
    %8 = vector.load %arg4[%c0_12, %c512_13] : memref<1x1024xf32, #tpu.memory_space<vmem>>, vector<1x256xf32>
    %c0_14 = arith.constant 0 : index
    %c768_15 = arith.constant 768 : index
    %9 = vector.load %arg4[%c0_14, %c768_15] : memref<1x1024xf32, #tpu.memory_space<vmem>>, vector<1x256xf32>
    %cst = arith.constant dense<0.000000e+00> : vector<256x256xf32>
    %10 = tpu.matmul %0, %2, %cst {dimension_numbers = #tpu.dot_dimension_numbers<[1], [0], [0], [1], [0, 0, 1, 1], [], []>} : vector<256x256xbf16>, vector<256x256xbf16>, vector<256x256xf32> -> vector<256x256xf32>
    %11 = vector.broadcast %6 : vector<1x256xf32> to vector<256x256xf32>
    %12 = arith.addf %10, %11 : vector<256x256xf32>
    %cst_16 = arith.constant 0.000000e+00 : f32
    %13 = vector.broadcast %cst_16 : f32 to vector<256x256xf32>
    %14 = arith.maximumf %12, %13 : vector<256x256xf32>
    %15 = arith.truncf %14 : vector<256x256xf32> to vector<256x256xbf16>
    %cst_17 = arith.constant dense<0.000000e+00> : vector<256x256xf32>
    %16 = tpu.matmul %15, %3, %cst_17 {dimension_numbers = #tpu.dot_dimension_numbers<[1], [0], [0], [1], [0, 0, 1, 1], [], []>} : vector<256x256xbf16>, vector<256x256xbf16>, vector<256x256xf32> -> vector<256x256xf32>
    %17 = vector.broadcast %7 : vector<1x256xf32> to vector<256x256xf32>
    %18 = arith.addf %16, %17 : vector<256x256xf32>
    %cst_18 = arith.constant 0.000000e+00 : f32
    %19 = vector.broadcast %cst_18 : f32 to vector<256x256xf32>
    %20 = arith.maximumf %18, %19 : vector<256x256xf32>
    %cst_19 = arith.constant dense<0.000000e+00> : vector<256x256xf32>
    %21 = tpu.matmul %1, %5, %cst_19 {dimension_numbers = #tpu.dot_dimension_numbers<[1], [0], [0], [1], [0, 0, 1, 1], [], []>} : vector<256x16xbf16>, vector<16x256xbf16>, vector<256x256xf32> -> vector<256x256xf32>
    %22 = vector.broadcast %8 : vector<1x256xf32> to vector<256x256xf32>
    %23 = arith.addf %21, %22 : vector<256x256xf32>
    %cst_20 = arith.constant 0.000000e+00 : f32
    %24 = vector.broadcast %cst_20 : f32 to vector<256x256xf32>
    %25 = arith.maximumf %23, %24 : vector<256x256xf32>
    %26 = arith.truncf %25 : vector<256x256xf32> to vector<256x256xbf16>
    %cst_21 = arith.constant dense<0.000000e+00> : vector<256x256xf32>
    %27 = tpu.matmul %26, %4, %cst_21 {dimension_numbers = #tpu.dot_dimension_numbers<[1], [0], [0], [1], [0, 0, 1, 1], [], []>} : vector<256x256xbf16>, vector<256x256xbf16>, vector<256x256xf32> -> vector<256x256xf32>
    %28 = vector.broadcast %9 : vector<1x256xf32> to vector<256x256xf32>
    %29 = arith.addf %27, %28 : vector<256x256xf32>
    %cst_22 = arith.constant 0.000000e+00 : f32
    %30 = vector.broadcast %cst_22 : f32 to vector<256x256xf32>
    %31 = arith.maximumf %29, %30 : vector<256x256xf32>
    %cst_23 = arith.constant dense<0.000000e+00> : vector<256xf32>
    %32 = vector.multi_reduction <add>, %31, %cst_23 [1] : vector<256x256xf32> to vector<256xf32>
    %33 = vector.shape_cast %32 : vector<256xf32> to vector<256x1xf32>
    %cst_24 = arith.constant 0.000000e+00 : f32
    %34 = vector.broadcast %cst_24 : f32 to vector<256x1xf32>
    %35 = arith.cmpf oeq, %33, %34 : vector<256x1xf32>
    %cst_25 = arith.constant 1.000000e+00 : f32
    %36 = vector.broadcast %cst_25 : f32 to vector<256x1xf32>
    %37 = arith.select %35, %36, %33 : vector<256x1xi1>, vector<256x1xf32>
    %38 = vector.broadcast %37 : vector<256x1xf32> to vector<256x256xf32>
    %39 = arith.divf %31, %38 : vector<256x256xf32>
    %cst_26 = arith.constant dense<0xFF800000> : vector<256xf32>
    %40 = vector.multi_reduction <maximumf>, %39, %cst_26 [1] : vector<256x256xf32> to vector<256xf32>
    %41 = vector.shape_cast %40 : vector<256xf32> to vector<256x1xf32>
    %42 = vector.broadcast %41 : vector<256x1xf32> to vector<256x256xf32>
    %43 = arith.subf %39, %42 : vector<256x256xf32>
    %44 = math.exp %43 : vector<256x256xf32>
    %cst_27 = arith.constant dense<0.000000e+00> : vector<256xf32>
    %45 = vector.multi_reduction <add>, %44, %cst_27 [1] : vector<256x256xf32> to vector<256xf32>
    %46 = vector.shape_cast %45 : vector<256xf32> to vector<256x1xf32>
    %47 = vector.broadcast %46 : vector<256x1xf32> to vector<256x256xf32>
    %48 = arith.divf %44, %47 : vector<256x256xf32>
    %49 = arith.mulf %48, %20 : vector<256x256xf32>
    %cst_28 = arith.constant dense<0.000000e+00> : vector<256xf32>
    %50 = vector.multi_reduction <add>, %49, %cst_28 [1] : vector<256x256xf32> to vector<256xf32>
    %51 = vector.shape_cast %50 : vector<256xf32> to vector<256x1xf32>
    %52 = vector.shape_cast %51 : vector<256x1xf32> to vector<256x1xf32>
    %53 = vector.broadcast %52 : vector<256x1xf32> to vector<256x128xf32>
    %c0_29 = arith.constant 0 : index
    %c0_30 = arith.constant 0 : index
    %54 = vector.load %arg5[%c0_29, %c0_30] : memref<256x128xf32, #tpu.memory_space<vmem>>, vector<256x128xf32>
    tpu.vector_store %arg5[%c0_29, %c0_30], %53 {strides = array<i32>} : memref<256x128xf32, #tpu.memory_space<vmem>>, vector<256x128xf32>,
    return
  }
  func.func @transform_0(%arg0: i32) -> (i32, i32) {
    %c0_i32 = arith.constant 0 : i32
    %c0_i32_0 = arith.constant 0 : i32
    return %arg0, %c0_i32 : i32, i32
  }
  func.func @transform_1(%arg0: i32) -> (i32, i32) {
    %c0_i32 = arith.constant 0 : i32
    %c0_i32_0 = arith.constant 0 : i32
    return %arg0, %c0_i32 : i32, i32
  }
  func.func @transform_2(%arg0: i32) -> (i32, i32) {
    %c0_i32 = arith.constant 0 : i32
    %c0_i32_0 = arith.constant 0 : i32
    %c0_i32_1 = arith.constant 0 : i32
    return %c0_i32, %c0_i32_0 : i32, i32
  }
  func.func @transform_3(%arg0: i32) -> (i32, i32) {
    %c0_i32 = arith.constant 0 : i32
    %c0_i32_0 = arith.constant 0 : i32
    %c0_i32_1 = arith.constant 0 : i32
    return %c0_i32, %c0_i32_0 : i32, i32
  }
  func.func @transform_4(%arg0: i32) -> (i32, i32) {
    %c0_i32 = arith.constant 0 : i32
    %c0_i32_0 = arith.constant 0 : i32
    return %arg0, %c0_i32 : i32, i32
  }
}

</mosaic_0001>

<bundles_post_ra>
// kernel: relation_forward_batched.1
= control target key start
LH: loop header
LB: loop body
LE: loop exit
PB: predicated region body
PF: predicated region fallthrough
CT: control target
= control target key end

     0   :  { %s3991_s15 = smov 0   ;;  %s5879_s0 = inlined_call_operand.vmem [shape: bf16[512,256], index: 0, kind: input, shape index: {}]   ;;  %s5880_s1 = inlined_call_operand.vmem [shape: bf16[512,16], index: 1, kind: input, shape index: {}]   ;;  %s5881_s2 = inlined_call_operand.vmem [shape: bf16[784,256], index: 2, kind: input, shape index: {}]   ;;  %s5882_s3 = inlined_call_operand.vmem [shape: f32[1,1024], index: 3, kind: input, shape index: {}]   ;;  %s5883_s4 = inlined_call_operand.vmem [shape: f32[512,128], index: 4, kind: output, shape index: {}]  }
   0x1 LB: > { %s3304_s16 = sadd.s32 4294967295, %s3963_s15   ;;  %p3308_p0 = scmp.ge.s32.totalorder %s3963_s15, 1  ;;  %s3963_s15 = sphi %s3991_s15, %s14_s15  }
   0x2   : > { %p175_p1 = scmp.lt.s32.totalorder %s3963_s15, 3 }
   0x4   : > { %p176_p2 = pnand %p3308_p0, %p175_p1 }
   0x6   : > { %179 = sbr.rel (%p176_p2) target bundleno = 1349 (0x545), region = 36 }
   0xb   : > { %v3490_v0 = vld [vmem:[%s5881_s2 + $0x74] ss:$8 sps:$4 sm:$0xff]   ;;  %v3492_v1 = vld [vmem:[%s5881_s2 + $0x70] ss:$8 sps:$4 sm:$0xff]   ;;  %v3493_v2 = vld [vmem:[%s5881_s2 + $0x64] ss:$8 sps:$4 sm:$0xff]  }
   0xc   : > { %724 = vmatprep.subr.bf16.mxu0 %v3490_v0  ;;  %v3495_v3 = vld [vmem:[%s5881_s2 + $0x60] ss:$8 sps:$4 sm:$0xff]   ;;  %v3496_v4 = vld [vmem:[%s5881_s2 + $0x54] ss:$8 sps:$4 sm:$0xff]   ;;  %s3309_s27 = sshll.u32 %s3304_s16, 5  ;;  %vm1542_vm0 = vcmask 130048  }
   0xd   : > { %725 = vmatpush1.bf16.msra.mxu0 %v3492_v1  ;;  %v3498_v5 = vld [vmem:[%s5881_s2 + $0x50] ss:$8 sps:$4 sm:$0xff]   ;;  %v3499_v6 = vld [vmem:[%s5881_s2 + $0x44] ss:$8 sps:$4 sm:$0xff]   ;;  %p208_p3 = scmp.lt.s32.totalorder %s3309_s27, 63 }
   0xe   : > { %726 = vmatprep.subr.bf16.mxu0 %v3493_v2  ;;  %v3501_v7 = vld [vmem:[%s5881_s2 + $0x40] ss:$8 sps:$4 sm:$0xff]   ;;  %v3502_v8 = vld [vmem:[%s5881_s2 + $0x34] ss:$8 sps:$4 sm:$0xff]   ;;  %v3504_v9 = vld [vmem:[%s5881_s2 + $0x30] ss:$8 sps:$4 sm:$0xff]  }
   0xf   : > { %s6291_s27 = smov (!%p208_p3, %s3309_s27), 63  ;;  %v3505_v10 = vld [vmem:[%s5881_s2 + $0x24] ss:$8 sps:$4 sm:$0xff]   ;;  %v3507_v11 = vld [vmem:[%s5881_s2 + $0x20] ss:$8 sps:$4 sm:$0xff]  }
  0x10   : > { %s3480_s14 = sshll.u32 %s6291_s27, 3  ;;  %v3508_v12 = vld [vmem:[%s5881_s2 + $0x14] ss:$8 sps:$4 sm:$0xff]   ;;  %v3510_v14 = vld [vmem:[%s5881_s2 + $0x10] ss:$8 sps:$4 sm:$0xff]   ;;  %s3313_s18 = sshll.u32 %s6291_s27, 2 }
  0x11   : > { %727 = vmatpush1.bf16.msra.mxu0 %v3495_v3  ;;  %s4043_s20 = scalar_lea.vmem %s5879_s0, %s3480_s14  ;;  %v3511_v15 = vld [vmem:[%s5881_s2 + $0x4] ss:$8 sps:$4 sm:$0xff]   ;;  %v3513_v16 = vld [vmem:[%s5881_s2] ss:$8 sps:$4 sm:$0xff]   ;;  %v3514_v17 = vld [vmem:[%s5881_s2 + $0xf4] ss:$8 sps:$4 sm:$0xff]   ;;  %s4086_s26 = scalar_lea.vmem %s5880_s1, %s3313_s18 }
  0x12   : > { %728 = vmatprep.subr.bf16.mxu0 %v3496_v4  ;;  %v3540_v13 = vld [vmem:[%s4043_s20 + $0x4] ss:$8 sps:$4 sm:$0xff]   ;;  %v3516_v18 = vld [vmem:[%s5881_s2 + $0xf0] ss:$8 sps:$4 sm:$0xff]   ;;  %v3519_v20 = vld [vmem:[%s5881_s2 + $0xe0] ss:$8 sps:$4 sm:$0xff]   ;;  %s5842_s7 = scalar_lea.vmem %s5883_s4, %s3480_s14 }
  0x13   : > { %756 = vmatprep.mubr.bf16.mxu0 %v3540_v13  ;;  %v3517_v19 = vld [vmem:[%s5881_s2 + $0xe4] ss:$8 sps:$4 sm:$0xff]   ;;  %v3520_v21 = vld [vmem:[%s5881_s2 + $0xd4] ss:$8 sps:$4 sm:$0xff]   ;;  %v3522_v22 = vld [vmem:[%s5881_s2 + $0xd0] ss:$8 sps:$4 sm:$0xff]  }
  0x14   : > { %v3523_v23 = vld [vmem:[%s5881_s2 + $0xc4] ss:$8 sps:$4 sm:$0xff]   ;;  %v3525_v24 = vld [vmem:[%s5881_s2 + $0xc0] ss:$8 sps:$4 sm:$0xff]   ;;  %v3526_v25 = vld [vmem:[%s5881_s2 + $0xb4] ss:$8 sps:$4 sm:$0xff]  }
  0x15   : > { %729 = vmatpush1.bf16.msra.mxu0 %v3498_v5  ;;  %v3528_v26 = vld [vmem:[%s5881_s2 + $0xb0] ss:$8 sps:$4 sm:$0xff]   ;;  %v3529_v27 = vld [vmem:[%s5881_s2 + $0xa4] ss:$8 sps:$4 sm:$0xff]   ;;  %v3531_v28 = vld [vmem:[%s5881_s2 + $0xa0] ss:$8 sps:$4 sm:$0xff]  }
  0x16   : > { %730 = vmatprep.subr.bf16.mxu0 %v3499_v6  ;;  %v3532_v29 = vld [vmem:[%s5881_s2 + $0x94] ss:$8 sps:$4 sm:$0xff]   ;;  %v3534_v30 = vld [vmem:[%s5881_s2 + $0x90] ss:$8 sps:$4 sm:$0xff]   ;;  %v3535_v31 = vld [vmem:[%s5881_s2 + $0x84] ss:$8 sps:$4 sm:$0xff]  }
  0x17   : > { %v3537_v32 = vld [vmem:[%s5881_s2 + $0x80] ss:$8 sps:$4 sm:$0xff]   ;;  %v3543_v33 = vld [vmem:[%s5881_s2 + $0x304] ss:$8 sps:$4 sm:$0xff]   ;;  %v3544_v36 = vld [vmem:[%s4043_s20 + $0x14] ss:$8 sps:$4 sm:$0xff]  }
  0x18   : > { %v3538_v34 = vld [vmem:[%s4043_s20] ss:$8 sps:$4 sm:$0xff]   ;;  %v3546_v37 = vld [vmem:[%s4043_s20 + $0x10] ss:$8 sps:$4 sm:$0xff]   ;;  %v3547_v38 = vld [vmem:[%s4043_s20 + $0x24] ss:$8 sps:$4 sm:$0xff]  }
  0x19   : > { %731 = vmatpush1.bf16.msra.mxu0 %v3501_v7  ;;  %v3541_v35 = vld [vmem:[%s5881_s2 + $0x300] ss:$8 sps:$4 sm:$0xff]   ;;  %v3591_v39 = vld [vmem:[%s5881_s2 + $0x174] ss:$8 sps:$4 sm:$0xff]   ;;  %v3593_v40 = vld [vmem:[%s5881_s2 + $0x170] ss:$8 sps:$4 sm:$0xff]  }
  0x1a   : > { %732 = vmatprep.subr.bf16.mxu0 %v3502_v8  ;;  %1184 = vmatprep.subr.bf16.mxu1 %v3591_v39  ;;  %v3549_v41 = vld [vmem:[%s4043_s20 + $0x20] ss:$8 sps:$4 sm:$0xff]   ;;  %v3550_v42 = vld [vmem:[%s4043_s20 + $0x34] ss:$8 sps:$4 sm:$0xff]   ;;  %v3595_v43 = vld [vmem:[%s5881_s2 + $0x164] ss:$8 sps:$4 sm:$0xff]  }
  0x1b   : > { %1185 = vmatpush1.bf16.msra.mxu1 %v3593_v40  ;;  %v3597_v44 = vld [vmem:[%s5881_s2 + $0x160] ss:$8 sps:$4 sm:$0xff]   ;;  %v3598_v45 = vld [vmem:[%s5881_s2 + $0x154] ss:$8 sps:$4 sm:$0xff]   ;;  %v3600_v46 = vld [vmem:[%s5881_s2 + $0x150] ss:$8 sps:$4 sm:$0xff]  }
  0x1c   : > { %1186 = vmatprep.subr.bf16.mxu1 %v3595_v43  ;;  %v3552_v47 = vld [vmem:[%s4043_s20 + $0x30] ss:$8 sps:$4 sm:$0xff]   ;;  %v3553_v48 = vld [vmem:[%s4043_s20 + $0x44] ss:$8 sps:$4 sm:$0xff]   ;;  %v3604_v50 = vld [vmem:[%s5881_s2 + $0x140] ss:$8 sps:$4 sm:$0xff]  }
  0x1d   : > { %733 = vmatpush1.bf16.msra.mxu0 %v3504_v9  ;;  %v3602_v49 = vld [vmem:[%s5881_s2 + $0x144] ss:$8 sps:$4 sm:$0xff]   ;;  %v3605_v51 = vld [vmem:[%s5881_s2 + $0x134] ss:$8 sps:$4 sm:$0xff]   ;;  %v3607_v52 = vld [vmem:[%s5881_s2 + $0x130] ss:$8 sps:$4 sm:$0xff]  }
  0x1e   : > { %734 = vmatprep.subr.bf16.mxu0 %v3505_v10  ;;  %v3555_v53 = vld [vmem:[%s4043_s20 + $0x40] ss:$8 sps:$4 sm:$0xff]   ;;  %v3556_v54 = vld [vmem:[%s4043_s20 + $0x54] ss:$8 sps:$4 sm:$0xff]   ;;  %v3609_v55 = vld [vmem:[%s5881_s2 + $0x124] ss:$8 sps:$4 sm:$0xff]  }
  0x1f   : > { %1187 = vmatpush1.bf16.msra.mxu1 %v3597_v44  ;;  %v3611_v56 = vld [vmem:[%s5881_s2 + $0x120] ss:$8 sps:$4 sm:$0xff]   ;;  %v3612_v57 = vld [vmem:[%s5881_s2 + $0x114] ss:$8 sps:$4 sm:$0xff]   ;;  %v3614_v58 = vld [vmem:[%s5881_s2 + $0x110] ss:$8 sps:$4 sm:$0xff]   ;;  %v394_v44 = vlaneseq }
  0x20   : > { %1188 = vmatprep.subr.bf16.mxu1 %v3598_v45  ;;  %v3558_v59 = vld [vmem:[%s4043_s20 + $0x50] ss:$8 sps:$4 sm:$0xff]   ;;  %v3559_v60 = vld [vmem:[%s4043_s20 + $0x64] ss:$8 sps:$4 sm:$0xff]   ;;  %v3618_v62 = vld [vmem:[%s5881_s2 + $0x100] ss:$8 sps:$4 sm:$0xff]  }
  0x21   : > { %735 = vmatpush1.bf16.msra.mxu0 %v3507_v11  ;;  %v3616_v61 = vld [vmem:[%s5881_s2 + $0x104] ss:$8 sps:$4 sm:$0xff]   ;;  %v3619_v63 = vld [vmem:[%s5881_s2 + $0x1f4] ss:$8 sps:$4 sm:$0xff]   ;;  %v3621_v0 = vld [vmem:[%s5881_s2 + $0x1f0] ss:$8 sps:$4 sm:$0xff]  }
  0x22   : > { %736 = vmatprep.subr.bf16.mxu0 %v3508_v12  ;;  %v3561_v1 = vld [vmem:[%s4043_s20 + $0x60] ss:$8 sps:$4 sm:$0xff]   ;;  %v3562_v2 = vld [vmem:[%s4043_s20 + $0x74] ss:$8 sps:$4 sm:$0xff]   ;;  %v3623_v3 = vld [vmem:[%s5881_s2 + $0x1e4] ss:$8 sps:$4 sm:$0xff]  }
  0x23   : > { %1189 = vmatpush1.bf16.msra.mxu1 %v3600_v46  ;;  %v3625_v4 = vld [vmem:[%s5881_s2 + $0x1e0] ss:$8 sps:$4 sm:$0xff]   ;;  %v3626_v5 = vld [vmem:[%s5881_s2 + $0x1d4] ss:$8 sps:$4 sm:$0xff]   ;;  %v3628_v6 = vld [vmem:[%s5881_s2 + $0x1d0] ss:$8 sps:$4 sm:$0xff]  }
  0x24   : > { %1190 = vmatprep.subr.bf16.mxu1 %v3602_v49  ;;  %v3564_v7 = vld [vmem:[%s4043_s20 + $0x70] ss:$8 sps:$4 sm:$0xff]   ;;  %v3565_v8 = vld [vmem:[%s4043_s20 + $0x84] ss:$8 sps:$4 sm:$0xff]   ;;  %v3632_v10 = vld [vmem:[%s5881_s2 + $0x1c0] ss:$8 sps:$4 sm:$0xff]  }
  0x25   : > { %737 = vmatpush1.bf16.msra.mxu0 %v3510_v14  ;;  %v3630_v9 = vld [vmem:[%s5881_s2 + $0x1c4] ss:$8 sps:$4 sm:$0xff]   ;;  %v3633_v11 = vld [vmem:[%s5881_s2 + $0x1b4] ss:$8 sps:$4 sm:$0xff]   ;;  %v3635_v12 = vld [vmem:[%s5881_s2 + $0x1b0] ss:$8 sps:$4 sm:$0xff]  }
  0x26   : > { %738 = vmatprep.subr.bf16.mxu0 %v3511_v15  ;;  %v3567_v13 = vld [vmem:[%s4043_s20 + $0x80] ss:$8 sps:$4 sm:$0xff]   ;;  %v3568_v14 = vld [vmem:[%s4043_s20 + $0x94] ss:$8 sps:$4 sm:$0xff]   ;;  %v3637_v15 = vld [vmem:[%s5881_s2 + $0x1a4] ss:$8 sps:$4 sm:$0xff]  }
  0x27   : > { %1191 = vmatpush1.bf16.msra.mxu1 %v3604_v50  ;;  %v3601_v39 = vld [vmem:[%s4086_s26 + $0x18] sm:$0xff]   ;;  %v3608_v40 = vld [vmem:[%s4086_s26 + $0x20] sm:$0xff]   ;;  %v395_v45 = vshrl.u32 %v394_v44, 7 }
  0x28   : > { %1192 = vmatprep.subr.bf16.mxu1 %v3605_v51  ;;  %v3629_v43 = vld [vmem:[%s4086_s26 + $0x38] sm:$0xff]   ;;  %v3636_v46 = vld [vmem:[%s4086_s26 + $0x40] sm:$0xff]  }
  0x29   : > { %739 = vmatpush1.bf16.msra.mxu0 %v3513_v16  ;;  %v3639_v16 = vld [vmem:[%s5881_s2 + $0x1a0] ss:$8 sps:$4 sm:$0xff]  }
  0x2a   : > { %740 = vmatprep.subr.bf16.mxu0 %v3514_v17  ;;  %v3570_v17 = vld [vmem:[%s4043_s20 + $0x90] ss:$8 sps:$4 sm:$0xff]   ;;  %v389_v49 = vld [vmem:[%s5882_s3] sm:$0x3] }
  0x2b   : > { %1193 = vmatpush1.bf16.msra.mxu1 %v3607_v52 }
  0x2c   : > { %1194 = vmatprep.subr.bf16.mxu1 %v3609_v55  ;;  %v3643_v55 = vld [vmem:[%s4086_s26 + $0x48] sm:$0xff]  }
  0x2d   : > { %741 = vmatpush2.bf16.msra.mxu0 %v3516_v18  ;;  %v3640_v18 = vld [vmem:[%s5881_s2 + $0x194] ss:$8 sps:$4 sm:$0xff]  }
  0x2e   : > { %742 = vmatprep.subr.bf16.mxu0 %v3517_v19  ;;  %v3571_v19 = vld [vmem:[%s4043_s20 + $0xa4] ss:$8 sps:$4 sm:$0xff]  }
  0x2f   : > { %1195 = vmatpush1.bf16.msra.mxu1 %v3611_v56 }
  0x30   : > { %1196 = vmatprep.subr.bf16.mxu1 %v3612_v57 }
  0x31   : > { %743 = vmatpush2.bf16.msra.mxu0 %v3519_v20  ;;  %v3642_v20 = vld [vmem:[%s5881_s2 + $0x190] ss:$8 sps:$4 sm:$0xff]  }
  0x32   : > { %744 = vmatprep.subr.bf16.mxu0 %v3520_v21  ;;  %v3644_v21 = vld [vmem:[%s5881_s2 + $0x184] ss:$8 sps:$4 sm:$0xff]  }
  0x33   : > { %1197 = vmatpush1.bf16.msra.mxu1 %v3614_v58 }
  0x34   : > { %1198 = vmatprep.subr.bf16.mxu1 %v3616_v61 }
  0x35   : > { %745 = vmatpush2.bf16.msra.mxu0 %v3522_v22  ;;  %v3646_v22 = vld [vmem:[%s5881_s2 + $0x180] ss:$8 sps:$4 sm:$0xff]  }
  0x36   : > { %746 = vmatprep.subr.bf16.mxu0 %v3523_v23  ;;  %v3573_v23 = vld [vmem:[%s4043_s20 + $0xa0] ss:$8 sps:$4 sm:$0xff]  }
  0x37   : > { %1199 = vmatpush1.bf16.msra.mxu1 %v3618_v62 }
  0x38   : > { %1200 = vmatprep.subr.bf16.mxu1 %v3619_v63 }
  0x39   : > { %747 = vmatpush2.bf16.msra.mxu0 %v3525_v24  ;;  %v3574_v24 = vld [vmem:[%s4043_s20 + $0xb4] ss:$8 sps:$4 sm:$0xff]  }
  0x3a   : > { %748 = vmatprep.subr.bf16.mxu0 %v3526_v25  ;;  %v3649_v25 = vld [vmem:[%s5881_s2 + $0x274] ss:$8 sps:$4 sm:$0xff]  }
  0x3b   : > { %1201 = vmatpush2.bf16.msra.mxu1 %v3621_v0 }
  0x3c   : > { %1202 = vmatprep.subr.bf16.mxu1 %v3623_v3 }
  0x3d   : > { %749 = vmatpush2.bf16.msra.mxu0 %v3528_v26  ;;  %v3576_v26 = vld [vmem:[%s4043_s20 + $0xb0] ss:$8 sps:$4 sm:$0xff]  }
  0x3e   : > { %750 = vmatprep.subr.bf16.mxu0 %v3529_v27  ;;  %v3577_v27 = vld [vmem:[%s4043_s20 + $0xc4] ss:$8 sps:$4 sm:$0xff]  }
  0x3f   : > { %1203 = vmatpush2.bf16.msra.mxu1 %v3625_v4  ;;  %v3647_v4 = vld [vmem:[%s5881_s2 + $0x270] ss:$8 sps:$4 sm:$0xff]  }
  0x40   : > { %1204 = vmatprep.subr.bf16.mxu1 %v3626_v5 }
  0x41   : > { %751 = vmatpush2.bf16.msra.mxu0 %v3531_v28  ;;  %v3579_v28 = vld [vmem:[%s4043_s20 + $0xc0] ss:$8 sps:$4 sm:$0xff]  }
  0x42   : > { %752 = vmatprep.subr.bf16.mxu0 %v3532_v29  ;;  %v3580_v29 = vld [vmem:[%s4043_s20 + $0xd4] ss:$8 sps:$4 sm:$0xff]  }
  0x43   : > { %1205 = vmatpush2.bf16.msra.mxu1 %v3628_v6 }
  0x44   : > { %1206 = vmatprep.subr.bf16.mxu1 %v3630_v9 }
  0x45   : > { %753 = vmatpush2.bf16.msra.mxu0 %v3534_v30  ;;  %v3582_v30 = vld [vmem:[%s4043_s20 + $0xd0] ss:$8 sps:$4 sm:$0xff]  }
  0x46   : > { %754 = vmatprep.subr.bf16.mxu0 %v3535_v31  ;;  %v3583_v31 = vld [vmem:[%s4043_s20 + $0xe4] ss:$8 sps:$4 sm:$0xff]  }
  0x47   : > { %1207 = vmatpush2.bf16.msra.mxu1 %v3632_v10 }
  0x48   : > { %1208 = vmatprep.subr.bf16.mxu1 %v3633_v11 }
  0x49   : > { %755 = vmatpush2.bf16.msra.mxu0 %v3537_v32  ;;  %v3585_v32 = vld [vmem:[%s4043_s20 + $0xe0] ss:$8 sps:$4 sm:$0xff]  }
  0x4a   : > { %1605 = vmatprep.subr.bf16.mxu0 %v3543_v33  ;;  %v3586_v33 = vld [vmem:[%s4043_s20 + $0xf4] ss:$8 sps:$4 sm:$0xff]  }
  0x4b   : > { %1209 = vmatpush2.bf16.msra.mxu1 %v3635_v12 }
  0x4c   : > { %757 = vmatmul.mubr.bf16.vlgmr.msra.gmra.mxu0 %v3538_v34  ;;  %1210 = vmatprep.subr.bf16.mxu1 %v3637_v15  ;;  %v3588_v34 = vld [vmem:[%s4043_s20 + $0xf0] ss:$8 sps:$4 sm:$0xff]  }
  0x4d   : > { %1606 = vmatpush1.bf16.msra.mxu0 %v3541_v35  ;;  %766 = vmatprep.mubr.bf16.mxu0 %v3544_v36  ;;  %v3965_v35 = vmov 0   ;;  %v3589_v36 = vld [vmem:[%s4086_s26] sm:$0xff]  }
  0x4f   : > { %1211 = vmatpush2.bf16.msra.mxu1 %v3639_v16 }
  0x50   : > { %1212 = vmatprep.subr.bf16.mxu1 %v3640_v18 }
  0x53   : > { %1213 = vmatpush2.bf16.msra.mxu1 %v3642_v20 }
  0x54   : > { %767 = vmatmul.mubr.bf16.gmra.mxu0 %v3546_v37  ;;  %1214 = vmatprep.subr.bf16.mxu1 %v3644_v21  ;;  %v3590_v37 = vld [vmem:[%s4086_s26 + $0x8] sm:$0xff]  }
  0x55   : > { %776 = vmatprep.mubr.bf16.mxu0 %v3547_v38  ;;  %v3594_v38 = vld [vmem:[%s4086_s26 + $0x10] sm:$0xff]  }
  0x57   : > { %1215 = vmatpush2.bf16.msra.mxu1 %v3646_v22 }
  0x58   : > { %2051 = vmatprep.subr.bf16.mxu1 %v3649_v25 }
  0x5c   : > { %777 = vmatmul.mubr.bf16.gmra.mxu0 %v3549_v41  ;;  %v3615_v41 = vld [vmem:[%s4086_s26 + $0x28] sm:$0xff]  }
  0x5d   : > { %786 = vmatprep.mubr.bf16.mxu0 %v3550_v42  ;;  %v3622_v42 = vld [vmem:[%s4086_s26 + $0x30] sm:$0xff]  }
  0x64   : > { %787 = vmatmul.mubr.bf16.gmra.mxu0 %v3552_v47  ;;  %v4274_v47 = vsub.s32 1, %v395_v45 }
  0x65   : > { %796 = vmatprep.mubr.bf16.mxu0 %v3553_v48  ;;  %v4276_v48 = vsub.s32 0, %v395_v45 }
  0x66   : > { %5998 = vst [vmem:[#allocation2_spill] sm:$0xff] %v4274_v47  ;;  %v4283_v51 = vrot.slane %v389_v49, %v4274_v47 }
  0x67   : > { %5999 = vst [vmem:[#allocation3_spill] sm:$0xff] %v4276_v48  ;;  %v4287_v52 = vrot.slane %v389_v49, %v4276_v48  ;;  %v3669_v49 = vld [vmem:[%s5881_s2 + $0x224] ss:$8 sps:$4 sm:$0xff]  }
  0x6c   : > { %797 = vmatmul.mubr.bf16.gmra.mxu0 %v3555_v53 }
  0x6d   : > { %806 = vmatprep.mubr.bf16.mxu0 %v3556_v54 }
  0x74   : > { %807 = vmatmul.mubr.bf16.gmra.mxu0 %v3558_v59 }
  0x75   : > { %816 = vmatprep.mubr.bf16.mxu0 %v3559_v60 }
  0x7c   : > { %817 = vmatmul.mubr.bf16.gmra.mxu0 %v3561_v1 }
  0x7d   : > { %826 = vmatprep.mubr.bf16.mxu0 %v3562_v2 }
  0x84   : > { %827 = vmatmul.mubr.bf16.gmra.mxu0 %v3564_v7  ;;  %v3650_v7 = vld [vmem:[%s4086_s26 + $0x50] sm:$0xff]  }
  0x85   : > { %836 = vmatprep.mubr.bf16.mxu0 %v3565_v8  ;;  %v3653_v8 = vld [vmem:[%s5881_s2 + $0x264] ss:$8 sps:$4 sm:$0xff]  }
  0x8c   : > { %837 = vmatmul.mubr.bf16.gmra.mxu0 %v3567_v13 }
  0x8d   : > { %846 = vmatprep.mubr.bf16.mxu0 %v3568_v14  ;;  %v3651_v14 = vld [vmem:[%s5881_s2 + $0x260] ss:$8 sps:$4 sm:$0xff]  }
  0x94   : > { %847 = vmatmul.mubr.bf16.gmra.mxu0 %v3570_v17  ;;  %v3657_v17 = vld [vmem:[%s5881_s2 + $0x254] ss:$8 sps:$4 sm:$0xff]  }
  0x95   : > { %856 = vmatprep.mubr.bf16.mxu0 %v3571_v19 }
  0x9c   : > { %857 = vmatmul.mubr.bf16.gmra.mxu0 %v3573_v23  ;;  %v3655_v23 = vld [vmem:[%s5881_s2 + $0x250] ss:$8 sps:$4 sm:$0xff]  }
  0x9d   : > { %866 = vmatprep.mubr.bf16.mxu0 %v3574_v24 }
  0xa4   : > { %867 = vmatmul.mubr.bf16.gmra.mxu0 %v3576_v26  ;;  %v3654_v26 = vld [vmem:[%s4086_s26 + $0x58] sm:$0xff]  }
  0xa5   : > { %876 = vmatprep.mubr.bf16.mxu0 %v3577_v27  ;;  %v3661_v27 = vld [vmem:[%s5881_s2 + $0x244] ss:$8 sps:$4 sm:$0xff]  }
  0xac   : > { %877 = vmatmul.mubr.bf16.gmra.mxu0 %v3579_v28 }
  0xad   : > { %886 = vmatprep.mubr.bf16.mxu0 %v3580_v29 }
  0xb4   : > { %887 = vmatmul.mubr.bf16.gmra.mxu0 %v3582_v30 }
  0xb5   : > { %896 = vmatprep.mubr.bf16.mxu0 %v3583_v31 }
  0xbc   : > { %897 = vmatmul.mubr.bf16.gmra.mxu0 %v3585_v32 }
  0xbd   : > { %906 = vmatprep.mubr.bf16.mxu0 %v3586_v33  ;;  %v3659_v33 = vld [vmem:[%s5881_s2 + $0x240] ss:$8 sps:$4 sm:$0xff]  }
  0xc4   : > { %907 = vmatmul.mubr.bf16.gmra.mxu0 %v3588_v34 }
  0xc5   : > { %1623 = vmatprep.mubr.bf16.mxu0 %v3965_v35 }
  0xcc   : > { %3430 = vmatmul.mubr.msk.bf16.vlgmr.msra.gmra.mxu0 %vm1542_vm0, %v3589_v36 }
  0xcd   : > { %1633 = vmatprep.mubr.bf16.mxu0 %v3965_v35 }
  0xd4   : > { %3431 = vmatmul.mubr.msk.bf16.gmra.mxu0 %vm1542_vm0, %v3590_v37  ;;  %v3665_v37 = vld [vmem:[%s5881_s2 + $0x234] ss:$8 sps:$4 sm:$0xff]  }
  0xd5   : > { %1643 = vmatprep.mubr.bf16.mxu0 %v3965_v35 }
  0xdc   : > { %3432 = vmatmul.mubr.msk.bf16.gmra.mxu0 %vm1542_vm0, %v3594_v38 }
  0xdd   : > { %1653 = vmatprep.mubr.bf16.mxu0 %v3965_v35 }
  0xe4   : > { %3433 = vmatmul.mubr.msk.bf16.gmra.mxu0 %vm1542_vm0, %v3601_v39 }
  0xe5   : > { %1663 = vmatprep.mubr.bf16.mxu0 %v3965_v35 }
  0xec   : > { %3434 = vmatmul.mubr.msk.bf16.gmra.mxu0 %vm1542_vm0, %v3608_v40 }
  0xed   : > { %1673 = vmatprep.mubr.bf16.mxu0 %v3965_v35 }
  0xf4   : > { %3435 = vmatmul.mubr.msk.bf16.gmra.mxu0 %vm1542_vm0, %v3615_v41 }
  0xf5   : > { %1683 = vmatprep.mubr.bf16.mxu0 %v3965_v35 }
  0xfc   : > { %3436 = vmatmul.mubr.msk.bf16.gmra.mxu0 %vm1542_vm0, %v3622_v42 }
  0xfd   : > { %1693 = vmatprep.mubr.bf16.mxu0 %v3965_v35 }
 0x104   : > { %3437 = vmatmul.mubr.msk.bf16.gmra.mxu0 %vm1542_vm0, %v3629_v43  ;;  %v3663_v43 = vld [vmem:[%s5881_s2 + $0x230] ss:$8 sps:$4 sm:$0xff]  }
 0x105   : > { %1703 = vmatprep.mubr.bf16.mxu0 %v3965_v35 }
 0x10c   : > { %v758_v50 = vpop.f32.mrf.mxu0  ;;  %3438 = vmatmul.mubr.msk.bf16.gmra.mxu0 %vm1542_vm0, %v3636_v46  ;;  %v3658_v46 = vld [vmem:[%s4086_s26 + $0x60] sm:$0xff]  }
 0x10d   : > { %1713 = vmatprep.mubr.bf16.mxu0 %v3965_v35  ;;  %v759_v58 = vadd.f32 %v758_v50, %v4287_v52 }
 0x10e   : > { %v760_v53 = vpop.f32.mrf.mxu0 }
 0x10f   : > { %v761_v56 = vadd.f32 %v760_v53, %v4283_v51  ;;  %v917_v1 = vmax.f32 %v759_v58, 0.0 }
 0x110   : > { %v762_v54 = vpop.f32.mrf.mxu0 }
 0x111   : > { %v763_v57 = vadd.f32 %v762_v54, %v4287_v52  ;;  %v918_v63 = vmax.f32 %v761_v56, 0.0 }
 0x112   : > { %v764_v59 = vpop.f32.mrf.mxu0 }
 0x113   : > { %v765_v60 = vadd.f32 %v764_v59, %v4283_v51  ;;  %v919_v61 = vmax.f32 %v763_v57, 0.0  ;;  %v3667_v57 = vld [vmem:[%s5881_s2 + $0x220] ss:$8 sps:$4 sm:$0xff]  }
 0x114   : > { %v768_v62 = vpop.f32.mrf.mxu0  ;;  %3439 = vmatmul.mubr.msk.bf16.gmra.mxu0 %vm1542_vm0, %v3643_v55 }
 0x115   : > { %v920_v0 = vmax.f32 %v765_v60, 0.0  ;;  %1723 = vmatprep.mubr.bf16.mxu0 %v3965_v35  ;;  %v981_v5 = vpack.c.bf16 %v919_v61, %v917_v1  ;;  %v769_v11 = vadd.f32 %v768_v62, %v4287_v52  ;;  %v3673_v60 = vld [vmem:[%s5881_s2 + $0x214] ss:$8 sps:$4 sm:$0xff]  }
 0x116   : > { %v770_v2 = vpop.f32.mrf.mxu0 }
 0x117   : > { %v982_v3 = vpack.c.bf16 %v920_v0, %v918_v63  ;;  %v771_v9 = vadd.f32 %v770_v2, %v4283_v51  ;;  %v921_v20 = vmax.f32 %v769_v11, 0.0  ;;  %v3671_v2 = vld [vmem:[%s5881_s2 + $0x210] ss:$8 sps:$4 sm:$0xff]  }
 0x118   : > { %v772_v6 = vpop.f32.mrf.mxu0 }
 0x119   : > { %v773_v10 = vadd.f32 %v772_v6, %v4287_v52  ;;  %1216 = vmatprep.mubr.bf16.mxu1 %v982_v3  ;;  %v922_v18 = vmax.f32 %v771_v9, 0.0  ;;  %v3676_v6 = vld [vmem:[%s5881_s2 + $0x204] ss:$8 sps:$4 sm:$0xff]  }
 0x11a   : > { %v774_v12 = vpop.f32.mrf.mxu0  ;;  %1217 = vmatmul.mubr.bf16.vlgmr.msra.gmra.mxu1 %v981_v5  ;;  %v3662_v5 = vld [vmem:[%s4086_s26 + $0x68] sm:$0xff]  }
 0x11b   : > { %v775_v13 = vadd.f32 %v774_v12, %v4283_v51  ;;  %2052 = vmatpush1.bf16.msra.mxu1 %v3647_v4  ;;  %v923_v15 = vmax.f32 %v773_v10, 0.0  ;;  %v3674_v12 = vld [vmem:[%s5881_s2 + $0x200] ss:$8 sps:$4 sm:$0xff]  }
 0x11c   : > { %v778_v16 = vpop.f32.mrf.mxu0  ;;  %3440 = vmatmul.mubr.msk.bf16.gmra.mxu0 %vm1542_vm0, %v3650_v7  ;;  %2053 = vmatprep.subr.bf16.mxu1 %v3653_v8 }
 0x11d   : > { %v924_v19 = vmax.f32 %v775_v13, 0.0  ;;  %1733 = vmatprep.mubr.bf16.mxu0 %v3965_v35  ;;  %v983_v24 = vpack.c.bf16 %v923_v15, %v921_v20  ;;  %v779_v30 = vadd.f32 %v778_v16, %v4287_v52  ;;  %v3679_v15 = vld [vmem:[%s5881_s2 + $0x2f4] ss:$8 sps:$4 sm:$0xff]  }
 0x11e   : > { %v780_v21 = vpop.f32.mrf.mxu0 }
 0x11f   : > { %v984_v22 = vpack.c.bf16 %v924_v19, %v922_v18  ;;  %2054 = vmatpush1.bf16.msra.mxu1 %v3651_v14  ;;  %v781_v28 = vadd.f32 %v780_v21, %v4283_v51  ;;  %v925_v40 = vmax.f32 %v779_v30, 0.0  ;;  %v3677_v21 = vld [vmem:[%s5881_s2 + $0x2f0] ss:$8 sps:$4 sm:$0xff]  }
 0x120   : > { %v782_v25 = vpop.f32.mrf.mxu0  ;;  %2055 = vmatprep.subr.bf16.mxu1 %v3657_v17 }
 0x121   : > { %v783_v29 = vadd.f32 %v782_v25, %v4287_v52  ;;  %1226 = vmatprep.mubr.bf16.mxu1 %v984_v22  ;;  %v926_v38 = vmax.f32 %v781_v28, 0.0  ;;  %v3682_v25 = vld [vmem:[%s5881_s2 + $0x2e4] ss:$8 sps:$4 sm:$0xff]  }
 0x122   : > { %v784_v31 = vpop.f32.mrf.mxu0  ;;  %1227 = vmatmul.mubr.bf16.gmra.mxu1 %v983_v24  ;;  %v3666_v24 = vld [vmem:[%s4086_s26 + $0x70] sm:$0xff]  }
 0x123   : > { %v785_v32 = vadd.f32 %v784_v31, %v4283_v51  ;;  %2056 = vmatpush1.bf16.msra.mxu1 %v3655_v23  ;;  %v927_v34 = vmax.f32 %v783_v29, 0.0  ;;  %v3680_v31 = vld [vmem:[%s5881_s2 + $0x2e0] ss:$8 sps:$4 sm:$0xff]  }
 0x124   : > { %v788_v36 = vpop.f32.mrf.mxu0  ;;  %3441 = vmatmul.mubr.msk.bf16.gmra.mxu0 %vm1542_vm0, %v3654_v26  ;;  %2057 = vmatprep.subr.bf16.mxu1 %v3661_v27 }
 0x125   : > { %v928_v39 = vmax.f32 %v785_v32, 0.0  ;;  %1743 = vmatprep.mubr.bf16.mxu0 %v3965_v35  ;;  %v985_v44 = vpack.c.bf16 %v927_v34, %v925_v40  ;;  %v789_v54 = vadd.f32 %v788_v36, %v4287_v52  ;;  %v3685_v34 = vld [vmem:[%s5881_s2 + $0x2d4] ss:$8 sps:$4 sm:$0xff]  }
 0x126   : > { %v790_v41 = vpop.f32.mrf.mxu0 }
 0x127   : > { %v986_v42 = vpack.c.bf16 %v928_v39, %v926_v38  ;;  %2058 = vmatpush1.bf16.msra.mxu1 %v3659_v33  ;;  %v791_v50 = vadd.f32 %v790_v41, %v4283_v51  ;;  %v929_v63 = vmax.f32 %v789_v54, 0.0  ;;  %v3683_v41 = vld [vmem:[%s5881_s2 + $0x2d0] ss:$8 sps:$4 sm:$0xff]   ;;  %v3686_v54 = vld [vmem:[%s5881_s2 + $0x2c0] ss:$8 sps:$4 sm:$0xff]  }
 0x128   : > { %v792_v45 = vpop.f32.mrf.mxu0  ;;  %2059 = vmatprep.subr.bf16.mxu1 %v3665_v37 }
 0x129   : > { %v793_v53 = vadd.f32 %v792_v45, %v4287_v52  ;;  %1236 = vmatprep.mubr.bf16.mxu1 %v986_v42  ;;  %v930_v61 = vmax.f32 %v791_v50, 0.0  ;;  %v3688_v45 = vld [vmem:[%s5881_s2 + $0x2c4] ss:$8 sps:$4 sm:$0xff]  }
 0x12a   : > { %v794_v55 = vpop.f32.mrf.mxu0  ;;  %1237 = vmatmul.mubr.bf16.gmra.mxu1 %v985_v44  ;;  %v3670_v44 = vld [vmem:[%s4086_s26 + $0x78] sm:$0xff]  }
 0x12b   : > { %v795_v56 = vadd.f32 %v794_v55, %v4283_v51  ;;  %2060 = vmatpush1.bf16.msra.mxu1 %v3663_v43  ;;  %v931_v58 = vmax.f32 %v793_v53, 0.0 }
 0x12c   : > { %v798_v59 = vpop.f32.mrf.mxu0  ;;  %3442 = vmatmul.mubr.msk.bf16.gmra.mxu0 %vm1542_vm0, %v3658_v46  ;;  %2061 = vmatprep.subr.bf16.mxu1 %v3669_v49 }
 0x12d   : > { %v932_v62 = vmax.f32 %v795_v56, 0.0  ;;  %1753 = vmatprep.mubr.bf16.mxu0 %v3965_v35  ;;  %v987_v3 = vpack.c.bf16 %v931_v58, %v929_v63  ;;  %v799_v9 = vadd.f32 %v798_v59, %v4287_v52  ;;  %v3689_v63 = vld [vmem:[%s5881_s2 + $0x2b0] ss:$8 sps:$4 sm:$0xff]  }
 0x12e   : > { %v800_v0 = vpop.f32.mrf.mxu0 }
 0x12f   : > { %v988_v1 = vpack.c.bf16 %v932_v62, %v930_v61  ;;  %2062 = vmatpush1.bf16.msra.mxu1 %v3667_v57  ;;  %v801_v7 = vadd.f32 %v800_v0, %v4283_v51  ;;  %v933_v18 = vmax.f32 %v799_v9, 0.0  ;;  %v3691_v57 = vld [vmem:[%s5881_s2 + $0x2b4] ss:$8 sps:$4 sm:$0xff]  }
 0x130   : > { %v802_v4 = vpop.f32.mrf.mxu0  ;;  %2063 = vmatprep.subr.bf16.mxu1 %v3673_v60 }
 0x131   : > { %v803_v8 = vadd.f32 %v802_v4, %v4287_v52  ;;  %1246 = vmatprep.mubr.bf16.mxu1 %v988_v1  ;;  %v934_v16 = vmax.f32 %v801_v7, 0.0 }
 0x132   : > { %v804_v10 = vpop.f32.mrf.mxu0  ;;  %1247 = vmatmul.mubr.bf16.gmra.mxu1 %v987_v3 }
 0x133   : > { %v805_v11 = vadd.f32 %v804_v10, %v4283_v51  ;;  %2064 = vmatpush1.bf16.msra.mxu1 %v3671_v2  ;;  %v935_v13 = vmax.f32 %v803_v8, 0.0  ;;  %v3694_v2 = vld [vmem:[%s5881_s2 + $0x2a4] ss:$8 sps:$4 sm:$0xff]   ;;  %v3692_v8 = vld [vmem:[%s5881_s2 + $0x2a0] ss:$8 sps:$4 sm:$0xff]  }
 0x134   : > { %v808_v14 = vpop.f32.mrf.mxu0  ;;  %3443 = vmatmul.mubr.msk.bf16.gmra.mxu0 %vm1542_vm0, %v3662_v5  ;;  %2065 = vmatprep.subr.bf16.mxu1 %v3676_v6 }
 0x135   : > { %v936_v17 = vmax.f32 %v805_v11, 0.0  ;;  %1763 = vmatprep.mubr.bf16.mxu0 %v3965_v35  ;;  %v989_v22 = vpack.c.bf16 %v935_v13, %v933_v18  ;;  %v809_v28 = vadd.f32 %v808_v14, %v4287_v52  ;;  %v3697_v11 = vld [vmem:[%s5881_s2 + $0x294] ss:$8 sps:$4 sm:$0xff]  }
 0x136   : > { %v810_v19 = vpop.f32.mrf.mxu0 }
 0x137   : > { %v990_v20 = vpack.c.bf16 %v936_v17, %v934_v16  ;;  %2066 = vmatpush1.bf16.msra.mxu1 %v3674_v12  ;;  %v811_v26 = vadd.f32 %v810_v19, %v4283_v51  ;;  %v937_v38 = vmax.f32 %v809_v28, 0.0  ;;  %v3695_v17 = vld [vmem:[%s5881_s2 + $0x290] ss:$8 sps:$4 sm:$0xff]  }
 0x138   : > { %v812_v23 = vpop.f32.mrf.mxu0  ;;  %2067 = vmatprep.subr.bf16.mxu1 %v3679_v15 }
 0x139   : > { %v813_v27 = vadd.f32 %v812_v23, %v4287_v52  ;;  %1256 = vmatprep.mubr.bf16.mxu1 %v990_v20  ;;  %v938_v36 = vmax.f32 %v811_v26, 0.0  ;;  %v3700_v20 = vld [vmem:[%s5881_s2 + $0x284] ss:$8 sps:$4 sm:$0xff]   ;;  %v3698_v26 = vld [vmem:[%s5881_s2 + $0x280] ss:$8 sps:$4 sm:$0xff]  }
 0x13a   : > { %v814_v29 = vpop.f32.mrf.mxu0  ;;  %1257 = vmatmul.mubr.bf16.gmra.mxu1 %v989_v22 }
 0x13b   : > { %v815_v30 = vadd.f32 %v814_v29, %v4283_v51  ;;  %2068 = vmatpush2.bf16.msra.mxu1 %v3677_v21  ;;  %v939_v32 = vmax.f32 %v813_v27, 0.0 }
 0x13c   : > { %v818_v33 = vpop.f32.mrf.mxu0  ;;  %3444 = vmatmul.mubr.msk.bf16.gmra.mxu0 %vm1542_vm0, %v3666_v24  ;;  %2069 = vmatprep.subr.bf16.mxu1 %v3682_v25 }
 0x13d   : > { %v940_v37 = vmax.f32 %v815_v30, 0.0  ;;  %1773 = vmatprep.mubr.bf16.mxu0 %v3965_v35  ;;  %v991_v42 = vpack.c.bf16 %v939_v32, %v937_v38  ;;  %v819_v49 = vadd.f32 %v818_v33, %v4287_v52 }
 0x13e   : > { %v820_v39 = vpop.f32.mrf.mxu0 }
 0x13f   : > { %v992_v40 = vpack.c.bf16 %v940_v37, %v938_v36  ;;  %2070 = vmatpush2.bf16.msra.mxu1 %v3680_v31  ;;  %v821_v46 = vadd.f32 %v820_v39, %v4283_v51  ;;  %v941_v60 = vmax.f32 %v819_v49, 0.0 }
 0x140   : > { %v822_v43 = vpop.f32.mrf.mxu0  ;;  %2071 = vmatprep.subr.bf16.mxu1 %v3685_v34 }
 0x141   : > { %v823_v35 = vadd.f32 %v822_v43, %v4287_v52  ;;  %1266 = vmatprep.mubr.bf16.mxu1 %v992_v40  ;;  %v942_v58 = vmax.f32 %v821_v46, 0.0 }
 0x142   : > { %v824_v50 = vpop.f32.mrf.mxu0  ;;  %1267 = vmatmul.mubr.bf16.gmra.mxu1 %v991_v42 }
 0x143   : > { %v825_v53 = vadd.f32 %v824_v50, %v4283_v51  ;;  %2072 = vmatpush2.bf16.msra.mxu1 %v3683_v41  ;;  %v943_v55 = vmax.f32 %v823_v35, 0.0 }
 0x144   : > { %v828_v56 = vpop.f32.mrf.mxu0  ;;  %3445 = vmatmul.mubr.msk.bf16.gmra.mxu0 %vm1542_vm0, %v3670_v44  ;;  %2073 = vmatprep.subr.bf16.mxu1 %v3688_v45 }
 0x145   : > { %v944_v59 = vmax.f32 %v825_v53, 0.0  ;;  %v993_v0 = vpack.c.bf16 %v943_v55, %v941_v60  ;;  %v829_v5 = vadd.f32 %v828_v56, %v4287_v52 }
 0x146   : > { %v830_v61 = vpop.f32.mrf.mxu0 }
 0x147   : > { %v994_v62 = vpack.c.bf16 %v944_v59, %v942_v58  ;;  %2074 = vmatpush2.bf16.msra.mxu1 %v3686_v54  ;;  %v831_v3 = vadd.f32 %v830_v61, %v4283_v51  ;;  %v945_v14 = vmax.f32 %v829_v5, 0.0 }
 0x148   : > { %v832_v1 = vpop.f32.mrf.mxu0  ;;  %2075 = vmatprep.subr.bf16.mxu1 %v3691_v57 }
 0x149   : > { %v833_v4 = vadd.f32 %v832_v1, %v4287_v52  ;;  %1276 = vmatprep.mubr.bf16.mxu1 %v994_v62  ;;  %v946_v12 = vmax.f32 %v831_v3, 0.0 }
 0x14a   : > { %v834_v6 = vpop.f32.mrf.mxu0  ;;  %1277 = vmatmul.mubr.bf16.gmra.mxu1 %v993_v0 }
 0x14b   : > { %v835_v7 = vadd.f32 %v834_v6, %v4283_v51  ;;  %2076 = vmatpush2.bf16.msra.mxu1 %v3689_v63  ;;  %v947_v9 = vmax.f32 %v833_v4, 0.0 }
 0x14c   : > { %v838_v10 = vpop.f32.mrf.mxu0  ;;  %2077 = vmatprep.subr.bf16.mxu1 %v3694_v2 }
 0x14d   : > { %v948_v13 = vmax.f32 %v835_v7, 0.0  ;;  %v995_v18 = vpack.c.bf16 %v947_v9, %v945_v14  ;;  %v839_v23 = vadd.f32 %v838_v10, %v4287_v52 }
 0x14e   : > { %v840_v15 = vpop.f32.mrf.mxu0 }
 0x14f   : > { %v996_v16 = vpack.c.bf16 %v948_v13, %v946_v12  ;;  %2078 = vmatpush2.bf16.msra.mxu1 %v3692_v8  ;;  %v841_v21 = vadd.f32 %v840_v15, %v4283_v51  ;;  %v949_v31 = vmax.f32 %v839_v23, 0.0 }
 0x150   : > { %v842_v19 = vpop.f32.mrf.mxu0  ;;  %2079 = vmatprep.subr.bf16.mxu1 %v3697_v11 }
 0x151   : > { %v843_v22 = vadd.f32 %v842_v19, %v4287_v52  ;;  %1286 = vmatprep.mubr.bf16.mxu1 %v996_v16  ;;  %v950_v29 = vmax.f32 %v841_v21, 0.0 }
 0x152   : > { %v844_v24 = vpop.f32.mrf.mxu0  ;;  %1287 = vmatmul.mubr.bf16.gmra.mxu1 %v995_v18 }
 0x153   : > { %v845_v25 = vadd.f32 %v844_v24, %v4283_v51  ;;  %2080 = vmatpush2.bf16.msra.mxu1 %v3695_v17  ;;  %v951_v27 = vmax.f32 %v843_v22, 0.0 }
 0x154   : > { %v848_v28 = vpop.f32.mrf.mxu0  ;;  %2081 = vmatprep.subr.bf16.mxu1 %v3700_v20 }
 0x155   : > { %v952_v30 = vmax.f32 %v845_v25, 0.0  ;;  %v997_v34 = vpack.c.bf16 %v951_v27, %v949_v31  ;;  %v849_v39 = vadd.f32 %v848_v28, %v4287_v52 }
 0x156   : > { %v850_v32 = vpop.f32.mrf.mxu0 }
 0x157   : > { %v998_v33 = vpack.c.bf16 %v952_v30, %v950_v29  ;;  %2082 = vmatpush2.bf16.msra.mxu1 %v3698_v26  ;;  %v851_v37 = vadd.f32 %v850_v32, %v4283_v51  ;;  %v953_v46 = vmax.f32 %v849_v39, 0.0 }
 0x158   : > { %v852_v36 = vpop.f32.mrf.mxu0 }
 0x159   : > { %v853_v38 = vadd.f32 %v852_v36, %v4287_v52  ;;  %1296 = vmatprep.mubr.bf16.mxu1 %v998_v33  ;;  %v954_v44 = vmax.f32 %v851_v37, 0.0 }
 0x15a   : > { %v854_v40 = vpop.f32.mrf.mxu0  ;;  %1297 = vmatmul.mubr.bf16.gmra.mxu1 %v997_v34 }
 0x15b   : > { %v855_v41 = vadd.f32 %v854_v40, %v4283_v51  ;;  %v955_v42 = vmax.f32 %v853_v38, 0.0 }
 0x15c   : > { %v858_v43 = vpop.f32.mrf.mxu0 }
 0x15d   : > { %v956_v45 = vmax.f32 %v855_v41, 0.0  ;;  %v999_v50 = vpack.c.bf16 %v955_v42, %v953_v46  ;;  %v859_v56 = vadd.f32 %v858_v43, %v4287_v52 }
 0x15e   : > { %v860_v35 = vpop.f32.mrf.mxu0 }
 0x15f   : > { %v1000_v49 = vpack.c.bf16 %v956_v45, %v954_v44  ;;  %v861_v54 = vadd.f32 %v860_v35, %v4283_v51  ;;  %v957_v63 = vmax.f32 %v859_v56, 0.0 }
 0x160   : > { %v862_v53 = vpop.f32.mrf.mxu0 }
 0x161   : > { %v863_v55 = vadd.f32 %v862_v53, %v4287_v52  ;;  %1306 = vmatprep.mubr.bf16.mxu1 %v1000_v49  ;;  %v958_v61 = vmax.f32 %v861_v54, 0.0 }
 0x162   : > { %v864_v57 = vpop.f32.mrf.mxu0  ;;  %1307 = vmatmul.mubr.bf16.gmra.mxu1 %v999_v50 }
 0x163   : > { %v865_v58 = vadd.f32 %v864_v57, %v4283_v51  ;;  %v959_v59 = vmax.f32 %v863_v55, 0.0 }
 0x164   : > { %v868_v60 = vpop.f32.mrf.mxu0 }
 0x165   : > { %v960_v62 = vmax.f32 %v865_v58, 0.0  ;;  %v1001_v2 = vpack.c.bf16 %v959_v59, %v957_v63  ;;  %v869_v6 = vadd.f32 %v868_v60, %v4287_v52 }
 0x166   : > { %v870_v0 = vpop.f32.mrf.mxu0 }
 0x167   : > { %v1002_v1 = vpack.c.bf16 %v960_v62, %v958_v61  ;;  %v871_v4 = vadd.f32 %v870_v0, %v4283_v51  ;;  %v961_v13 = vmax.f32 %v869_v6, 0.0 }
 0x168   : > { %v872_v3 = vpop.f32.mrf.mxu0 }
 0x169   : > { %v873_v5 = vadd.f32 %v872_v3, %v4287_v52  ;;  %1316 = vmatprep.mubr.bf16.mxu1 %v1002_v1  ;;  %v962_v11 = vmax.f32 %v871_v4, 0.0 }
 0x16a   : > { %v874_v7 = vpop.f32.mrf.mxu0  ;;  %1317 = vmatmul.mubr.bf16.gmra.mxu1 %v1001_v2 }
 0x16b   : > { %v875_v8 = vadd.f32 %v874_v7, %v4283_v51  ;;  %v963_v9 = vmax.f32 %v873_v5, 0.0  ;;  %v391_v5 = vld [vmem:[%s5882_s3 + $0x4] sm:$0x3] }
 0x16c   : > { %v878_v10 = vpop.f32.mrf.mxu0 }
 0x16d   : > { %v964_v12 = vmax.f32 %v875_v8, 0.0  ;;  %v1003_v16 = vpack.c.bf16 %v963_v9, %v961_v13  ;;  %v879_v20 = vadd.f32 %v878_v10, %v4287_v52  ;;  %v4470_v10 = vrot.slane %v391_v5, %v4274_v47 }
 0x16e   : > { %v880_v14 = vpop.f32.mrf.mxu0 }
 0x16f   : > { %v1004_v15 = vpack.c.bf16 %v964_v12, %v962_v11  ;;  %v881_v18 = vadd.f32 %v880_v14, %v4283_v51  ;;  %v965_v27 = vmax.f32 %v879_v20, 0.0  ;;  %v4473_v12 = vrot.slane %v391_v5, %v4276_v48 }
 0x170   : > { %v882_v17 = vpop.f32.mrf.mxu0 }
 0x171   : > { %v883_v19 = vadd.f32 %v882_v17, %v4287_v52  ;;  %1326 = vmatprep.mubr.bf16.mxu1 %v1004_v15  ;;  %v966_v25 = vmax.f32 %v881_v18, 0.0 }
 0x172   : > { %v884_v21 = vpop.f32.mrf.mxu0  ;;  %1327 = vmatmul.mubr.bf16.gmra.mxu1 %v1003_v16 }
 0x173   : > { %v885_v22 = vadd.f32 %v884_v21, %v4283_v51  ;;  %v967_v23 = vmax.f32 %v883_v19, 0.0 }
 0x174   : > { %v888_v24 = vpop.f32.mrf.mxu0 }
 0x175   : > { %v968_v26 = vmax.f32 %v885_v22, 0.0  ;;  %v1005_v30 = vpack.c.bf16 %v967_v23, %v965_v27  ;;  %v889_v34 = vadd.f32 %v888_v24, %v4287_v52 }
 0x176   : > { %v890_v28 = vpop.f32.mrf.mxu0 }
 0x177   : > { %v1006_v29 = vpack.c.bf16 %v968_v26, %v966_v25  ;;  %v891_v32 = vadd.f32 %v890_v28, %v4283_v51  ;;  %v969_v42 = vmax.f32 %v889_v34, 0.0 }
 0x178   : > { %v892_v31 = vpop.f32.mrf.mxu0 }
 0x179   : > { %v893_v33 = vadd.f32 %v892_v31, %v4287_v52  ;;  %1336 = vmatprep.mubr.bf16.mxu1 %v1006_v29  ;;  %v970_v40 = vmax.f32 %v891_v32, 0.0 }
 0x17a   : > { %v894_v36 = vpop.f32.mrf.mxu0  ;;  %1337 = vmatmul.mubr.bf16.gmra.mxu1 %v1005_v30 }
 0x17b   : > { %v895_v37 = vadd.f32 %v894_v36, %v4283_v51  ;;  %v971_v38 = vmax.f32 %v893_v33, 0.0 }
 0x17c   : > { %v898_v39 = vpop.f32.mrf.mxu0 }
 0x17d   : > { %v972_v41 = vmax.f32 %v895_v37, 0.0  ;;  %v1007_v45 = vpack.c.bf16 %v971_v38, %v969_v42  ;;  %v899_v50 = vadd.f32 %v898_v39, %v4287_v52 }
 0x17e   : > { %v900_v43 = vpop.f32.mrf.mxu0 }
 0x17f   : > { %v1008_v44 = vpack.c.bf16 %v972_v41, %v970_v40  ;;  %v901_v35 = vadd.f32 %v900_v43, %v4283_v51  ;;  %v973_v59 = vmax.f32 %v899_v50, 0.0 }
 0x180   : > { %v902_v46 = vpop.f32.mrf.mxu0 }
 0x181   : > { %v903_v49 = vadd.f32 %v902_v46, %v4287_v52  ;;  %1346 = vmatprep.mubr.bf16.mxu1 %v1008_v44  ;;  %v974_v57 = vmax.f32 %v901_v35, 0.0 }
 0x182   : > { %v904_v53 = vpop.f32.mrf.mxu0  ;;  %1347 = vmatmul.mubr.bf16.gmra.mxu1 %v1007_v45 }
 0x183   : > { %v905_v54 = vadd.f32 %v904_v53, %v4283_v51  ;;  %v975_v55 = vmax.f32 %v903_v49, 0.0 }
 0x184   : > { %v908_v56 = vpop.f32.mrf.mxu0 }
 0x185   : > { %v976_v58 = vmax.f32 %v905_v54, 0.0  ;;  %v1009_v62 = vpack.c.bf16 %v975_v55, %v973_v59  ;;  %v909_v2 = vadd.f32 %v908_v56, %v4287_v52 }
 0x186   : > { %v910_v60 = vpop.f32.mrf.mxu0 }
 0x187   : > { %v1010_v61 = vpack.c.bf16 %v976_v58, %v974_v57  ;;  %v911_v0 = vadd.f32 %v910_v60, %v4283_v51  ;;  %v977_v11 = vmax.f32 %v909_v2, 0.0 }
 0x188   : > { %v912_v63 = vpop.f32.mrf.mxu0 }
 0x189   : > { %v913_v1 = vadd.f32 %v912_v63, %v4287_v52  ;;  %1356 = vmatprep.mubr.bf16.mxu1 %v1010_v61  ;;  %v978_v8 = vmax.f32 %v911_v0, 0.0 }
 0x18a   : > { %v914_v3 = vpop.f32.mrf.mxu0  ;;  %1357 = vmatmul.mubr.bf16.gmra.mxu1 %v1009_v62 }
 0x18b   : > { %v915_v4 = vadd.f32 %v914_v3, %v4283_v51  ;;  %v979_v6 = vmax.f32 %v913_v1, 0.0 }
 0x18c   : > { %v1625_v7 = vpop.f32.mrf.mxu0 }
 0x18d   : > { %v980_v9 = vmax.f32 %v915_v4, 0.0  ;;  %v1011_v14 = vpack.c.bf16 %v979_v6, %v977_v11  ;;  %v1626_v17 = vadd.f32 %v1625_v7, %v4473_v12 }
 0x18e   : > { %v1627_v52 = vpop.f32.mrf.mxu0 }
 0x18f   : > { %v1012_v13 = vpack.c.bf16 %v980_v9, %v978_v8  ;;  %v1628_v51 = vadd.f32 %v1627_v52, %v4470_v10  ;;  %v1784_v24 = vmax.f32 %v1626_v17, 0.0 }
 0x190   : > { %v1629_v15 = vpop.f32.mrf.mxu0 }
 0x191   : > { %v1630_v16 = vadd.f32 %v1629_v15, %v4473_v12  ;;  %1366 = vmatprep.mubr.bf16.mxu1 %v1012_v13  ;;  %v1785_v22 = vmax.f32 %v1628_v51, 0.0 }
 0x192   : > { %1367 = vmatmul.mubr.bf16.gmra.mxu1 %v1011_v14  ;;  %v1631_v18 = vpop.f32.mrf.mxu0 }
 0x193   : > { %v1632_v19 = vadd.f32 %v1631_v18, %v4470_v10  ;;  %v1786_v20 = vmax.f32 %v1630_v16, 0.0 }
 0x194   : > { %v1635_v21 = vpop.f32.mrf.mxu0 }
 0x195   : > { %v1787_v23 = vmax.f32 %v1632_v19, 0.0  ;;  %v1848_v27 = vpack.c.bf16 %v1786_v20, %v1784_v24  ;;  %v1636_v31 = vadd.f32 %v1635_v21, %v4473_v12 }
 0x196   : > { %v1637_v25 = vpop.f32.mrf.mxu0 }
 0x197   : > { %v1849_v26 = vpack.c.bf16 %v1787_v23, %v1785_v22  ;;  %v1638_v29 = vadd.f32 %v1637_v25, %v4470_v10  ;;  %v1788_v39 = vmax.f32 %v1636_v31, 0.0 }
 0x198   : > { %v1639_v28 = vpop.f32.mrf.mxu0 }
 0x199   : > { %v1640_v30 = vadd.f32 %v1639_v28, %v4473_v12  ;;  %2083 = vmatprep.mubr.bf16.mxu1 %v1849_v26  ;;  %v1789_v37 = vmax.f32 %v1638_v29, 0.0 }
 0x19a   : > { %v1641_v32 = vpop.f32.mrf.mxu0  ;;  %2084 = vmatmul.mubr.bf16.vlgmr.msra.gmra.mxu1 %v1848_v27 }
 0x19b   : > { %v1642_v33 = vadd.f32 %v1641_v32, %v4470_v10  ;;  %v1790_v34 = vmax.f32 %v1640_v30, 0.0 }
 0x19c   : > { %v1645_v36 = vpop.f32.mrf.mxu0 }
 0x19d   : > { %v1791_v38 = vmax.f32 %v1642_v33, 0.0  ;;  %v1850_v42 = vpack.c.bf16 %v1790_v34, %v1788_v39  ;;  %v1646_v46 = vadd.f32 %v1645_v36, %v4473_v12 }
 0x19e   : > { %v1647_v40 = vpop.f32.mrf.mxu0 }
 0x19f   : > { %v1851_v41 = vpack.c.bf16 %v1791_v38, %v1789_v37  ;;  %v1648_v44 = vadd.f32 %v1647_v40, %v4470_v10  ;;  %v1792_v56 = vmax.f32 %v1646_v46, 0.0 }
 0x1a0   : > { %v1649_v43 = vpop.f32.mrf.mxu0 }
 0x1a1   : > { %v1650_v45 = vadd.f32 %v1649_v43, %v4473_v12  ;;  %2093 = vmatprep.mubr.bf16.mxu1 %v1851_v41  ;;  %v1793_v54 = vmax.f32 %v1648_v44, 0.0 }
 0x1a2   : > { %v1651_v35 = vpop.f32.mrf.mxu0  ;;  %2094 = vmatmul.mubr.bf16.gmra.mxu1 %v1850_v42 }
 0x1a3   : > { %v1652_v49 = vadd.f32 %v1651_v35, %v4470_v10  ;;  %v1794_v50 = vmax.f32 %v1650_v45, 0.0 }
 0x1a4   : > { %v1655_v53 = vpop.f32.mrf.mxu0 }
 0x1a5   : > { %v1795_v55 = vmax.f32 %v1652_v49, 0.0  ;;  %v1852_v59 = vpack.c.bf16 %v1794_v50, %v1792_v56  ;;  %v1656_v63 = vadd.f32 %v1655_v53, %v4473_v12 }
 0x1a6   : > { %v1657_v57 = vpop.f32.mrf.mxu0 }
 0x1a7   : > { %v1853_v58 = vpack.c.bf16 %v1795_v55, %v1793_v54  ;;  %v1658_v61 = vadd.f32 %v1657_v57, %v4470_v10  ;;  %v1796_v6 = vmax.f32 %v1656_v63, 0.0 }
 0x1a8   : > { %v1659_v60 = vpop.f32.mrf.mxu0 }
 0x1a9   : > { %v1660_v62 = vadd.f32 %v1659_v60, %v4473_v12  ;;  %2103 = vmatprep.mubr.bf16.mxu1 %v1853_v58  ;;  %v1797_v4 = vmax.f32 %v1658_v61, 0.0 }
 0x1aa   : > { %v1661_v0 = vpop.f32.mrf.mxu0  ;;  %2104 = vmatmul.mubr.bf16.gmra.mxu1 %v1852_v59 }
 0x1ab   : > { %v1662_v1 = vadd.f32 %v1661_v0, %v4470_v10  ;;  %v1798_v2 = vmax.f32 %v1660_v62, 0.0 }
 0x1ac   : > { %v1665_v3 = vpop.f32.mrf.mxu0 }
 0x1ad   : > { %v1799_v5 = vmax.f32 %v1662_v1, 0.0  ;;  %v1854_v9 = vpack.c.bf16 %v1798_v2, %v1796_v6  ;;  %v1666_v14 = vadd.f32 %v1665_v3, %v4473_v12 }
 0x1ae   : > { %v1667_v7 = vpop.f32.mrf.mxu0 }
 0x1af   : > { %v1855_v8 = vpack.c.bf16 %v1799_v5, %v1797_v4  ;;  %v1668_v52 = vadd.f32 %v1667_v7, %v4470_v10  ;;  %v1800_v20 = vmax.f32 %v1666_v14, 0.0 }
 0x1b0   : > { %v1669_v11 = vpop.f32.mrf.mxu0 }
 0x1b1   : > { %v1670_v13 = vadd.f32 %v1669_v11, %v4473_v12  ;;  %2113 = vmatprep.mubr.bf16.mxu1 %v1855_v8  ;;  %v1801_v18 = vmax.f32 %v1668_v52, 0.0 }
 0x1b2   : > { %v1671_v15 = vpop.f32.mrf.mxu0  ;;  %2114 = vmatmul.mubr.bf16.gmra.mxu1 %v1854_v9 }
 0x1b3   : > { %v1672_v51 = vadd.f32 %v1671_v15, %v4470_v10  ;;  %v1802_v16 = vmax.f32 %v1670_v13, 0.0 }
 0x1b4   : > { %v1675_v17 = vpop.f32.mrf.mxu0 }
 0x1b5   : > { %v1803_v19 = vmax.f32 %v1672_v51, 0.0  ;;  %v1856_v23 = vpack.c.bf16 %v1802_v16, %v1800_v20  ;;  %v1676_v27 = vadd.f32 %v1675_v17, %v4473_v12 }
 0x1b6   : > { %v1677_v21 = vpop.f32.mrf.mxu0 }
 0x1b7   : > { %v1857_v22 = vpack.c.bf16 %v1803_v19, %v1801_v18  ;;  %v1678_v25 = vadd.f32 %v1677_v21, %v4470_v10  ;;  %v1804_v34 = vmax.f32 %v1676_v27, 0.0 }
 0x1b8   : > { %v1679_v24 = vpop.f32.mrf.mxu0 }
 0x1b9   : > { %v1680_v26 = vadd.f32 %v1679_v24, %v4473_v12  ;;  %2123 = vmatprep.mubr.bf16.mxu1 %v1857_v22  ;;  %v1805_v32 = vmax.f32 %v1678_v25, 0.0 }
 0x1ba   : > { %v1681_v28 = vpop.f32.mrf.mxu0  ;;  %2124 = vmatmul.mubr.bf16.gmra.mxu1 %v1856_v23 }
 0x1bb   : > { %v1682_v29 = vadd.f32 %v1681_v28, %v4470_v10  ;;  %v1806_v30 = vmax.f32 %v1680_v26, 0.0 }
 0x1bc   : > { %v1685_v31 = vpop.f32.mrf.mxu0 }
 0x1bd   : > { %v1807_v33 = vmax.f32 %v1682_v29, 0.0  ;;  %v1858_v38 = vpack.c.bf16 %v1806_v30, %v1804_v34  ;;  %v1686_v42 = vadd.f32 %v1685_v31, %v4473_v12 }
 0x1be   : > { %v1687_v36 = vpop.f32.mrf.mxu0 }
 0x1bf   : > { %v1859_v37 = vpack.c.bf16 %v1807_v33, %v1805_v32  ;;  %v1688_v40 = vadd.f32 %v1687_v36, %v4470_v10  ;;  %v1808_v50 = vmax.f32 %v1686_v42, 0.0 }
 0x1c0   : > { %v1689_v39 = vpop.f32.mrf.mxu0 }
 0x1c1   : > { %v1690_v41 = vadd.f32 %v1689_v39, %v4473_v12  ;;  %2133 = vmatprep.mubr.bf16.mxu1 %v1859_v37  ;;  %v1809_v35 = vmax.f32 %v1688_v40, 0.0 }
 0x1c2   : > { %v1691_v43 = vpop.f32.mrf.mxu0  ;;  %2134 = vmatmul.mubr.bf16.gmra.mxu1 %v1858_v38 }
 0x1c3   : > { %v1692_v44 = vadd.f32 %v1691_v43, %v4470_v10  ;;  %v1810_v45 = vmax.f32 %v1690_v41, 0.0 }
 0x1c4   : > { %v1695_v46 = vpop.f32.mrf.mxu0 }
 0x1c5   : > { %v1811_v49 = vmax.f32 %v1692_v44, 0.0  ;;  %v1860_v55 = vpack.c.bf16 %v1810_v45, %v1808_v50  ;;  %v1696_v59 = vadd.f32 %v1695_v46, %v4473_v12 }
 0x1c6   : > { %v1697_v53 = vpop.f32.mrf.mxu0 }
 0x1c7   : > { %v1861_v54 = vpack.c.bf16 %v1811_v49, %v1809_v35  ;;  %v1698_v57 = vadd.f32 %v1697_v53, %v4470_v10  ;;  %v1812_v2 = vmax.f32 %v1696_v59, 0.0 }
 0x1c8   : > { %v1699_v56 = vpop.f32.mrf.mxu0 }
 0x1c9   : > { %v1700_v58 = vadd.f32 %v1699_v56, %v4473_v12  ;;  %2143 = vmatprep.mubr.bf16.mxu1 %v1861_v54  ;;  %v1813_v0 = vmax.f32 %v1698_v57, 0.0 }
 0x1ca   : > { %v1701_v60 = vpop.f32.mrf.mxu0  ;;  %2144 = vmatmul.mubr.bf16.gmra.mxu1 %v1860_v55 }
 0x1cb   : > { %v1702_v61 = vadd.f32 %v1701_v60, %v4470_v10  ;;  %v1814_v62 = vmax.f32 %v1700_v58, 0.0 }
 0x1cc   : > { %v1705_v63 = vpop.f32.mrf.mxu0 }
 0x1cd   : > { %v1815_v1 = vmax.f32 %v1702_v61, 0.0  ;;  %v1862_v5 = vpack.c.bf16 %v1814_v62, %v1812_v2  ;;  %v1706_v9 = vadd.f32 %v1705_v63, %v4473_v12 }
 0x1ce   : > { %v1707_v3 = vpop.f32.mrf.mxu0 }
 0x1cf   : > { %v1863_v4 = vpack.c.bf16 %v1815_v1, %v1813_v0  ;;  %v1708_v7 = vadd.f32 %v1707_v3, %v4470_v10  ;;  %v1816_v16 = vmax.f32 %v1706_v9, 0.0 }
 0x1d0   : > { %v1709_v6 = vpop.f32.mrf.mxu0 }
 0x1d1   : > { %v1710_v8 = vadd.f32 %v1709_v6, %v4473_v12  ;;  %2153 = vmatprep.mubr.bf16.mxu1 %v1863_v4  ;;  %v1817_v15 = vmax.f32 %v1708_v7, 0.0 }
 0x1d2   : > { %v1711_v11 = vpop.f32.mrf.mxu0  ;;  %2154 = vmatmul.mubr.bf16.gmra.mxu1 %v1862_v5 }
 0x1d3   : > { %v1712_v52 = vadd.f32 %v1711_v11, %v4470_v10  ;;  %v1818_v13 = vmax.f32 %v1710_v8, 0.0 }
 0x1d4   : > { %v1715_v14 = vpop.f32.mrf.mxu0 }
 0x1d5   : > { %v1819_v51 = vmax.f32 %v1712_v52, 0.0  ;;  %v1864_v19 = vpack.c.bf16 %v1818_v13, %v1816_v16  ;;  %v1716_v23 = vadd.f32 %v1715_v14, %v4473_v12 }
 0x1d6   : > { %v1717_v17 = vpop.f32.mrf.mxu0 }
 0x1d7   : > { %v1865_v18 = vpack.c.bf16 %v1819_v51, %v1817_v15  ;;  %v1718_v21 = vadd.f32 %v1717_v17, %v4470_v10  ;;  %v1820_v32 = vmax.f32 %v1716_v23, 0.0 }
 0x1d8   : > { %v1719_v20 = vpop.f32.mrf.mxu0 }
 0x1d9   : > { %v1720_v22 = vadd.f32 %v1719_v20, %v4473_v12  ;;  %2163 = vmatprep.mubr.bf16.mxu1 %v1865_v18  ;;  %v1821_v30 = vmax.f32 %v1718_v21, 0.0 }
 0x1da   : > { %v4514_v24 = vpop.f32.mrf.mxu1  ;;  %v1721_v25 = vpop.f32.mrf.mxu0  ;;  %2164 = vmatmul.mubr.bf16.gmra.mxu1 %v1864_v19 }
 0x1db   : > { %6000 = vst [vmem:[#allocation4_spill] sm:$0xff] %v4514_v24  ;;  %v1722_v26 = vadd.f32 %v1721_v25, %v4470_v10  ;;  %v1822_v27 = vmax.f32 %v1720_v22, 0.0 }
 0x1dc   : > { %v4517_v28 = vpop.f32.mrf.mxu1  ;;  %v1725_v29 = vpop.f32.mrf.mxu0 }
 0x1dd   : > { %6001 = vst [vmem:[#allocation5_spill] sm:$0xff] %v4517_v28  ;;  %v1823_v31 = vmax.f32 %v1722_v26, 0.0  ;;  %v1866_v37 = vpack.c.bf16 %v1822_v27, %v1820_v32  ;;  %v1726_v42 = vadd.f32 %v1725_v29, %v4473_v12 }
 0x1de   : > { %v4519_v33 = vpop.f32.mrf.mxu1  ;;  %v1727_v34 = vpop.f32.mrf.mxu0 }
 0x1df   : > { %6002 = vst [vmem:[#allocation6_spill] sm:$0xff] %v4519_v33  ;;  %v1867_v36 = vpack.c.bf16 %v1823_v31, %v1821_v30  ;;  %v1728_v40 = vadd.f32 %v1727_v34, %v4470_v10  ;;  %v1824_v54 = vmax.f32 %v1726_v42, 0.0 }
 0x1e0   : > { %v4521_v38 = vpop.f32.mrf.mxu1  ;;  %v1729_v39 = vpop.f32.mrf.mxu0 }
 0x1e1   : > { %6003 = vst [vmem:[#allocation7_spill] sm:$0xff] %v4521_v38  ;;  %v1730_v41 = vadd.f32 %v1729_v39, %v4473_v12  ;;  %2173 = vmatprep.mubr.bf16.mxu1 %v1867_v36  ;;  %v1825_v50 = vmax.f32 %v1728_v40, 0.0 }
 0x1e2   : > { %v4526_v43 = vpop.f32.mrf.mxu1  ;;  %v1731_v44 = vpop.f32.mrf.mxu0  ;;  %2174 = vmatmul.mubr.bf16.gmra.mxu1 %v1866_v37 }
 0x1e3   : > { %6004 = vst [vmem:[#allocation8_spill] sm:$0xff] %v4526_v43  ;;  %v1732_v45 = vadd.f32 %v1731_v44, %v4470_v10  ;;  %v1826_v46 = vmax.f32 %v1730_v41, 0.0 }
 0x1e4   : > { %v4529_v35 = vpop.f32.mrf.mxu1  ;;  %v1735_v49 = vpop.f32.mrf.mxu0 }
 0x1e5   : > { %6005 = vst [vmem:[#allocation9_spill] sm:$0xff] %v4529_v35  ;;  %v1827_v53 = vmax.f32 %v1732_v45, 0.0  ;;  %v1868_v58 = vpack.c.bf16 %v1826_v46, %v1824_v54  ;;  %v1736_v63 = vadd.f32 %v1735_v49, %v4473_v12 }
 0x1e6   : > { %v4531_v55 = vpop.f32.mrf.mxu1  ;;  %v1737_v56 = vpop.f32.mrf.mxu0 }
 0x1e7   : > { %6006 = vst [vmem:[#allocation10_spill] sm:$0xff] %v4531_v55  ;;  %v1869_v57 = vpack.c.bf16 %v1827_v53, %v1825_v50  ;;  %v1738_v61 = vadd.f32 %v1737_v56, %v4470_v10  ;;  %v1828_v8 = vmax.f32 %v1736_v63, 0.0 }
 0x1e8   : > { %v4533_v59 = vpop.f32.mrf.mxu1  ;;  %v1739_v60 = vpop.f32.mrf.mxu0 }
 0x1e9   : > { %6007 = vst [vmem:[#allocation11_spill] sm:$0xff] %v4533_v59  ;;  %v1740_v62 = vadd.f32 %v1739_v60, %v4473_v12  ;;  %2183 = vmatprep.mubr.bf16.mxu1 %v1869_v57  ;;  %v1829_v6 = vmax.f32 %v1738_v61, 0.0 }
 0x1ea   : > { %v4538_v0 = vpop.f32.mrf.mxu1  ;;  %v1741_v1 = vpop.f32.mrf.mxu0  ;;  %2184 = vmatmul.mubr.bf16.gmra.mxu1 %v1868_v58 }
 0x1eb   : > { %6008 = vst [vmem:[#allocation12_spill] sm:$0xff] %v4538_v0  ;;  %v1742_v2 = vadd.f32 %v1741_v1, %v4470_v10  ;;  %v1830_v3 = vmax.f32 %v1740_v62, 0.0 }
 0x1ec   : > { %v4541_v4 = vpop.f32.mrf.mxu1  ;;  %v1745_v5 = vpop.f32.mrf.mxu0 }
 0x1ed   : > { %6009 = vst [vmem:[#allocation13_spill] sm:$0xff] %v4541_v4  ;;  %v1831_v7 = vmax.f32 %v1742_v2, 0.0  ;;  %v1870_v13 = vpack.c.bf16 %v1830_v3, %v1828_v8  ;;  %v1746_v17 = vadd.f32 %v1745_v5, %v4473_v12 }
 0x1ee   : > { %v4543_v9 = vpop.f32.mrf.mxu1  ;;  %v1747_v11 = vpop.f32.mrf.mxu0 }
 0x1ef   : > { %6010 = vst [vmem:[#allocation14_spill] sm:$0xff] %v4543_v9  ;;  %v1871_v52 = vpack.c.bf16 %v1831_v7, %v1829_v6  ;;  %v1748_v51 = vadd.f32 %v1747_v11, %v4470_v10  ;;  %v1832_v27 = vmax.f32 %v1746_v17, 0.0 }
 0x1f0   : > { %v4545_v14 = vpop.f32.mrf.mxu1  ;;  %v1749_v15 = vpop.f32.mrf.mxu0 }
 0x1f1   : > { %6011 = vst [vmem:[#allocation15_spill] sm:$0xff] %v4545_v14  ;;  %v1750_v16 = vadd.f32 %v1749_v15, %v4473_v12  ;;  %2193 = vmatprep.mubr.bf16.mxu1 %v1871_v52  ;;  %v1833_v25 = vmax.f32 %v1748_v51, 0.0 }
 0x1f2   : > { %v4550_v18 = vpop.f32.mrf.mxu1  ;;  %v1751_v19 = vpop.f32.mrf.mxu0  ;;  %2194 = vmatmul.mubr.bf16.gmra.mxu1 %v1870_v13 }
 0x1f3   : > { %6012 = vst [vmem:[#allocation16_spill] sm:$0xff] %v4550_v18  ;;  %v1752_v20 = vadd.f32 %v1751_v19, %v4470_v10  ;;  %v1834_v21 = vmax.f32 %v1750_v16, 0.0 }
 0x1f4   : > { %v4553_v22 = vpop.f32.mrf.mxu1  ;;  %v1755_v23 = vpop.f32.mrf.mxu0 }
 0x1f5   : > { %6013 = vst [vmem:[#allocation17_spill] sm:$0xff] %v4553_v22  ;;  %v1835_v26 = vmax.f32 %v1752_v20, 0.0  ;;  %v1872_v32 = vpack.c.bf16 %v1834_v21, %v1832_v27  ;;  %v1756_v40 = vadd.f32 %v1755_v23, %v4473_v12 }
 0x1f6   : > { %v4555_v29 = vpop.f32.mrf.mxu1  ;;  %v1757_v30 = vpop.f32.mrf.mxu0 }
 0x1f7   : > { %6014 = vst [vmem:[#allocation18_spill] sm:$0xff] %v4555_v29  ;;  %v1873_v31 = vpack.c.bf16 %v1835_v26, %v1833_v25  ;;  %v1758_v37 = vadd.f32 %v1757_v30, %v4470_v10  ;;  %v1836_v54 = vmax.f32 %v1756_v40, 0.0 }
 0x1f8   : > { %v4557_v34 = vpop.f32.mrf.mxu1  ;;  %v1759_v36 = vpop.f32.mrf.mxu0 }
 0x1f9   : > { %6015 = vst [vmem:[#allocation19_spill] sm:$0xff] %v4557_v34  ;;  %v1760_v39 = vadd.f32 %v1759_v36, %v4473_v12  ;;  %2203 = vmatprep.mubr.bf16.mxu1 %v1873_v31  ;;  %v1837_v50 = vmax.f32 %v1758_v37, 0.0 }
 0x1fa   : > { %v4562_v41 = vpop.f32.mrf.mxu1  ;;  %v1761_v42 = vpop.f32.mrf.mxu0  ;;  %2204 = vmatmul.mubr.bf16.gmra.mxu1 %v1872_v32 }
 0x1fb   : > { %6016 = vst [vmem:[#allocation20_spill] sm:$0xff] %v4562_v41  ;;  %v1762_v44 = vadd.f32 %v1761_v42, %v4470_v10  ;;  %v1838_v45 = vmax.f32 %v1760_v39, 0.0 }
 0x1fc   : > { %v4565_v46 = vpop.f32.mrf.mxu1  ;;  %v1765_v49 = vpop.f32.mrf.mxu0 }
 0x1fd   : > { %6017 = vst [vmem:[#allocation21_spill] sm:$0xff] %v4565_v46  ;;  %v1839_v53 = vmax.f32 %v1762_v44, 0.0  ;;  %v1874_v60 = vpack.c.bf16 %v1838_v45, %v1836_v54  ;;  %v1766_v2 = vadd.f32 %v1765_v49, %v4473_v12 }
 0x1fe   : > { %v4567_v56 = vpop.f32.mrf.mxu1  ;;  %v1767_v57 = vpop.f32.mrf.mxu0 }
 0x1ff   : > { %6018 = vst [vmem:[#allocation22_spill] sm:$0xff] %v4567_v56  ;;  %v1875_v58 = vpack.c.bf16 %v1839_v53, %v1837_v50  ;;  %v1768_v63 = vadd.f32 %v1767_v57, %v4470_v10  ;;  %v1840_v15 = vmax.f32 %v1766_v2, 0.0 }
 0x200   : > { %v4569_v61 = vpop.f32.mrf.mxu1  ;;  %v1769_v62 = vpop.f32.mrf.mxu0 }
 0x201   : > { %6019 = vst [vmem:[#allocation23_spill] sm:$0xff] %v4569_v61  ;;  %v1770_v1 = vadd.f32 %v1769_v62, %v4473_v12  ;;  %2213 = vmatprep.mubr.bf16.mxu1 %v1875_v58  ;;  %v1841_v52 = vmax.f32 %v1768_v63, 0.0 }
 0x202   : > { %v4574_v3 = vpop.f32.mrf.mxu1  ;;  %v1771_v5 = vpop.f32.mrf.mxu0  ;;  %2214 = vmatmul.mubr.bf16.gmra.mxu1 %v1874_v60 }
 0x203   : > { %6020 = vst [vmem:[#allocation24_spill] sm:$0xff] %v4574_v3  ;;  %v1772_v6 = vadd.f32 %v1771_v5, %v4470_v10  ;;  %v1842_v7 = vmax.f32 %v1770_v1, 0.0 }
 0x204   : > { %v4577_v8 = vpop.f32.mrf.mxu1  ;;  %v1775_v11 = vpop.f32.mrf.mxu0 }
 0x205   : > { %6021 = vst [vmem:[#allocation25_spill] sm:$0xff] %v4577_v8  ;;  %v1843_v13 = vmax.f32 %v1772_v6, 0.0  ;;  %v1876_v19 = vpack.c.bf16 %v1842_v7, %v1840_v15  ;;  %v1776_v26 = vadd.f32 %v1775_v11, %v4473_v12 }
 0x206   : > { %v4579_v51 = vpop.f32.mrf.mxu1  ;;  %v1777_v16 = vpop.f32.mrf.mxu0 }
 0x207   : > { %6022 = vst [vmem:[#allocation26_spill] sm:$0xff] %v4579_v51  ;;  %v1877_v17 = vpack.c.bf16 %v1843_v13, %v1841_v52  ;;  %v1778_v23 = vadd.f32 %v1777_v16, %v4470_v10  ;;  %v1844_v40 = vmax.f32 %v1776_v26, 0.0 }
 0x208   : > { %v4581_v20 = vpop.f32.mrf.mxu1  ;;  %v1779_v21 = vpop.f32.mrf.mxu0 }
 0x209   : > { %6023 = vst [vmem:[#allocation27_spill] sm:$0xff] %v4581_v20  ;;  %v1780_v25 = vadd.f32 %v1779_v21, %v4473_v12  ;;  %2223 = vmatprep.mubr.bf16.mxu1 %v1877_v17  ;;  %v1845_v37 = vmax.f32 %v1778_v23, 0.0 }
 0x20a   : > { %v4586_v27 = vpop.f32.mrf.mxu1  ;;  %v1781_v30 = vpop.f32.mrf.mxu0  ;;  %2224 = vmatmul.mubr.bf16.gmra.mxu1 %v1876_v19 }
 0x20b   : > { %6024 = vst [vmem:[#allocation28_spill] sm:$0xff] %v4586_v27  ;;  %v1782_v31 = vadd.f32 %v1781_v30, %v4470_v10  ;;  %v1846_v32 = vmax.f32 %v1780_v25, 0.0 }
 0x20c   : > { %v4589_v36 = vpop.f32.mrf.mxu1 }
 0x20d   : > { %6025 = vst [vmem:[#allocation29_spill] sm:$0xff] %v4589_v36  ;;  %v1847_v39 = vmax.f32 %v1782_v31, 0.0  ;;  %v1878_v45 = vpack.c.bf16 %v1846_v32, %v1844_v40 }
 0x20e   : > { %v4591_v42 = vpop.f32.mrf.mxu1 }
 0x20f   : > { %6026 = vst [vmem:[#allocation30_spill] sm:$0xff] %v4591_v42  ;;  %v1879_v44 = vpack.c.bf16 %v1847_v39, %v1845_v37 }
 0x210   : > { %v4593_v49 = vpop.f32.mrf.mxu1 }
 0x211   : > { %6027 = vst [vmem:[#allocation31_spill] sm:$0xff] %v4593_v49  ;;  %2233 = vmatprep.mubr.bf16.mxu1 %v1879_v44 }
 0x212   : > { %v4595_v12 = vpop.f32.mrf.mxu1  ;;  %2234 = vmatmul.mubr.bf16.gmra.mxu1 %v1878_v45 }
 0x213   : > { %6028 = vst [vmem:[#allocation32_spill] sm:$0xff] %v4595_v12 }
 0x214   : > { %v4597_v50 = vpop.f32.mrf.mxu1 }
 0x215   : > { %6029 = vst [vmem:[#allocation33_spill] sm:$0xff] %v4597_v50 }
 0x216   : > { %v4599_v53 = vpop.f32.mrf.mxu1 }
 0x217   : > { %6030 = vst [vmem:[#allocation34_spill] sm:$0xff] %v4599_v53 }
 0x218   : > { %v4601_v10 = vpop.f32.mrf.mxu1 }
 0x219   : > { %6031 = vst [vmem:[#allocation35_spill] sm:$0xff] %v4601_v10 }
 0x21a   : > { %v4603_v54 = vpop.f32.mrf.mxu1 }
 0x21b   : > { %6032 = vst [vmem:[#allocation36_spill] sm:$0xff] %v4603_v54 }
 0x21c   : > { %v4605_v57 = vpop.f32.mrf.mxu1 }
 0x21d   : > { %6033 = vst [vmem:[#allocation37_spill] sm:$0xff] %v4605_v57 }
 0x21e   : > { %v4607_v58 = vpop.f32.mrf.mxu1 }
 0x21f   : > { %6034 = vst [vmem:[#allocation38_spill] sm:$0xff] %v4607_v58 }
 0x220   : > { %v4609_v60 = vpop.f32.mrf.mxu1 }
 0x221   : > { %6035 = vst [vmem:[#allocation39_spill] sm:$0xff] %v4609_v60 }
 0x222   : > { %v4611_v62 = vpop.f32.mrf.mxu1 }
 0x223   : > { %6036 = vst [vmem:[#allocation40_spill] sm:$0xff] %v4611_v62 }
 0x224   : > { %v4613_v63 = vpop.f32.mrf.mxu1 }
 0x225   : > { %6037 = vst [vmem:[#allocation41_spill] sm:$0xff] %v4613_v63 }
 0x226   : > { %v4615_v1 = vpop.f32.mrf.mxu1 }
 0x227   : > { %6038 = vst [vmem:[#allocation42_spill] sm:$0xff] %v4615_v1 }
 0x228   : > { %v4617_v2 = vpop.f32.mrf.mxu1 }
 0x229   : > { %6039 = vst [vmem:[#allocation43_spill] sm:$0xff] %v4617_v2 }
 0x22a   : > { %v4619_v5 = vpop.f32.mrf.mxu1 }
 0x22b   : > { %6040 = vst [vmem:[#allocation44_spill] sm:$0xff] %v4619_v5 }
 0x22c   : > { %v4621_v6 = vpop.f32.mrf.mxu1 }
 0x22d   : > { %6041 = vst [vmem:[#allocation45_spill] sm:$0xff] %v4621_v6 }
 0x22e   : > { %v4623_v7 = vpop.f32.mrf.mxu1 }
 0x22f   : > { %6042 = vst [vmem:[#allocation46_spill] sm:$0xff] %v4623_v7 }
 0x230   : > { %v4625_v11 = vpop.f32.mrf.mxu1 }
 0x231   : > { %6043 = vst [vmem:[#allocation47_spill] sm:$0xff] %v4625_v11 }
 0x232   : > { %v4627_v52 = vpop.f32.mrf.mxu1 }
 0x233   : > { %6044 = vst [vmem:[#allocation48_spill] sm:$0xff] %v4627_v52 }
 0x234   : > { %v4629_v13 = vpop.f32.mrf.mxu1 }
 0x235   : > { %6045 = vst [vmem:[#allocation49_spill] sm:$0xff] %v4629_v13 }
 0x236   : > { %v4631_v15 = vpop.f32.mrf.mxu1 }
 0x237   : > { %6046 = vst [vmem:[#allocation50_spill] sm:$0xff] %v4631_v15 }
 0x238   : > { %v4633_v16 = vpop.f32.mrf.mxu1 }
 0x239   : > { %6047 = vst [vmem:[#allocation51_spill] sm:$0xff] %v4633_v16 }
 0x23a   : > { %v4635_v17 = vpop.f32.mrf.mxu1 }
 0x23b   : > { %6048 = vst [vmem:[#allocation52_spill] sm:$0xff] %v4635_v17 }
 0x23c   : > { %v4637_v19 = vpop.f32.mrf.mxu1 }
 0x23d   : > { %6049 = vst [vmem:[#allocation53_spill] sm:$0xff] %v4637_v19 }
 0x23e   : > { %v4639_v21 = vpop.f32.mrf.mxu1 }
 0x23f   : > { %6050 = vst [vmem:[#allocation54_spill] sm:$0xff] %v4639_v21 }
 0x240   : > { %v4641_v23 = vpop.f32.mrf.mxu1 }
 0x241   : > { %6051 = vst [vmem:[#allocation55_spill] sm:$0xff] %v4641_v23 }
 0x242   : > { %v4643_v25 = vpop.f32.mrf.mxu1 }
 0x243   : > { %6052 = vst [vmem:[#allocation56_spill] sm:$0xff] %v4643_v25 }
 0x244   : > { %v4645_v26 = vpop.f32.mrf.mxu1 }
 0x245   : > { %6053 = vst [vmem:[#allocation57_spill] sm:$0xff] %v4645_v26  ;;  %v392_v26 = vld [vmem:[%s5882_s3 + $0x6] sm:$0x3] }
 0x246   : > { %v4647_v30 = vpop.f32.mrf.mxu1 }
 0x247   : > { %6054 = vst [vmem:[#allocation58_spill] sm:$0xff] %v4647_v30 }
 0x248   : > { %v4649_v31 = vpop.f32.mrf.mxu1 }
 0x249   : > { %6055 = vst [vmem:[#allocation59_spill] sm:$0xff] %v4649_v31  ;;  %v4669_v31 = vrot.slane %v392_v26, %v4276_v48 }
 0x24a   : > { %v4651_v32 = vpop.f32.mrf.mxu1 }
 0x24b   : > { %6056 = vst [vmem:[#allocation60_spill] sm:$0xff] %v4651_v32 }
 0x24c   : > { %v4653_v37 = vpop.f32.mrf.mxu1 }
 0x24d   : > { %6057 = vst [vmem:[#allocation61_spill] sm:$0xff] %v4653_v37  ;;  %v4674_v37 = vrot.slane %v392_v26, %v4274_v47 }
 0x24e   : > { %v4655_v39 = vpop.f32.mrf.mxu1 }
 0x24f   : > { %6058 = vst [vmem:[#allocation62_spill] sm:$0xff] %v4655_v39 }
 0x250   : > { %v4657_v40 = vpop.f32.mrf.mxu1 }
 0x251   : > { %6059 = vst [vmem:[#allocation63_spill] sm:$0xff] %v4657_v40 }
 0x252   : > { %v4659_v44 = vpop.f32.mrf.mxu1 }
 0x253   : > { %6060 = vst [vmem:[#allocation64_spill] sm:$0xff] %v4659_v44 }
 0x254   : > { %v4661_v45 = vpop.f32.mrf.mxu1 }
 0x255   : > { %6061 = vst [vmem:[#allocation65_spill] sm:$0xff] %v4661_v45 }
 0x256   : > { %v4666_v25 = vpop.f32.mrf.mxu1 }
 0x257   : > { %6062 = vst [vmem:[#allocation66_spill] sm:$0xff] %v4666_v25 }
 0x258   : > { %v4671_v32 = vpop.f32.mrf.mxu1 }
 0x259   : > { %6063 = vst [vmem:[#allocation67_spill] sm:$0xff] %v4671_v32 }
 0x25a   : > { %v2085_v39 = vpop.f32.mrf.mxu1 }
 0x25b   : > { %v4677_v40 = vadd.f32 %v2085_v39, %v4669_v31 }
 0x25c   : > { %v2087_v44 = vpop.f32.mrf.mxu1 }
 0x25d   : > { %v4680_v45 = vadd.f32 %v2087_v44, %v4674_v37  ;;  %v5885_v23 = vmax.f32 %v4677_v40, 0.0 }
 0x25e   : > { %v2089_v30 = vpop.f32.mrf.mxu1 }
 0x25f   : > { %v5884_v25 = vmax.f32 %v4680_v45, 0.0  ;;  %v4685_v21 = vadd.f32 %v2089_v30, %v4669_v31 }
 0x260   : > { %v2091_v32 = vpop.f32.mrf.mxu1 }
 0x261   : > { %v4688_v26 = vadd.f32 %v2091_v32, %v4674_v37  ;;  %v2308_v39 = vadd.f32 %v5884_v25, %v5885_v23  ;;  %v5887_v44 = vmax.f32 %v4685_v21, 0.0 }
 0x262   : > { %v2095_v19 = vpop.f32.mrf.mxu1 }
 0x263   : > { %v5886_v17 = vmax.f32 %v4688_v26, 0.0  ;;  %v4697_v16 = vadd.f32 %v2095_v19, %v4669_v31  ;;  %2309 = vadd.xlane.f32.xlu0 %v2308_v39 }
 0x264   : > { %v2097_v30 = vpop.f32.mrf.mxu1 }
 0x265   : > { %v4700_v15 = vadd.f32 %v2097_v30, %v4674_v37  ;;  %v2311_v32 = vadd.f32 %v5886_v17, %v5887_v44  ;;  %v5889_v25 = vmax.f32 %v4697_v16, 0.0 }
 0x266   : > { %v2099_v13 = vpop.f32.mrf.mxu1 }
 0x267   : > { %v5888_v23 = vmax.f32 %v4700_v15, 0.0  ;;  %v4709_v52 = vadd.f32 %v2099_v13, %v4669_v31  ;;  %2312 = vadd.xlane.f32.xlu0 %v2311_v32 }
 0x268   : > { %v2101_v19 = vpop.f32.mrf.mxu1 }
 0x269   : > { %v4712_v39 = vadd.f32 %v2101_v19, %v4674_v37  ;;  %v2314_v30 = vadd.f32 %v5888_v23, %v5889_v25  ;;  %v5891_v17 = vmax.f32 %v4709_v52, 0.0 }
 0x26a   : > { %v2105_v11 = vpop.f32.mrf.mxu1 }
 0x26b   : > { %v5890_v44 = vmax.f32 %v4712_v39, 0.0  ;;  %v4721_v7 = vadd.f32 %v2105_v11, %v4669_v31  ;;  %2315 = vadd.xlane.f32.xlu1 %v2314_v30 }
 0x26c   : > { %v2107_v13 = vpop.f32.mrf.mxu1 }
 0x26d   : > { %v4724_v32 = vadd.f32 %v2107_v13, %v4674_v37  ;;  %v2317_v19 = vadd.f32 %v5890_v44, %v5891_v17  ;;  %v5893_v23 = vmax.f32 %v4721_v7, 0.0 }
 0x26e   : > { %v2109_v6 = vpop.f32.mrf.mxu1 }
 0x26f   : > { %v5892_v25 = vmax.f32 %v4724_v32, 0.0  ;;  %v4733_v5 = vadd.f32 %v2109_v6, %v4669_v31  ;;  %2318 = vadd.xlane.f32.xlu1 %v2317_v19 }
 0x270   : > { %v2111_v11 = vpop.f32.mrf.mxu1 }
 0x271   : > { %v4736_v30 = vadd.f32 %v2111_v11, %v4674_v37  ;;  %v2320_v13 = vadd.f32 %v5892_v25, %v5893_v23  ;;  %v5895_v44 = vmax.f32 %v4733_v5, 0.0 }
 0x272   : > { %v2115_v2 = vpop.f32.mrf.mxu1 }
 0x273   : > { %v5894_v17 = vmax.f32 %v4736_v30, 0.0  ;;  %v4745_v1 = vadd.f32 %v2115_v2, %v4669_v31  ;;  %2321 = vadd.xlane.f32.xlu0 %v2320_v13 }
 0x274   : > { %v2117_v6 = vpop.f32.mrf.mxu1 }
 0x275   : > { %v4748_v19 = vadd.f32 %v2117_v6, %v4674_v37  ;;  %v2323_v11 = vadd.f32 %v5894_v17, %v5895_v44  ;;  %v5897_v25 = vmax.f32 %v4745_v1, 0.0 }
 0x276   : > { %v2119_v63 = vpop.f32.mrf.mxu1 }
 0x277   : > { %v5896_v23 = vmax.f32 %v4748_v19, 0.0  ;;  %v4757_v62 = vadd.f32 %v2119_v63, %v4669_v31  ;;  %2324 = vadd.xlane.f32.xlu1 %v2323_v11 }
 0x278   : > { %v2121_v2 = vpop.f32.mrf.mxu1 }
 0x279   : > { %v4760_v13 = vadd.f32 %v2121_v2, %v4674_v37  ;;  %v2326_v6 = vadd.f32 %v5896_v23, %v5897_v25  ;;  %v5899_v17 = vmax.f32 %v4757_v62, 0.0 }
 0x27a   : > { %v2125_v60 = vpop.f32.mrf.mxu1 }
 0x27b   : > { %v5898_v44 = vmax.f32 %v4760_v13, 0.0  ;;  %v4769_v58 = vadd.f32 %v2125_v60, %v4669_v31  ;;  %2327 = vadd.xlane.f32.xlu0 %v2326_v6 }
 0x27c   : > { %v2127_v63 = vpop.f32.mrf.mxu1 }
 0x27d   : > { %v4772_v11 = vadd.f32 %v2127_v63, %v4674_v37  ;;  %v2329_v2 = vadd.f32 %v5898_v44, %v5899_v17  ;;  %v5901_v23 = vmax.f32 %v4769_v58, 0.0 }
 0x27e   : > { %v2129_v57 = vpop.f32.mrf.mxu1 }
 0x27f   : > { %v5900_v25 = vmax.f32 %v4772_v11, 0.0  ;;  %v4781_v54 = vadd.f32 %v2129_v57, %v4669_v31  ;;  %2330 = vadd.xlane.f32.xlu1 %v2329_v2 }
 0x280   : > { %v2131_v60 = vpop.f32.mrf.mxu1 }
 0x281   : > { %v4784_v6 = vadd.f32 %v2131_v60, %v4674_v37  ;;  %v2332_v63 = vadd.f32 %v5900_v25, %v5901_v23  ;;  %v5903_v44 = vmax.f32 %v4781_v54, 0.0 }
 0x282   : > { %v2135_v10 = vpop.f32.mrf.mxu1 }
 0x283   : > { %v5902_v17 = vmax.f32 %v4784_v6, 0.0  ;;  %v4793_v53 = vadd.f32 %v2135_v10, %v4669_v31  ;;  %2333 = vadd.xlane.f32.xlu0 %v2332_v63 }
 0x284   : > { %v2137_v57 = vpop.f32.mrf.mxu1 }
 0x285   : > { %v4796_v2 = vadd.f32 %v2137_v57, %v4674_v37  ;;  %v2335_v60 = vadd.f32 %v5902_v17, %v5903_v44  ;;  %v5905_v25 = vmax.f32 %v4793_v53, 0.0 }
 0x286   : > { %v2139_v50 = vpop.f32.mrf.mxu1 }
 0x287   : > { %v5904_v23 = vmax.f32 %v4796_v2, 0.0  ;;  %v4805_v12 = vadd.f32 %v2139_v50, %v4669_v31  ;;  %2336 = vadd.xlane.f32.xlu1 %v2335_v60 }
 0x288   : > { %v2141_v10 = vpop.f32.mrf.mxu1 }
 0x289   : > { %v4808_v63 = vadd.f32 %v2141_v10, %v4674_v37  ;;  %v2338_v57 = vadd.f32 %v5904_v23, %v5905_v25  ;;  %v5907_v17 = vmax.f32 %v4805_v12, 0.0 }
 0x28a   : > { %v2145_v49 = vpop.f32.mrf.mxu1 }
 0x28b   : > { %v5906_v44 = vmax.f32 %v4808_v63, 0.0  ;;  %v4817_v42 = vadd.f32 %v2145_v49, %v4669_v31  ;;  %2339 = vadd.xlane.f32.xlu0 %v2338_v57 }
 0x28c   : > { %v2147_v50 = vpop.f32.mrf.mxu1 }
 0x28d   : > { %v4820_v60 = vadd.f32 %v2147_v50, %v4674_v37  ;;  %v2341_v10 = vadd.f32 %v5906_v44, %v5907_v17  ;;  %v5909_v23 = vmax.f32 %v4817_v42, 0.0 }
 0x28e   : > { %v2149_v36 = vpop.f32.mrf.mxu1 }
 0x28f   : > { %v5908_v25 = vmax.f32 %v4820_v60, 0.0  ;;  %v4829_v27 = vadd.f32 %v2149_v36, %v4669_v31  ;;  %2342 = vadd.xlane.f32.xlu1 %v2341_v10 }
 0x290   : > { %v2151_v49 = vpop.f32.mrf.mxu1 }
 0x291   : > { %v4832_v57 = vadd.f32 %v2151_v49, %v4674_v37  ;;  %v2344_v50 = vadd.f32 %v5908_v25, %v5909_v23  ;;  %v5911_v44 = vmax.f32 %v4829_v27, 0.0 }
 0x292   : > { %v2155_v20 = vpop.f32.mrf.mxu1 }
 0x293   : > { %v5910_v17 = vmax.f32 %v4832_v57, 0.0  ;;  %v4841_v51 = vadd.f32 %v2155_v20, %v4669_v31  ;;  %2345 = vadd.xlane.f32.xlu0 %v2344_v50 }
 0x294   : > { %v2157_v36 = vpop.f32.mrf.mxu1 }
 0x295   : > { %v4844_v10 = vadd.f32 %v2157_v36, %v4674_v37  ;;  %v2347_v49 = vadd.f32 %v5910_v17, %v5911_v44  ;;  %v5913_v25 = vmax.f32 %v4841_v51, 0.0 }
 0x296   : > { %v2159_v8 = vpop.f32.mrf.mxu1 }
 0x297   : > { %v5912_v23 = vmax.f32 %v4844_v10, 0.0  ;;  %v4853_v3 = vadd.f32 %v2159_v8, %v4669_v31  ;;  %2348 = vadd.xlane.f32.xlu1 %v2347_v49 }
 0x298   : > { %v2161_v20 = vpop.f32.mrf.mxu1 }
 0x299   : > { %v4856_v50 = vadd.f32 %v2161_v20, %v4674_v37  ;;  %v2350_v36 = vadd.f32 %v5912_v23, %v5913_v25  ;;  %v5915_v17 = vmax.f32 %v4853_v3, 0.0 }
 0x29a   : > { %v2165_v61 = vpop.f32.mrf.mxu1 }
 0x29b   : > { %v5914_v44 = vmax.f32 %v4856_v50, 0.0  ;;  %v4865_v56 = vadd.f32 %v2165_v61, %v4669_v31  ;;  %2351 = vadd.xlane.f32.xlu0 %v2350_v36 }
 0x29c   : > { %v2167_v8 = vpop.f32.mrf.mxu1 }
 0x29d   : > { %v4868_v49 = vadd.f32 %v2167_v8, %v4674_v37  ;;  %v2353_v20 = vadd.f32 %v5914_v44, %v5915_v17  ;;  %v5917_v23 = vmax.f32 %v4865_v56, 0.0 }
 0x29e   : > { %v2169_v46 = vpop.f32.mrf.mxu1 }
 0x29f   : > { %v5916_v25 = vmax.f32 %v4868_v49, 0.0  ;;  %v4877_v41 = vadd.f32 %v2169_v46, %v4669_v31  ;;  %2354 = vadd.xlane.f32.xlu1 %v2353_v20 }
 0x2a0   : > { %v2171_v61 = vpop.f32.mrf.mxu1 }
 0x2a1   : > { %v4880_v36 = vadd.f32 %v2171_v61, %v4674_v37  ;;  %v2356_v8 = vadd.f32 %v5916_v25, %v5917_v23  ;;  %v5919_v44 = vmax.f32 %v4877_v41, 0.0 }
 0x2a2   : > { %v2175_v34 = vpop.f32.mrf.mxu1 }
 0x2a3   : > { %v5918_v17 = vmax.f32 %v4880_v36, 0.0  ;;  %v4889_v29 = vadd.f32 %v2175_v34, %v4669_v31  ;;  %2357 = vadd.xlane.f32.xlu0 %v2356_v8 }
 0x2a4   : > { %v2177_v46 = vpop.f32.mrf.mxu1 }
 0x2a5   : > { %v4892_v20 = vadd.f32 %v2177_v46, %v4674_v37  ;;  %v2359_v61 = vadd.f32 %v5918_v17, %v5919_v44  ;;  %v5921_v25 = vmax.f32 %v4889_v29, 0.0 }
 0x2a6   : > { %v2179_v22 = vpop.f32.mrf.mxu1 }
 0x2a7   : > { %v5920_v23 = vmax.f32 %v4892_v20, 0.0  ;;  %v4901_v18 = vadd.f32 %v2179_v22, %v4669_v31  ;;  %2360 = vadd.xlane.f32.xlu1 %v2359_v61 }
 0x2a8   : > { %v2181_v34 = vpop.f32.mrf.mxu1 }
 0x2a9   : > { %v4904_v8 = vadd.f32 %v2181_v34, %v4674_v37  ;;  %v2362_v46 = vadd.f32 %v5920_v23, %v5921_v25  ;;  %v5923_v17 = vmax.f32 %v4901_v18, 0.0 }
 0x2aa   : > { %v2185_v14 = vpop.f32.mrf.mxu1 }
 0x2ab   : > { %v5922_v44 = vmax.f32 %v4904_v8, 0.0  ;;  %v4913_v9 = vadd.f32 %v2185_v14, %v4669_v31  ;;  %2363 = vadd.xlane.f32.xlu0 %v2362_v46 }
 0x2ac   : > { %v2187_v22 = vpop.f32.mrf.mxu1 }
 0x2ad   : > { %v4916_v61 = vadd.f32 %v2187_v22, %v4674_v37  ;;  %v2365_v34 = vadd.f32 %v5922_v44, %v5923_v17  ;;  %v5925_v23 = vmax.f32 %v4913_v9, 0.0 }
 0x2ae   : > { %v2189_v4 = vpop.f32.mrf.mxu1 }
 0x2af   : > { %v5924_v25 = vmax.f32 %v4916_v61, 0.0  ;;  %v4925_v0 = vadd.f32 %v2189_v4, %v4669_v31  ;;  %2366 = vadd.xlane.f32.xlu1 %v2365_v34 }
 0x2b0   : > { %v2191_v14 = vpop.f32.mrf.mxu1 }
 0x2b1   : > { %v4928_v46 = vadd.f32 %v2191_v14, %v4674_v37  ;;  %v2368_v22 = vadd.f32 %v5924_v25, %v5925_v23  ;;  %v5927_v44 = vmax.f32 %v4925_v0, 0.0 }
 0x2b2   : > { %v2195_v59 = vpop.f32.mrf.mxu1 }
 0x2b3   : > { %v5926_v17 = vmax.f32 %v4928_v46, 0.0  ;;  %v4937_v55 = vadd.f32 %v2195_v59, %v4669_v31  ;;  %2369 = vadd.xlane.f32.xlu0 %v2368_v22 }
 0x2b4   : > { %v2197_v4 = vpop.f32.mrf.mxu1 }
 0x2b5   : > { %v4940_v34 = vadd.f32 %v2197_v4, %v4674_v37  ;;  %v2371_v14 = vadd.f32 %v5926_v17, %v5927_v44  ;;  %v5929_v25 = vmax.f32 %v4937_v55, 0.0 }
 0x2b6   : > { %v2199_v35 = vpop.f32.mrf.mxu1 }
 0x2b7   : > { %v5928_v23 = vmax.f32 %v4940_v34, 0.0  ;;  %v4949_v43 = vadd.f32 %v2199_v35, %v4669_v31  ;;  %2372 = vadd.xlane.f32.xlu1 %v2371_v14 }
 0x2b8   : > { %v2201_v59 = vpop.f32.mrf.mxu1 }
 0x2b9   : > { %v4952_v22 = vadd.f32 %v2201_v59, %v4674_v37  ;;  %v2374_v4 = vadd.f32 %v5928_v23, %v5929_v25  ;;  %v5932_v17 = vmax.f32 %v4949_v43, 0.0 }
 0x2ba   : > { %v2205_v38 = vpop.f32.mrf.mxu1 }
 0x2bb   : > { %v5931_v44 = vmax.f32 %v4952_v22, 0.0  ;;  %v4961_v33 = vadd.f32 %v2205_v38, %v4669_v31  ;;  %2375 = vadd.xlane.f32.xlu0 %v2374_v4 }
 0x2bc   : > { %v2207_v35 = vpop.f32.mrf.mxu1 }
 0x2bd   : > { %6064 = vst [vmem:[#allocation68_spill] sm:$0xff] %v4961_v33  ;;  %v4964_v14 = vadd.f32 %v2207_v35, %v4674_v37  ;;  %v2377_v59 = vadd.f32 %v5931_v44, %v5932_v17  ;;  %v5936_v23 = vmax.f32 %v4961_v33, 0.0 }
 0x2be   : > { %v2209_v28 = vpop.f32.mrf.mxu1 }
 0x2bf   : > { %6065 = vst [vmem:[#allocation69_spill] sm:$0xff] %v4964_v14  ;;  %v5935_v25 = vmax.f32 %v4964_v14, 0.0  ;;  %v4973_v24 = vadd.f32 %v2209_v28, %v4669_v31  ;;  %2378 = vadd.xlane.f32.xlu1 %v2377_v59 }
 0x2c0   : > { %v2211_v38 = vpop.f32.mrf.mxu1 }
 0x2c1   : > { %6066 = vst [vmem:[#allocation70_spill] sm:$0xff] %v4973_v24  ;;  %v4976_v4 = vadd.f32 %v2211_v38, %v4674_v37  ;;  %v2380_v35 = vadd.f32 %v5935_v25, %v5936_v23  ;;  %v5940_v44 = vmax.f32 %v4973_v24, 0.0 }
 0x2c2   : > { %v2215_v47 = vpop.f32.mrf.mxu1 }
 0x2c3   : > { %6067 = vst [vmem:[#allocation71_spill] sm:$0xff] %v4976_v4  ;;  %v5939_v17 = vmax.f32 %v4976_v4, 0.0  ;;  %v4985_v48 = vadd.f32 %v2215_v47, %v4669_v31  ;;  %2381 = vadd.xlane.f32.xlu0 %v2380_v35 }
 0x2c4   : > { %v2217_v28 = vpop.f32.mrf.mxu1 }
 0x2c5   : > { %6068 = vst [vmem:[#allocation72_spill] sm:$0xff] %v4985_v48  ;;  %v4988_v59 = vadd.f32 %v2217_v28, %v4674_v37  ;;  %v2383_v38 = vadd.f32 %v5939_v17, %v5940_v44  ;;  %v5944_v25 = vmax.f32 %v4985_v48, 0.0 }
 0x2c6   : > { %v2219_v14 = vpop.f32.mrf.mxu1 }
 0x2c7   : > { %6069 = vst [vmem:[#allocation73_spill] sm:$0xff] %v4988_v59  ;;  %v5943_v23 = vmax.f32 %v4988_v59, 0.0  ;;  %v4997_v33 = vadd.f32 %v2219_v14, %v4669_v31  ;;  %2384 = vadd.xlane.f32.xlu1 %v2383_v38 }
 0x2c8   : > { %v2221_v47 = vpop.f32.mrf.mxu1 }
 0x2c9   : > { %6070 = vst [vmem:[#allocation74_spill] sm:$0xff] %v4997_v33  ;;  %v5000_v35 = vadd.f32 %v2221_v47, %v4674_v37  ;;  %v2386_v28 = vadd.f32 %v5943_v23, %v5944_v25  ;;  %v5948_v17 = vmax.f32 %v4997_v33, 0.0 }
 0x2ca   : > { %v2225_v4 = vpop.f32.mrf.mxu1 }
 0x2cb   : > { %6071 = vst [vmem:[#allocation75_spill] sm:$0xff] %v5000_v35  ;;  %v5947_v44 = vmax.f32 %v5000_v35, 0.0  ;;  %v5009_v24 = vadd.f32 %v2225_v4, %v4669_v31  ;;  %2387 = vadd.xlane.f32.xlu0 %v2386_v28 }
 0x2cc   : > { %v2227_v14 = vpop.f32.mrf.mxu1 }
 0x2cd   : > { %6072 = vst [vmem:[#allocation76_spill] sm:$0xff] %v5009_v24  ;;  %v5012_v38 = vadd.f32 %v2227_v14, %v4674_v37  ;;  %v2389_v47 = vadd.f32 %v5947_v44, %v5948_v17  ;;  %v5952_v23 = vmax.f32 %v5009_v24, 0.0 }
 0x2ce   : > { %v2229_v59 = vpop.f32.mrf.mxu1 }
 0x2cf   : > { %6073 = vst [vmem:[#allocation77_spill] sm:$0xff] %v5012_v38  ;;  %v5951_v25 = vmax.f32 %v5012_v38, 0.0  ;;  %v5021_v48 = vadd.f32 %v2229_v59, %v4669_v31  ;;  %2390 = vadd.xlane.f32.xlu1 %v2389_v47 }
 0x2d0   : > { %v2231_v4 = vpop.f32.mrf.mxu1 }
 0x2d1   : > { %v5024_v28 = vadd.f32 %v2231_v4, %v4674_v37  ;;  %v2392_v14 = vadd.f32 %v5951_v25, %v5952_v23  ;;  %v5955_v44 = vmax.f32 %v5021_v48, 0.0 }
 0x2d2   : > { %v2235_v35 = vpop.f32.mrf.mxu1 }
 0x2d3   : > { %v5954_v17 = vmax.f32 %v5024_v28, 0.0  ;;  %v5033_v33 = vadd.f32 %v2235_v35, %v4669_v31  ;;  %2393 = vadd.xlane.f32.xlu0 %v2392_v14 }
 0x2d4   : > { %v2237_v59 = vpop.f32.mrf.mxu1 }
 0x2d5   : > { %v5036_v47 = vadd.f32 %v2237_v59, %v4674_v37  ;;  %v2395_v4 = vadd.f32 %v5954_v17, %v5955_v44  ;;  %v5957_v25 = vmax.f32 %v5033_v33, 0.0 }
 0x2d6   : > { %v2239_v38 = vpop.f32.mrf.mxu1 }
 0x2d7   : > { %6074 = vst [vmem:[#allocation78_spill] sm:$0xff] %v5036_v47  ;;  %v5956_v23 = vmax.f32 %v5036_v47, 0.0  ;;  %v5045_v24 = vadd.f32 %v2239_v38, %v4669_v31  ;;  %2396 = vadd.xlane.f32.xlu1 %v2395_v4 }
 0x2d8   : > { %v2241_v35 = vpop.f32.mrf.mxu1 }
 0x2d9   : > { %6075 = vst [vmem:[#allocation79_spill] sm:$0xff] %v5045_v24  ;;  %v5048_v14 = vadd.f32 %v2241_v35, %v4674_v37  ;;  %v2398_v59 = vadd.f32 %v5956_v23, %v5957_v25  ;;  %v5962_v17 = vmax.f32 %v5045_v24, 0.0 }
 0x2db   : > { %6076 = vst [vmem:[#allocation80_spill] sm:$0xff] %v5048_v14  ;;  %v5961_v44 = vmax.f32 %v5048_v14, 0.0  ;;  %2399 = vadd.xlane.f32.xlu0 %v2398_v59 }
 0x2dd   : > { %v2401_v31 = vadd.f32 %v5961_v44, %v5962_v17 }
 0x2df   : > { %2402 = vadd.xlane.f32.xlu1 %v2401_v31  ;;  %v6077_v31 = vmax.f32 %v4677_v40, 0.0  ;;  %v6080_v40 = vmax.f32 %v4688_v26, 0.0 }
 0x2ec   : > { %v2310_v38 = vpop.xlane.xlu0 %2309 }
 0x2ed   : > { %vm2404_vm1 = vcmp.eq.f32.partialorder %v2310_v38, 0.0 }
 0x2ee   : > { %v2436_v37 = vsel %vm2404_vm1, 1.0, %v2310_v38  ;;  %v6078_v38 = vmax.f32 %v4680_v45, 0.0 }
 0x2ef   : > { %3701 = vrcp.f32 %v2436_v37 }
 0x2f0   : > { %v2313_v4 = vpop.xlane.xlu0 %2312 }
 0x2f1   : > { %vm2405_vm2 = vcmp.eq.f32.partialorder %v2313_v4, 0.0 }
 0x2f2   : > { %v2437_v35 = vsel %vm2405_vm2, 1.0, %v2313_v4 }
 0x2f3   : > { %3703 = vrcp.f32 %v2437_v35 }
 0x2f4   : > { %v2316_v23 = vpop.xlane.xlu1 %2315 }
 0x2f5   : > { %vm2406_vm3 = vcmp.eq.f32.partialorder %v2316_v23, 0.0 }
 0x2f6   : > { %v2438_v25 = vsel %vm2406_vm3, 1.0, %v2316_v23 }
 0x2f7   : > { %3705 = vrcp.f32 %v2438_v25 }
 0x2f8   : > { %v2319_v47 = vpop.xlane.xlu1 %2318 }
 0x2f9   : > { %vm2407_vm4 = vcmp.eq.f32.partialorder %v2319_v47, 0.0 }
 0x2fa   : > { %v2439_v59 = vsel %vm2407_vm4, 1.0, %v2319_v47  ;;  %v6079_v47 = vmax.f32 %v4685_v21, 0.0  ;;  %v6082_v21 = vmax.f32 %v4700_v15, 0.0 }
 0x2fb   : > { %3707 = vrcp.f32 %v2439_v59 }
 0x2fc   : > { %v3702_v24 = vpop.eup %3701  ;;  %v2322_v14 = vpop.xlane.xlu0 %2321 }
 0x2fd   : > { %vm2408_vm5 = vcmp.eq.f32.partialorder %v2322_v14, 0.0  ;;  %v5062_v44 = vmul.f32 %v3702_v24, %v6077_v31  ;;  %v5066_v37 = vmul.f32 %v3702_v24, %v6078_v38 }
 0x2fe   : > { %v2440_v4 = vsel %vm2408_vm5, 1.0, %v2322_v14 }
 0x2ff   : > { %3709 = vrcp.f32 %v2440_v4  ;;  %v2564_v23 = vmax.f32 %v5062_v44, %v5066_v37  ;;  %v6081_v4 = vmax.f32 %v4697_v16, 0.0  ;;  %v6084_v16 = vmax.f32 %v4712_v39, 0.0 }
 0x300   : > { %v3704_v25 = vpop.eup %3703  ;;  %v2325_v35 = vpop.xlane.xlu1 %2324 }
 0x301   : > { %vm2409_vm6 = vcmp.eq.f32.partialorder %v2325_v35, 0.0  ;;  %2565 = vmax.xlane.f32.xlu0 %v2564_v23  ;;  %v5072_v59 = vmul.f32 %v3704_v25, %v6079_v47  ;;  %v5076_v31 = vmul.f32 %v3704_v25, %v6080_v40 }
 0x302   : > { %v2441_v45 = vsel %vm2409_vm6, 1.0, %v2325_v35 }
 0x303   : > { %3711 = vrcp.f32 %v2441_v45  ;;  %v2567_v24 = vmax.f32 %v5072_v59, %v5076_v31  ;;  %v6083_v45 = vmax.f32 %v4709_v52, 0.0  ;;  %v6086_v52 = vmax.f32 %v4724_v32, 0.0 }
 0x304   : > { %v3706_v14 = vpop.eup %3705  ;;  %v2328_v38 = vpop.xlane.xlu0 %2327 }
 0x305   : > { %vm2410_vm7 = vcmp.eq.f32.partialorder %v2328_v38, 0.0  ;;  %2568 = vmax.xlane.f32.xlu1 %v2567_v24  ;;  %v5082_v23 = vmul.f32 %v3706_v14, %v6081_v4  ;;  %v5086_v47 = vmul.f32 %v3706_v14, %v6082_v21 }
 0x306   : > { %v2442_v26 = vsel %vm2410_vm7, 1.0, %v2328_v38 }
 0x307   : > { %3713 = vrcp.f32 %v2442_v26  ;;  %v2570_v25 = vmax.f32 %v5082_v23, %v5086_v47  ;;  %v6085_v26 = vmax.f32 %v4721_v7, 0.0  ;;  %v6088_v7 = vmax.f32 %v4736_v30, 0.0 }
 0x308   : > { %v3708_v35 = vpop.eup %3707  ;;  %v2331_v40 = vpop.xlane.xlu1 %2330 }
 0x309   : > { %vm2411_vm8 = vcmp.eq.f32.partialorder %v2331_v40, 0.0  ;;  %2571 = vmax.xlane.f32.xlu0 %v2570_v25  ;;  %v5092_v24 = vmul.f32 %v3708_v35, %v6083_v45  ;;  %v5096_v4 = vmul.f32 %v3708_v35, %v6084_v16 }
 0x30a   : > { %v2443_v15 = vsel %vm2411_vm8, 1.0, %v2331_v40 }
 0x30b   : > { %3715 = vrcp.f32 %v2443_v15  ;;  %v2573_v14 = vmax.f32 %v5092_v24, %v5096_v4  ;;  %v6087_v15 = vmax.f32 %v4733_v5, 0.0  ;;  %v6090_v5 = vmax.f32 %v4748_v19, 0.0 }
 0x30c   : > { %v3710_v38 = vpop.eup %3709  ;;  %v2334_v21 = vpop.xlane.xlu0 %2333 }
 0x30d   : > { %vm2412_vm9 = vcmp.eq.f32.partialorder %v2334_v21, 0.0  ;;  %2574 = vmax.xlane.f32.xlu1 %v2573_v14  ;;  %v5102_v25 = vmul.f32 %v3710_v38, %v6085_v26  ;;  %v5106_v45 = vmul.f32 %v3710_v38, %v6086_v52 }
 0x30e   : > { %v2444_v39 = vsel %vm2412_vm9, 1.0, %v2334_v21 }
 0x30f   : > { %3717 = vrcp.f32 %v2444_v39  ;;  %v2576_v35 = vmax.f32 %v5102_v25, %v5106_v45  ;;  %v6089_v39 = vmax.f32 %v4745_v1, 0.0  ;;  %v6092_v1 = vmax.f32 %v4760_v13, 0.0 }
 0x310   : > { %v3712_v40 = vpop.eup %3711  ;;  %v2337_v16 = vpop.xlane.xlu1 %2336 }
 0x311   : > { %vm2413_vm10 = vcmp.eq.f32.partialorder %v2337_v16, 0.0  ;;  %2577 = vmax.xlane.f32.xlu0 %v2576_v35  ;;  %v5112_v14 = vmul.f32 %v3712_v40, %v6087_v15  ;;  %v5116_v26 = vmul.f32 %v3712_v40, %v6088_v7 }
 0x312   : > { %v2445_v32 = vsel %vm2413_vm10, 1.0, %v2337_v16 }
 0x313   : > { %3719 = vrcp.f32 %v2445_v32  ;;  %v2579_v38 = vmax.f32 %v5112_v14, %v5116_v26  ;;  %v6091_v32 = vmax.f32 %v4757_v62, 0.0  ;;  %v6094_v62 = vmax.f32 %v4772_v11, 0.0 }
 0x314   : > { %v3714_v21 = vpop.eup %3713  ;;  %v2340_v52 = vpop.xlane.xlu0 %2339 }
 0x315   : > { %vm2414_vm11 = vcmp.eq.f32.partialorder %v2340_v52, 0.0  ;;  %2580 = vmax.xlane.f32.xlu1 %v2579_v38  ;;  %v5122_v35 = vmul.f32 %v3714_v21, %v6089_v39  ;;  %v5126_v15 = vmul.f32 %v3714_v21, %v6090_v5 }
 0x316   : > { %v2446_v30 = vsel %vm2414_vm11, 1.0, %v2340_v52 }
 0x317   : > { %3721 = vrcp.f32 %v2446_v30  ;;  %v2582_v40 = vmax.f32 %v5122_v35, %v5126_v15  ;;  %v6093_v30 = vmax.f32 %v4769_v58, 0.0  ;;  %v6096_v58 = vmax.f32 %v4784_v6, 0.0 }
 0x318   : > { %v3716_v16 = vpop.eup %3715  ;;  %v2343_v7 = vpop.xlane.xlu1 %2342 }
 0x319   : > { %vm2415_vm12 = vcmp.eq.f32.partialorder %v2343_v7, 0.0  ;;  %2583 = vmax.xlane.f32.xlu0 %v2582_v40  ;;  %v5132_v38 = vmul.f32 %v3716_v16, %v6091_v32  ;;  %v5136_v39 = vmul.f32 %v3716_v16, %v6092_v1 }
 0x31a   : > { %v2447_v19 = vsel %vm2415_vm12, 1.0, %v2343_v7 }
 0x31b   : > { %3723 = vrcp.f32 %v2447_v19  ;;  %v2585_v21 = vmax.f32 %v5132_v38, %v5136_v39  ;;  %v6095_v19 = vmax.f32 %v4781_v54, 0.0  ;;  %v6098_v54 = vmax.f32 %v4796_v2, 0.0 }
 0x31c   : > { %v3718_v52 = vpop.eup %3717  ;;  %v2346_v5 = vpop.xlane.xlu0 %2345 }
 0x31d   : > { %vm2416_vm13 = vcmp.eq.f32.partialorder %v2346_v5, 0.0  ;;  %2586 = vmax.xlane.f32.xlu1 %v2585_v21  ;;  %v5142_v40 = vmul.f32 %v3718_v52, %v6093_v30  ;;  %v5146_v32 = vmul.f32 %v3718_v52, %v6094_v62 }
 0x31e   : > { %v2448_v13 = vsel %vm2416_vm13, 1.0, %v2346_v5 }
 0x31f   : > { %3725 = vrcp.f32 %v2448_v13  ;;  %v2588_v16 = vmax.f32 %v5142_v40, %v5146_v32  ;;  %v6097_v13 = vmax.f32 %v4793_v53, 0.0  ;;  %v6100_v53 = vmax.f32 %v4808_v63, 0.0 }
 0x320   : > { %v3720_v7 = vpop.eup %3719  ;;  %v2349_v1 = vpop.xlane.xlu1 %2348 }
 0x321   : > { %vm2417_vm14 = vcmp.eq.f32.partialorder %v2349_v1, 0.0  ;;  %2589 = vmax.xlane.f32.xlu0 %v2588_v16  ;;  %v5152_v21 = vmul.f32 %v3720_v7, %v6095_v19  ;;  %v5156_v30 = vmul.f32 %v3720_v7, %v6096_v58 }
 0x322   : > { %v2449_v11 = vsel %vm2417_vm14, 1.0, %v2349_v1 }
 0x323   : > { %3727 = vrcp.f32 %v2449_v11  ;;  %v2591_v52 = vmax.f32 %v5152_v21, %v5156_v30  ;;  %v6099_v11 = vmax.f32 %v4805_v12, 0.0  ;;  %v6102_v12 = vmax.f32 %v4820_v60, 0.0 }
 0x324   : > { %v3722_v5 = vpop.eup %3721  ;;  %v2352_v62 = vpop.xlane.xlu0 %2351 }
 0x325   : > { %vm2418_vm15 = vcmp.eq.f32.partialorder %v2352_v62, 0.0  ;;  %2592 = vmax.xlane.f32.xlu1 %v2591_v52  ;;  %v5162_v16 = vmul.f32 %v3722_v5, %v6097_v13  ;;  %v5166_v19 = vmul.f32 %v3722_v5, %v6098_v54 }
 0x326   : > { %v2450_v6 = vsel %vm2418_vm15, 1.0, %v2352_v62 }
 0x327   : > { %3729 = vrcp.f32 %v2450_v6  ;;  %v2594_v7 = vmax.f32 %v5162_v16, %v5166_v19  ;;  %v6101_v6 = vmax.f32 %v4817_v42, 0.0  ;;  %v6104_v42 = vmax.f32 %v4832_v57, 0.0 }
 0x328   : > { %v3724_v1 = vpop.eup %3723  ;;  %v2355_v58 = vpop.xlane.xlu1 %2354 }
 0x329   : > { %vm2419_vm0 = vcmp.eq.f32.partialorder %v2355_v58, 0.0  ;;  %2595 = vmax.xlane.f32.xlu0 %v2594_v7  ;;  %v5172_v52 = vmul.f32 %v3724_v1, %v6099_v11  ;;  %v5176_v13 = vmul.f32 %v3724_v1, %v6100_v53 }
 0x32a   : > { %v2451_v2 = vsel %vm2419_vm0, 1.0, %v2355_v58 }
 0x32b   : > { %3731 = vrcp.f32 %v2451_v2  ;;  %v2597_v5 = vmax.f32 %v5172_v52, %v5176_v13  ;;  %v6103_v2 = vmax.f32 %v4829_v27, 0.0  ;;  %v6106_v27 = vmax.f32 %v4844_v10, 0.0 }
 0x32c   : > { %v3726_v62 = vpop.eup %3725  ;;  %v2358_v54 = vpop.xlane.xlu0 %2357 }
 0x32d   : > { %vm2420_vm1 = vcmp.eq.f32.partialorder %v2358_v54, 0.0  ;;  %2598 = vmax.xlane.f32.xlu1 %v2597_v5  ;;  %v5182_v7 = vmul.f32 %v3726_v62, %v6101_v6  ;;  %v5186_v11 = vmul.f32 %v3726_v62, %v6102_v12 }
 0x32e   : > { %v2452_v63 = vsel %vm2420_vm1, 1.0, %v2358_v54 }
 0x32f   : > { %3733 = vrcp.f32 %v2452_v63  ;;  %v2600_v1 = vmax.f32 %v5182_v7, %v5186_v11  ;;  %v6105_v63 = vmax.f32 %v4841_v51, 0.0  ;;  %v6108_v51 = vmax.f32 %v4856_v50, 0.0 }
 0x330   : > { %v3728_v58 = vpop.eup %3727  ;;  %v2361_v53 = vpop.xlane.xlu1 %2360 }
 0x331   : > { %vm2421_vm2 = vcmp.eq.f32.partialorder %v2361_v53, 0.0  ;;  %2601 = vmax.xlane.f32.xlu0 %v2600_v1  ;;  %v5192_v5 = vmul.f32 %v3728_v58, %v6103_v2  ;;  %v5196_v6 = vmul.f32 %v3728_v58, %v6104_v42 }
 0x332   : > { %v2453_v60 = vsel %vm2421_vm2, 1.0, %v2361_v53 }
 0x333   : > { %3735 = vrcp.f32 %v2453_v60  ;;  %v2603_v62 = vmax.f32 %v5192_v5, %v5196_v6  ;;  %v6107_v60 = vmax.f32 %v4853_v3, 0.0  ;;  %v6110_v3 = vmax.f32 %v4868_v49, 0.0 }
 0x334   : > { %v3730_v54 = vpop.eup %3729  ;;  %v2364_v12 = vpop.xlane.xlu0 %2363 }
 0x335   : > { %vm2422_vm3 = vcmp.eq.f32.partialorder %v2364_v12, 0.0  ;;  %2604 = vmax.xlane.f32.xlu1 %v2603_v62  ;;  %v5202_v1 = vmul.f32 %v3730_v54, %v6105_v63  ;;  %v5206_v2 = vmul.f32 %v3730_v54, %v6106_v27 }
 0x336   : > { %v2454_v57 = vsel %vm2422_vm3, 1.0, %v2364_v12 }
 0x337   : > { %3737 = vrcp.f32 %v2454_v57  ;;  %v2606_v58 = vmax.f32 %v5202_v1, %v5206_v2  ;;  %v6109_v57 = vmax.f32 %v4865_v56, 0.0  ;;  %v6112_v56 = vmax.f32 %v4880_v36, 0.0 }
 0x338   : > { %v3732_v53 = vpop.eup %3731  ;;  %v2367_v42 = vpop.xlane.xlu1 %2366 }
 0x339   : > { %vm2423_vm4 = vcmp.eq.f32.partialorder %v2367_v42, 0.0  ;;  %2607 = vmax.xlane.f32.xlu0 %v2606_v58  ;;  %v5212_v62 = vmul.f32 %v3732_v53, %v6107_v60  ;;  %v5216_v63 = vmul.f32 %v3732_v53, %v6108_v51 }
 0x33a   : > { %v2455_v10 = vsel %vm2423_vm4, 1.0, %v2367_v42 }
 0x33b   : > { %3739 = vrcp.f32 %v2455_v10  ;;  %v2609_v54 = vmax.f32 %v5212_v62, %v5216_v63  ;;  %v6111_v10 = vmax.f32 %v4877_v41, 0.0  ;;  %v6114_v41 = vmax.f32 %v4892_v20, 0.0 }
 0x33c   : > { %v3734_v12 = vpop.eup %3733  ;;  %v2370_v27 = vpop.xlane.xlu0 %2369 }
 0x33d   : > { %vm2424_vm5 = vcmp.eq.f32.partialorder %v2370_v27, 0.0  ;;  %2610 = vmax.xlane.f32.xlu1 %v2609_v54  ;;  %v5222_v58 = vmul.f32 %v3734_v12, %v6109_v57  ;;  %v5226_v60 = vmul.f32 %v3734_v12, %v6110_v3 }
 0x33e   : > { %v2456_v50 = vsel %vm2424_vm5, 1.0, %v2370_v27 }
 0x33f   : > { %3741 = vrcp.f32 %v2456_v50  ;;  %v2612_v53 = vmax.f32 %v5222_v58, %v5226_v60  ;;  %v6113_v50 = vmax.f32 %v4889_v29, 0.0  ;;  %v6116_v29 = vmax.f32 %v4904_v8, 0.0 }
 0x340   : > { %v3736_v42 = vpop.eup %3735  ;;  %v2373_v51 = vpop.xlane.xlu1 %2372 }
 0x341   : > { %vm2425_vm6 = vcmp.eq.f32.partialorder %v2373_v51, 0.0  ;;  %2613 = vmax.xlane.f32.xlu0 %v2612_v53  ;;  %v5232_v54 = vmul.f32 %v3736_v42, %v6111_v10  ;;  %v5236_v57 = vmul.f32 %v3736_v42, %v6112_v56 }
 0x342   : > { %v2457_v49 = vsel %vm2425_vm6, 1.0, %v2373_v51 }
 0x343   : > { %3743 = vrcp.f32 %v2457_v49  ;;  %v2615_v12 = vmax.f32 %v5232_v54, %v5236_v57  ;;  %v6115_v49 = vmax.f32 %v4901_v18, 0.0  ;;  %v6118_v18 = vmax.f32 %v4916_v61, 0.0 }
 0x344   : > { %v3738_v27 = vpop.eup %3737  ;;  %v2376_v3 = vpop.xlane.xlu0 %2375 }
 0x345   : > { %vm2426_vm7 = vcmp.eq.f32.partialorder %v2376_v3, 0.0  ;;  %2616 = vmax.xlane.f32.xlu1 %v2615_v12  ;;  %v5242_v53 = vmul.f32 %v3738_v27, %v6113_v50  ;;  %v5246_v10 = vmul.f32 %v3738_v27, %v6114_v41 }
 0x346   : > { %v2458_v36 = vsel %vm2426_vm7, 1.0, %v2376_v3 }
 0x347   : > { %3745 = vrcp.f32 %v2458_v36  ;;  %v2618_v42 = vmax.f32 %v5242_v53, %v5246_v10  ;;  %v6117_v36 = vmax.f32 %v4913_v9, 0.0  ;;  %v6120_v9 = vmax.f32 %v4928_v46, 0.0 }
 0x348   : > { %v3740_v51 = vpop.eup %3739  ;;  %v2379_v56 = vpop.xlane.xlu1 %2378 }
 0x349   : > { %vm2427_vm8 = vcmp.eq.f32.partialorder %v2379_v56, 0.0  ;;  %2619 = vmax.xlane.f32.xlu0 %v2618_v42  ;;  %v5252_v12 = vmul.f32 %v3740_v51, %v6115_v49  ;;  %v5256_v50 = vmul.f32 %v3740_v51, %v6116_v29 }
 0x34a   : > { %v2459_v20 = vsel %vm2427_vm8, 1.0, %v2379_v56 }
 0x34b   : > { %3747 = vrcp.f32 %v2459_v20  ;;  %v2621_v27 = vmax.f32 %v5252_v12, %v5256_v50  ;;  %v6119_v20 = vmax.f32 %v4925_v0, 0.0  ;;  %v6122_v0 = vmax.f32 %v4940_v34, 0.0 }
 0x34c   : > { %v3742_v3 = vpop.eup %3741  ;;  %v2382_v41 = vpop.xlane.xlu0 %2381 }
 0x34d   : > { %vm2428_vm9 = vcmp.eq.f32.partialorder %v2382_v41, 0.0  ;;  %2622 = vmax.xlane.f32.xlu1 %v2621_v27  ;;  %v5262_v42 = vmul.f32 %v3742_v3, %v6117_v36  ;;  %v5266_v49 = vmul.f32 %v3742_v3, %v6118_v18 }
 0x34e   : > { %v2460_v8 = vsel %vm2428_vm9, 1.0, %v2382_v41 }
 0x34f   : > { %3749 = vrcp.f32 %v2460_v8  ;;  %v2624_v51 = vmax.f32 %v5262_v42, %v5266_v49  ;;  %v6121_v8 = vmax.f32 %v4937_v55, 0.0  ;;  %v6126_v55 = vmax.f32 %v4952_v22, 0.0 }
 0x350   : > { %v3744_v56 = vpop.eup %3743  ;;  %v2385_v29 = vpop.xlane.xlu1 %2384 }
 0x351   : > { %vm2429_vm10 = vcmp.eq.f32.partialorder %v2385_v29, 0.0  ;;  %2625 = vmax.xlane.f32.xlu0 %v2624_v51  ;;  %v5272_v27 = vmul.f32 %v3744_v56, %v6119_v20  ;;  %v5276_v36 = vmul.f32 %v3744_v56, %v6120_v9 }
 0x352   : > { %v2461_v61 = vsel %vm2429_vm10, 1.0, %v2385_v29 }
 0x353   : > { %3751 = vrcp.f32 %v2461_v61  ;;  %v2627_v3 = vmax.f32 %v5272_v27, %v5276_v36  ;;  %v6124_v61 = vmax.f32 %v4949_v43, 0.0  ;;  %v6131_v43 = vld [vmem:[#allocation69_spill] sm:$0xff] }
 0x354   : > { %v3746_v41 = vpop.eup %3745  ;;  %v2388_v18 = vpop.xlane.xlu0 %2387 }
 0x355   : > { %vm2430_vm11 = vcmp.eq.f32.partialorder %v2388_v18, 0.0  ;;  %2628 = vmax.xlane.f32.xlu1 %v2627_v3  ;;  %v5282_v51 = vmul.f32 %v3746_v41, %v6121_v8  ;;  %v5286_v20 = vmul.f32 %v3746_v41, %v6122_v0 }
 0x356   : > { %v2462_v46 = vsel %vm2430_vm11, 1.0, %v2388_v18 }
 0x357   : > { %6123 = vst [vmem:[#allocation81_spill] sm:$0xff] %v5286_v20  ;;  %3753 = vrcp.f32 %v2462_v46  ;;  %v2630_v56 = vmax.f32 %v5282_v51, %v5286_v20  ;;  %v6128_v46 = vld [vmem:[#allocation68_spill] sm:$0xff] }
 0x358   : > { %v3748_v29 = vpop.eup %3747  ;;  %v2391_v9 = vpop.xlane.xlu1 %2390  ;;  %v6129_v17 = vmax.f32 %v6128_v46, 0.0  ;;  %v6137_v46 = vld [vmem:[#allocation71_spill] sm:$0xff] }
 0x359   : > { %vm2431_vm12 = vcmp.eq.f32.partialorder %v2391_v9, 0.0  ;;  %2631 = vmax.xlane.f32.xlu0 %v2630_v56  ;;  %v5292_v3 = vmul.f32 %v3748_v29, %v6124_v61  ;;  %v5296_v8 = vmul.f32 %v3748_v29, %v6126_v55  ;;  %v6132_v61 = vmax.f32 %v6131_v43, 0.0 }
 0x35a   : > { %v2463_v34 = vsel %vm2431_vm12, 1.0, %v2391_v9 }
 0x35b   : > { %6125 = vst [vmem:[#allocation82_spill] sm:$0xff] %v5292_v3  ;;  %6127 = vst [vmem:[#allocation83_spill] sm:$0xff] %v5296_v8  ;;  %3755 = vrcp.f32 %v2463_v34  ;;  %v2633_v41 = vmax.f32 %v5292_v3, %v5296_v8  ;;  %v6134_v34 = vld [vmem:[#allocation70_spill] sm:$0xff] }
 0x35c   : > { %v3750_v18 = vpop.eup %3749  ;;  %v2394_v0 = vpop.xlane.xlu0 %2393  ;;  %v6135_v8 = vmax.f32 %v6134_v34, 0.0  ;;  %v6143_v34 = vld [vmem:[#allocation73_spill] sm:$0xff] }
 0x35d   : > { %vm2432_vm13 = vcmp.eq.f32.partialorder %v2394_v0, 0.0  ;;  %2634 = vmax.xlane.f32.xlu1 %v2633_v41  ;;  %v5302_v56 = vmul.f32 %v3750_v18, %v6129_v17  ;;  %v5306_v20 = vmul.f32 %v3750_v18, %v6132_v61  ;;  %v6138_v17 = vmax.f32 %v6137_v46, 0.0 }
 0x35e   : > { %v2464_v22 = vsel %vm2432_vm13, 1.0, %v2394_v0 }
 0x35f   : > { %6130 = vst [vmem:[#allocation68_spill] sm:$0xff] %v5302_v56  ;;  %6133 = vst [vmem:[#allocation69_spill] sm:$0xff] %v5306_v20  ;;  %3757 = vrcp.f32 %v2464_v22  ;;  %v2636_v29 = vmax.f32 %v5302_v56, %v5306_v20  ;;  %v6140_v22 = vld [vmem:[#allocation72_spill] sm:$0xff] }
 0x360   : > { %v3752_v9 = vpop.eup %3751  ;;  %v2397_v55 = vpop.xlane.xlu1 %2396  ;;  %v6141_v20 = vmax.f32 %v6140_v22, 0.0  ;;  %v6148_v22 = vld [vmem:[#allocation75_spill] sm:$0xff] }
 0x361   : > { %vm2433_vm14 = vcmp.eq.f32.partialorder %v2397_v55, 0.0  ;;  %2637 = vmax.xlane.f32.xlu0 %v2636_v29  ;;  %v5312_v41 = vmul.f32 %v3752_v9, %v6135_v8  ;;  %v5316_v3 = vmul.f32 %v3752_v9, %v6138_v17  ;;  %v6144_v8 = vmax.f32 %v6143_v34, 0.0 }
 0x362   : > { %v2465_v43 = vsel %vm2433_vm14, 1.0, %v2397_v55 }
 0x363   : > { %6136 = vst [vmem:[#allocation70_spill] sm:$0xff] %v5312_v41  ;;  %6139 = vst [vmem:[#allocation71_spill] sm:$0xff] %v5316_v3  ;;  %3759 = vrcp.f32 %v2465_v43  ;;  %v2639_v18 = vmax.f32 %v5312_v41, %v5316_v3  ;;  %v6146_v43 = vld [vmem:[#allocation74_spill] sm:$0xff] }
 0x364   : > { %v3754_v0 = vpop.eup %3753  ;;  %v2400_v61 = vpop.xlane.xlu0 %2399  ;;  %v6147_v3 = vmax.f32 %v6146_v43, 0.0 }
 0x365   : > { %vm2434_vm15 = vcmp.eq.f32.partialorder %v2400_v61, 0.0  ;;  %2640 = vmax.xlane.f32.xlu1 %v2639_v18  ;;  %v5322_v29 = vmul.f32 %v3754_v0, %v6141_v20  ;;  %v5326_v56 = vmul.f32 %v3754_v0, %v6144_v8  ;;  %v6149_v20 = vmax.f32 %v6148_v22, 0.0  ;;  %v6150_v8 = vld [vmem:[#allocation76_spill] sm:$0xff] }
 0x366   : > { %v2466_v46 = vsel %vm2434_vm15, 1.0, %v2400_v61 }
 0x367   : > { %6142 = vst [vmem:[#allocation72_spill] sm:$0xff] %v5322_v29  ;;  %6145 = vst [vmem:[#allocation73_spill] sm:$0xff] %v5326_v56  ;;  %3761 = vrcp.f32 %v2466_v46  ;;  %v2642_v9 = vmax.f32 %v5322_v29, %v5326_v56  ;;  %v6151_v46 = vmax.f32 %v6150_v8, 0.0 }
 0x368   : > { %v3756_v55 = vpop.eup %3755  ;;  %v2403_v17 = vpop.xlane.xlu1 %2402 }
 0x369   : > { %vm2435_vm0 = vcmp.eq.f32.partialorder %v2403_v17, 0.0  ;;  %2643 = vmax.xlane.f32.xlu0 %v2642_v9  ;;  %v5332_v18 = vmul.f32 %v3756_v55, %v6147_v3  ;;  %v5336_v41 = vmul.f32 %v3756_v55, %v6149_v20  ;;  %v6152_v9 = vld [vmem:[#allocation77_spill] sm:$0xff]  ;;  %v6156_v20 = vmax.f32 %v5024_v28, 0.0  ;;  %v6162_v28 = vld [vmem:[#allocation79_spill] sm:$0xff] }
 0x36a   : > { %v2467_v34 = vsel %vm2435_vm0, 1.0, %v2403_v17  ;;  %v6153_v29 = vmax.f32 %v6152_v9, 0.0  ;;  %v6154_v17 = vmax.f32 %v5021_v48, 0.0 }
 0x36b   : > { %3763 = vrcp.f32 %v2467_v34  ;;  %v2645_v0 = vmax.f32 %v5332_v18, %v5336_v41 }
 0x36c   : > { %v3758_v61 = vpop.eup %3757 }
 0x36d   : > { %2646 = vmax.xlane.f32.xlu1 %v2645_v0  ;;  %v5342_v56 = vmul.f32 %v3758_v61, %v6151_v46  ;;  %v5346_v43 = vmul.f32 %v3758_v61, %v6153_v29  ;;  %v6158_v29 = vmax.f32 %v5033_v33, 0.0  ;;  %v6159_v46 = vld [vmem:[#allocation78_spill] sm:$0xff] }
 0x36e   : > { %v6160_v9 = vmax.f32 %v6159_v46, 0.0 }
 0x36f   : > { %v2648_v3 = vmax.f32 %v5342_v56, %v5346_v43 }
 0x370   : > { %v3760_v55 = vpop.eup %3759 }
 0x371   : > { %2649 = vmax.xlane.f32.xlu0 %v2648_v3  ;;  %v5352_v22 = vmul.f32 %v3760_v55, %v6154_v17  ;;  %v5356_v34 = vmul.f32 %v3760_v55, %v6156_v20  ;;  %v6163_v55 = vmax.f32 %v6162_v28, 0.0 }
 0x373   : > { %6155 = vst [vmem:[#allocation74_spill] sm:$0xff] %v5352_v22  ;;  %6157 = vst [vmem:[#allocation75_spill] sm:$0xff] %v5356_v34  ;;  %v2651_v0 = vmax.f32 %v5352_v22, %v5356_v34  ;;  %v6164_v34 = vld [vmem:[#allocation80_spill] sm:$0xff] }
 0x374   : > { %v3762_v8 = vpop.eup %3761  ;;  %v6165_v22 = vmax.f32 %v6164_v34, 0.0 }
 0x375   : > { %2652 = vmax.xlane.f32.xlu1 %v2651_v0  ;;  %v5362_v61 = vmul.f32 %v3762_v8, %v6158_v29  ;;  %v5366_v3 = vmul.f32 %v3762_v8, %v6160_v9 }
 0x377   : > { %6161 = vst [vmem:[#allocation76_spill] sm:$0xff] %v5366_v3  ;;  %v2654_v48 = vmax.f32 %v5362_v61, %v5366_v3 }
 0x378   : > { %v3764_v17 = vpop.eup %3763 }
 0x379   : > { %2655 = vmax.xlane.f32.xlu0 %v2654_v48  ;;  %v5372_v20 = vmul.f32 %v3764_v17, %v6163_v55  ;;  %v5376_v0 = vmul.f32 %v3764_v17, %v6165_v22 }
 0x37b   : > { %6166 = vst [vmem:[#allocation77_spill] sm:$0xff] %v5376_v0  ;;  %v2657_v33 = vmax.f32 %v5372_v20, %v5376_v0 }
 0x37d   : > { %2658 = vmax.xlane.f32.xlu1 %v2657_v33 }
 0x38a   : > { %v2566_v29 = vpop.xlane.xlu0 %2565 }
 0x38b   : > { %v2660_v8 = vsub.f32 %v5062_v44, %v2566_v29  ;;  %v2661_v46 = vsub.f32 %v5066_v37, %v2566_v29 }
 0x38d   : > { %v2724_v9 = vmul.f32 1.442695, %v2660_v8  ;;  %v2726_v3 = vmul.f32 1.442695, %v2661_v46 }
 0x38e   : > { %v2569_v48 = vpop.xlane.xlu1 %2568 }
 0x38f   : > { %3765 = vpow2.f32 %v2724_v9  ;;  %v2662_v28 = vsub.f32 %v5072_v59, %v2569_v48  ;;  %v2663_v55 = vsub.f32 %v5076_v31, %v2569_v48 }
 0x390   : > { %3767 = vpow2.f32 %v2726_v3 }
 0x391   : > { %v2728_v22 = vmul.f32 1.442695, %v2662_v28  ;;  %v2730_v34 = vmul.f32 1.442695, %v2663_v55 }
 0x392   : > { %v2572_v17 = vpop.xlane.xlu0 %2571 }
 0x393   : > { %3769 = vpow2.f32 %v2728_v22  ;;  %v2664_v33 = vsub.f32 %v5082_v23, %v2572_v17  ;;  %v2665_v0 = vsub.f32 %v5086_v47, %v2572_v17 }
 0x394   : > { %3771 = vpow2.f32 %v2730_v34 }
 0x395   : > { %v2732_v44 = vmul.f32 1.442695, %v2664_v33  ;;  %v2734_v37 = vmul.f32 1.442695, %v2665_v0 }
 0x396   : > { %v2575_v29 = vpop.xlane.xlu1 %2574 }
 0x397   : > { %3773 = vpow2.f32 %v2732_v44  ;;  %v2666_v8 = vsub.f32 %v5092_v24, %v2575_v29  ;;  %v2667_v59 = vsub.f32 %v5096_v4, %v2575_v29 }
 0x398   : > { %3775 = vpow2.f32 %v2734_v37 }
 0x399   : > { %v2736_v31 = vmul.f32 1.442695, %v2666_v8  ;;  %v2738_v3 = vmul.f32 1.442695, %v2667_v59 }
 0x39a   : > { %v2578_v46 = vpop.xlane.xlu0 %2577 }
 0x39b   : > { %3777 = vpow2.f32 %v2736_v31  ;;  %v2668_v9 = vsub.f32 %v5102_v25, %v2578_v46  ;;  %v2669_v23 = vsub.f32 %v5106_v45, %v2578_v46 }
 0x39c   : > { %v5390_v48 = vpop.eup %3765  ;;  %3779 = vpow2.f32 %v2738_v3 }
 0x39d   : > { %v5392_v47 = vpop.eup %3767  ;;  %v2740_v0 = vmul.f32 1.442695, %v2668_v9  ;;  %v2742_v28 = vmul.f32 1.442695, %v2669_v23 }
 0x39e   : > { %v2581_v55 = vpop.xlane.xlu1 %2580  ;;  %v2852_v24 = vadd.f32 %v5392_v47, %v5390_v48 }
 0x39f   : > { %3781 = vpow2.f32 %v2740_v0  ;;  %v2670_v4 = vsub.f32 %v5112_v14, %v2581_v55  ;;  %v2671_v22 = vsub.f32 %v5116_v26, %v2581_v55 }
 0x3a0   : > { %v5398_v34 = vpop.eup %3769  ;;  %3783 = vpow2.f32 %v2742_v28  ;;  %2853 = vadd.xlane.f32.xlu0 %v2852_v24 }
 0x3a1   : > { %v5400_v25 = vpop.eup %3771  ;;  %v2744_v45 = vmul.f32 1.442695, %v2670_v4  ;;  %v2746_v17 = vmul.f32 1.442695, %v2671_v22 }
 0x3a2   : > { %v2584_v33 = vpop.xlane.xlu0 %2583  ;;  %v2855_v44 = vadd.f32 %v5400_v25, %v5398_v34 }
 0x3a3   : > { %3785 = vpow2.f32 %v2744_v45  ;;  %v2672_v37 = vsub.f32 %v5122_v35, %v2584_v33  ;;  %v2673_v29 = vsub.f32 %v5126_v15, %v2584_v33 }
 0x3a4   : > { %v5406_v14 = vpop.eup %3773  ;;  %3787 = vpow2.f32 %v2746_v17  ;;  %2856 = vadd.xlane.f32.xlu1 %v2855_v44 }
 0x3a5   : > { %v5408_v26 = vpop.eup %3775  ;;  %v2748_v8 = vmul.f32 1.442695, %v2672_v37  ;;  %v2750_v59 = vmul.f32 1.442695, %v2673_v29 }
 0x3a6   : > { %v2587_v31 = vpop.xlane.xlu1 %2586  ;;  %v2858_v3 = vadd.f32 %v5408_v26, %v5406_v14 }
 0x3a7   : > { %3789 = vpow2.f32 %v2748_v8  ;;  %v2674_v46 = vsub.f32 %v5132_v38, %v2587_v31  ;;  %v2675_v9 = vsub.f32 %v5136_v39, %v2587_v31 }
 0x3a8   : > { %v5414_v35 = vpop.eup %3777  ;;  %3791 = vpow2.f32 %v2750_v59  ;;  %2859 = vadd.xlane.f32.xlu0 %v2858_v3 }
 0x3a9   : > { %v5416_v15 = vpop.eup %3779  ;;  %v2752_v23 = vmul.f32 1.442695, %v2674_v46  ;;  %v2754_v0 = vmul.f32 1.442695, %v2675_v9 }
 0x3aa   : > { %v2590_v28 = vpop.xlane.xlu0 %2589  ;;  %v2861_v55 = vadd.f32 %v5416_v15, %v5414_v35 }
 0x3ab   : > { %3793 = vpow2.f32 %v2752_v23  ;;  %v2676_v24 = vsub.f32 %v5142_v40, %v2590_v28  ;;  %v2677_v4 = vsub.f32 %v5146_v32, %v2590_v28 }
 0x3ac   : > { %v5422_v38 = vpop.eup %3781  ;;  %3795 = vpow2.f32 %v2754_v0  ;;  %2862 = vadd.xlane.f32.xlu1 %v2861_v55 }
 0x3ad   : > { %v5424_v39 = vpop.eup %3783  ;;  %v2756_v22 = vmul.f32 1.442695, %v2676_v24  ;;  %v2758_v45 = vmul.f32 1.442695, %v2677_v4 }
 0x3ae   : > { %v2593_v17 = vpop.xlane.xlu1 %2592  ;;  %v2864_v33 = vadd.f32 %v5424_v39, %v5422_v38 }
 0x3af   : > { %3797 = vpow2.f32 %v2756_v22  ;;  %v2678_v44 = vsub.f32 %v5152_v21, %v2593_v17  ;;  %v2679_v37 = vsub.f32 %v5156_v30, %v2593_v17 }
 0x3b0   : > { %v5430_v40 = vpop.eup %3785  ;;  %3799 = vpow2.f32 %v2758_v45  ;;  %2865 = vadd.xlane.f32.xlu0 %v2864_v33 }
 0x3b1   : > { %v5432_v32 = vpop.eup %3787  ;;  %v2760_v29 = vmul.f32 1.442695, %v2678_v44  ;;  %v2762_v8 = vmul.f32 1.442695, %v2679_v37 }
 0x3b2   : > { %v2596_v59 = vpop.xlane.xlu0 %2595  ;;  %v2867_v31 = vadd.f32 %v5432_v32, %v5430_v40 }
 0x3b3   : > { %3801 = vpow2.f32 %v2760_v29  ;;  %v2680_v3 = vsub.f32 %v5162_v16, %v2596_v59  ;;  %v2681_v46 = vsub.f32 %v5166_v19, %v2596_v59 }
 0x3b4   : > { %v5438_v21 = vpop.eup %3789  ;;  %3803 = vpow2.f32 %v2762_v8  ;;  %2868 = vadd.xlane.f32.xlu1 %v2867_v31 }
 0x3b5   : > { %v5440_v30 = vpop.eup %3791  ;;  %v2764_v9 = vmul.f32 1.442695, %v2680_v3  ;;  %v2766_v23 = vmul.f32 1.442695, %v2681_v46 }
 0x3b6   : > { %v2599_v0 = vpop.xlane.xlu1 %2598  ;;  %v2870_v28 = vadd.f32 %v5440_v30, %v5438_v21 }
 0x3b7   : > { %3805 = vpow2.f32 %v2764_v9  ;;  %v2682_v55 = vsub.f32 %v5172_v52, %v2599_v0  ;;  %v2683_v24 = vsub.f32 %v5176_v13, %v2599_v0 }
 0x3b8   : > { %v5446_v16 = vpop.eup %3793  ;;  %3807 = vpow2.f32 %v2766_v23  ;;  %2871 = vadd.xlane.f32.xlu0 %v2870_v28 }
 0x3b9   : > { %v5448_v19 = vpop.eup %3795  ;;  %v2768_v4 = vmul.f32 1.442695, %v2682_v55  ;;  %v2770_v22 = vmul.f32 1.442695, %v2683_v24 }
 0x3ba   : > { %v2602_v45 = vpop.xlane.xlu0 %2601  ;;  %v2873_v17 = vadd.f32 %v5448_v19, %v5446_v16 }
 0x3bb   : > { %3809 = vpow2.f32 %v2768_v4  ;;  %v2684_v33 = vsub.f32 %v5182_v7, %v2602_v45  ;;  %v2685_v44 = vsub.f32 %v5186_v11, %v2602_v45 }
 0x3bc   : > { %v5454_v52 = vpop.eup %3797  ;;  %3811 = vpow2.f32 %v2770_v22  ;;  %2874 = vadd.xlane.f32.xlu1 %v2873_v17 }
 0x3bd   : > { %v5456_v13 = vpop.eup %3799  ;;  %v2772_v37 = vmul.f32 1.442695, %v2684_v33  ;;  %v2774_v29 = vmul.f32 1.442695, %v2685_v44 }
 0x3be   : > { %v2605_v8 = vpop.xlane.xlu1 %2604  ;;  %v2876_v59 = vadd.f32 %v5456_v13, %v5454_v52 }
 0x3bf   : > { %3813 = vpow2.f32 %v2772_v37  ;;  %v2686_v31 = vsub.f32 %v5192_v5, %v2605_v8  ;;  %v2687_v3 = vsub.f32 %v5196_v6, %v2605_v8 }
 0x3c0   : > { %v5462_v7 = vpop.eup %3801  ;;  %3815 = vpow2.f32 %v2774_v29  ;;  %2877 = vadd.xlane.f32.xlu0 %v2876_v59 }
 0x3c1   : > { %v5464_v11 = vpop.eup %3803  ;;  %v2776_v46 = vmul.f32 1.442695, %v2686_v31  ;;  %v2778_v9 = vmul.f32 1.442695, %v2687_v3 }
 0x3c2   : > { %v2608_v23 = vpop.xlane.xlu0 %2607  ;;  %v2879_v0 = vadd.f32 %v5464_v11, %v5462_v7 }
 0x3c3   : > { %3817 = vpow2.f32 %v2776_v46  ;;  %v2688_v28 = vsub.f32 %v5202_v1, %v2608_v23  ;;  %v2689_v55 = vsub.f32 %v5206_v2, %v2608_v23 }
 0x3c4   : > { %v5470_v5 = vpop.eup %3805  ;;  %3819 = vpow2.f32 %v2778_v9  ;;  %2880 = vadd.xlane.f32.xlu1 %v2879_v0 }
 0x3c5   : > { %v5472_v6 = vpop.eup %3807  ;;  %v2780_v24 = vmul.f32 1.442695, %v2688_v28  ;;  %v2782_v4 = vmul.f32 1.442695, %v2689_v55 }
 0x3c6   : > { %v2611_v22 = vpop.xlane.xlu1 %2610  ;;  %v2882_v45 = vadd.f32 %v5472_v6, %v5470_v5 }
 0x3c7   : > { %3821 = vpow2.f32 %v2780_v24  ;;  %v2690_v17 = vsub.f32 %v5212_v62, %v2611_v22  ;;  %v2691_v33 = vsub.f32 %v5216_v63, %v2611_v22 }
 0x3c8   : > { %v5478_v1 = vpop.eup %3809  ;;  %3823 = vpow2.f32 %v2782_v4  ;;  %2883 = vadd.xlane.f32.xlu0 %v2882_v45 }
 0x3c9   : > { %v5480_v2 = vpop.eup %3811  ;;  %v2784_v44 = vmul.f32 1.442695, %v2690_v17  ;;  %v2786_v37 = vmul.f32 1.442695, %v2691_v33 }
 0x3ca   : > { %v2614_v29 = vpop.xlane.xlu0 %2613  ;;  %v2885_v8 = vadd.f32 %v5480_v2, %v5478_v1 }
 0x3cb   : > { %3825 = vpow2.f32 %v2784_v44  ;;  %v2692_v59 = vsub.f32 %v5222_v58, %v2614_v29  ;;  %v2693_v31 = vsub.f32 %v5226_v60, %v2614_v29 }
 0x3cc   : > { %v5486_v62 = vpop.eup %3813  ;;  %3827 = vpow2.f32 %v2786_v37  ;;  %2886 = vadd.xlane.f32.xlu1 %v2885_v8 }
 0x3cd   : > { %v5488_v63 = vpop.eup %3815  ;;  %v2788_v3 = vmul.f32 1.442695, %v2692_v59  ;;  %v2790_v46 = vmul.f32 1.442695, %v2693_v31 }
 0x3ce   : > { %v2617_v9 = vpop.xlane.xlu1 %2616  ;;  %v2888_v23 = vadd.f32 %v5488_v63, %v5486_v62 }
 0x3cf   : > { %3829 = vpow2.f32 %v2788_v3  ;;  %v2694_v0 = vsub.f32 %v5232_v54, %v2617_v9  ;;  %v2695_v28 = vsub.f32 %v5236_v57, %v2617_v9 }
 0x3d0   : > { %v5494_v58 = vpop.eup %3817  ;;  %3831 = vpow2.f32 %v2790_v46  ;;  %2889 = vadd.xlane.f32.xlu0 %v2888_v23 }
 0x3d1   : > { %v5496_v60 = vpop.eup %3819  ;;  %v2792_v55 = vmul.f32 1.442695, %v2694_v0  ;;  %v2794_v24 = vmul.f32 1.442695, %v2695_v28 }
 0x3d2   : > { %v2620_v4 = vpop.xlane.xlu0 %2619  ;;  %v2891_v22 = vadd.f32 %v5496_v60, %v5494_v58 }
 0x3d3   : > { %3833 = vpow2.f32 %v2792_v55  ;;  %v2696_v45 = vsub.f32 %v5242_v53, %v2620_v4  ;;  %v2697_v17 = vsub.f32 %v5246_v10, %v2620_v4 }
 0x3d4   : > { %v5502_v54 = vpop.eup %3821  ;;  %3835 = vpow2.f32 %v2794_v24  ;;  %2892 = vadd.xlane.f32.xlu1 %v2891_v22 }
 0x3d5   : > { %v5504_v57 = vpop.eup %3823  ;;  %v2796_v33 = vmul.f32 1.442695, %v2696_v45  ;;  %v2798_v44 = vmul.f32 1.442695, %v2697_v17 }
 0x3d6   : > { %v2623_v37 = vpop.xlane.xlu1 %2622  ;;  %v2894_v29 = vadd.f32 %v5504_v57, %v5502_v54 }
 0x3d7   : > { %3837 = vpow2.f32 %v2796_v33  ;;  %v2698_v8 = vsub.f32 %v5252_v12, %v2623_v37  ;;  %v2699_v59 = vsub.f32 %v5256_v50, %v2623_v37 }
 0x3d8   : > { %v5510_v53 = vpop.eup %3825  ;;  %3839 = vpow2.f32 %v2798_v44  ;;  %2895 = vadd.xlane.f32.xlu0 %v2894_v29 }
 0x3d9   : > { %v5512_v10 = vpop.eup %3827  ;;  %v2800_v31 = vmul.f32 1.442695, %v2698_v8  ;;  %v2802_v3 = vmul.f32 1.442695, %v2699_v59  ;;  %v6167_v8 = vld [vmem:[#allocation81_spill] sm:$0xff] }
 0x3da   : > { %v2626_v46 = vpop.xlane.xlu0 %2625  ;;  %v2897_v9 = vadd.f32 %v5512_v10, %v5510_v53 }
 0x3db   : > { %3841 = vpow2.f32 %v2800_v31  ;;  %v2700_v23 = vsub.f32 %v5262_v42, %v2626_v46  ;;  %v2701_v0 = vsub.f32 %v5266_v49, %v2626_v46 }
 0x3dc   : > { %v5518_v12 = vpop.eup %3829  ;;  %3843 = vpow2.f32 %v2802_v3  ;;  %2898 = vadd.xlane.f32.xlu1 %v2897_v9 }
 0x3dd   : > { %v5520_v50 = vpop.eup %3831  ;;  %v2804_v28 = vmul.f32 1.442695, %v2700_v23  ;;  %v2806_v55 = vmul.f32 1.442695, %v2701_v0  ;;  %v6168_v23 = vld [vmem:[#allocation82_spill] sm:$0xff] }
 0x3de   : > { %v2629_v24 = vpop.xlane.xlu1 %2628  ;;  %v2900_v4 = vadd.f32 %v5520_v50, %v5518_v12 }
 0x3df   : > { %3845 = vpow2.f32 %v2804_v28  ;;  %v2702_v22 = vsub.f32 %v5272_v27, %v2629_v24  ;;  %v2703_v45 = vsub.f32 %v5276_v36, %v2629_v24  ;;  %v6169_v28 = vld [vmem:[#allocation83_spill] sm:$0xff] }
 0x3e0   : > { %v5526_v42 = vpop.eup %3833  ;;  %3847 = vpow2.f32 %v2806_v55  ;;  %2901 = vadd.xlane.f32.xlu0 %v2900_v4 }
 0x3e1   : > { %v5528_v49 = vpop.eup %3835  ;;  %v2808_v17 = vmul.f32 1.442695, %v2702_v22  ;;  %v2810_v33 = vmul.f32 1.442695, %v2703_v45 }
 0x3e2   : > { %v2632_v44 = vpop.xlane.xlu0 %2631  ;;  %v2903_v37 = vadd.f32 %v5528_v49, %v5526_v42 }
 0x3e3   : > { %3849 = vpow2.f32 %v2808_v17  ;;  %v2704_v29 = vsub.f32 %v5282_v51, %v2632_v44  ;;  %v2705_v59 = vsub.f32 %v6167_v8, %v2632_v44 }
 0x3e4   : > { %v5534_v27 = vpop.eup %3837  ;;  %3851 = vpow2.f32 %v2810_v33  ;;  %2904 = vadd.xlane.f32.xlu1 %v2903_v37  ;;  %v6170_v33 = vld [vmem:[#allocation68_spill] sm:$0xff]  ;;  %v6171_v37 = vld [vmem:[#allocation69_spill] sm:$0xff] }
 0x3e5   : > { %v5536_v36 = vpop.eup %3839  ;;  %v2812_v31 = vmul.f32 1.442695, %v2704_v29  ;;  %v2814_v3 = vmul.f32 1.442695, %v2705_v59 }
 0x3e6   : > { %v2635_v46 = vpop.xlane.xlu1 %2634  ;;  %v2906_v9 = vadd.f32 %v5536_v36, %v5534_v27 }
 0x3e7   : > { %3853 = vpow2.f32 %v2812_v31  ;;  %v2706_v0 = vsub.f32 %v6168_v23, %v2635_v46  ;;  %v2707_v55 = vsub.f32 %v6169_v28, %v2635_v46  ;;  %v6173_v23 = vld [vmem:[#allocation70_spill] sm:$0xff]  ;;  %v6174_v28 = vld [vmem:[#allocation71_spill] sm:$0xff] }
 0x3e8   : > { %v5542_v51 = vpop.eup %3841  ;;  %3855 = vpow2.f32 %v2814_v3  ;;  %2907 = vadd.xlane.f32.xlu0 %v2906_v9 }
 0x3e9   : > { %v5544_v24 = vpop.eup %3843  ;;  %v2816_v4 = vmul.f32 1.442695, %v2706_v0  ;;  %v2818_v22 = vmul.f32 1.442695, %v2707_v55 }
 0x3ea   : > { %v2638_v45 = vpop.xlane.xlu0 %2637  ;;  %v2909_v17 = vadd.f32 %v5544_v24, %v5542_v51 }
 0x3eb   : > { %3857 = vpow2.f32 %v2816_v4  ;;  %v2708_v44 = vsub.f32 %v6170_v33, %v2638_v45  ;;  %v2709_v29 = vsub.f32 %v6171_v37, %v2638_v45  ;;  %v6176_v37 = vld [vmem:[#allocation72_spill] sm:$0xff] }
 0x3ec   : > { %v5550_v8 = vpop.eup %3845  ;;  %3859 = vpow2.f32 %v2818_v22  ;;  %2910 = vadd.xlane.f32.xlu1 %v2909_v17 }
 0x3ed   : > { %v5552_v59 = vpop.eup %3847  ;;  %v2820_v31 = vmul.f32 1.442695, %v2708_v44  ;;  %v2822_v3 = vmul.f32 1.442695, %v2709_v29 }
 0x3ee   : > { %6172 = vst [vmem:[#allocation78_spill] sm:$0xff] %v5552_v59  ;;  %v2641_v46 = vpop.xlane.xlu1 %2640  ;;  %v2912_v9 = vadd.f32 %v5552_v59, %v5550_v8 }
 0x3ef   : > { %3861 = vpow2.f32 %v2820_v31  ;;  %v2710_v0 = vsub.f32 %v6173_v23, %v2641_v46  ;;  %v2711_v55 = vsub.f32 %v6174_v28, %v2641_v46  ;;  %v6177_v31 = vld [vmem:[#allocation73_spill] sm:$0xff] }
 0x3f0   : > { %v5558_v4 = vpop.eup %3849  ;;  %3863 = vpow2.f32 %v2822_v3  ;;  %2913 = vadd.xlane.f32.xlu0 %v2912_v9 }
 0x3f1   : > { %v5560_v45 = vpop.eup %3851  ;;  %v2824_v22 = vmul.f32 1.442695, %v2710_v0  ;;  %v2826_v17 = vmul.f32 1.442695, %v2711_v55 }
 0x3f2   : > { %6175 = vst [vmem:[#allocation79_spill] sm:$0xff] %v5560_v45  ;;  %v2644_v33 = vpop.xlane.xlu0 %2643  ;;  %v2915_v44 = vadd.f32 %v5560_v45, %v5558_v4 }
 0x3f3   : > { %3865 = vpow2.f32 %v2824_v22  ;;  %v2712_v29 = vsub.f32 %v6176_v37, %v2644_v33  ;;  %v2713_v59 = vsub.f32 %v6177_v31, %v2644_v33 }
 0x3f4   : > { %v5566_v23 = vpop.eup %3853  ;;  %3867 = vpow2.f32 %v2826_v17  ;;  %2916 = vadd.xlane.f32.xlu1 %v2915_v44 }
 0x3f5   : > { %6178 = vst [vmem:[#allocation80_spill] sm:$0xff] %v5566_v23  ;;  %v5568_v46 = vpop.eup %3855  ;;  %v2828_v3 = vmul.f32 1.442695, %v2712_v29  ;;  %v2830_v9 = vmul.f32 1.442695, %v2713_v59 }
 0x3f6   : > { %6179 = vst [vmem:[#allocation81_spill] sm:$0xff] %v5568_v46  ;;  %v2647_v28 = vpop.xlane.xlu1 %2646  ;;  %v2918_v0 = vadd.f32 %v5568_v46, %v5566_v23  ;;  %v6209_v46 = vld [vmem:[#allocation9_spill] sm:$0xff] }
 0x3f7   : > { %3869 = vpow2.f32 %v2828_v3  ;;  %v2714_v55 = vsub.f32 %v5332_v18, %v2647_v28  ;;  %v2715_v22 = vsub.f32 %v5336_v41, %v2647_v28 }
 0x3f8   : > { %v5574_v37 = vpop.eup %3857  ;;  %3871 = vpow2.f32 %v2830_v9  ;;  %2919 = vadd.xlane.f32.xlu0 %v2918_v0 }
 0x3f9   : > { %6180 = vst [vmem:[#allocation82_spill] sm:$0xff] %v5574_v37  ;;  %v5576_v33 = vpop.eup %3859  ;;  %v2832_v17 = vmul.f32 1.442695, %v2714_v55  ;;  %v2834_v44 = vmul.f32 1.442695, %v2715_v22  ;;  %v6184_v22 = vld [vmem:[#allocation74_spill] sm:$0xff] }
 0x3fa   : > { %6181 = vst [vmem:[#allocation83_spill] sm:$0xff] %v5576_v33  ;;  %v2650_v31 = vpop.xlane.xlu0 %2649  ;;  %v2921_v59 = vadd.f32 %v5576_v33, %v5574_v37 }
 0x3fb   : > { %3873 = vpow2.f32 %v2832_v17  ;;  %v2716_v29 = vsub.f32 %v5342_v56, %v2650_v31  ;;  %v2717_v3 = vsub.f32 %v5346_v43, %v2650_v31  ;;  %v6185_v17 = vld [vmem:[#allocation75_spill] sm:$0xff] }
 0x3fc   : > { %v5582_v18 = vpop.eup %3861  ;;  %3875 = vpow2.f32 %v2834_v44  ;;  %2922 = vadd.xlane.f32.xlu1 %v2921_v59 }
 0x3fd   : > { %6182 = vst [vmem:[#allocation68_spill] sm:$0xff] %v5582_v18  ;;  %v5584_v41 = vpop.eup %3863  ;;  %v2836_v9 = vmul.f32 1.442695, %v2716_v29  ;;  %v2838_v28 = vmul.f32 1.442695, %v2717_v3 }
 0x3fe   : > { %6183 = vst [vmem:[#allocation69_spill] sm:$0xff] %v5584_v41  ;;  %v2653_v0 = vpop.xlane.xlu1 %2652  ;;  %v2924_v55 = vadd.f32 %v5584_v41, %v5582_v18 }
 0x3ff   : > { %3877 = vpow2.f32 %v2836_v9  ;;  %v2718_v33 = vsub.f32 %v6184_v22, %v2653_v0  ;;  %v2719_v37 = vsub.f32 %v6185_v17, %v2653_v0  ;;  %v6188_v9 = vld [vmem:[#allocation76_spill] sm:$0xff] }
 0x400   : > { %v5590_v56 = vpop.eup %3865  ;;  %3879 = vpow2.f32 %v2838_v28  ;;  %2925 = vadd.xlane.f32.xlu0 %v2924_v55 }
 0x401   : > { %6186 = vst [vmem:[#allocation70_spill] sm:$0xff] %v5590_v56  ;;  %v5592_v43 = vpop.eup %3867  ;;  %v2840_v44 = vmul.f32 1.442695, %v2718_v33  ;;  %v2842_v31 = vmul.f32 1.442695, %v2719_v37 }
 0x402   : > { %6187 = vst [vmem:[#allocation71_spill] sm:$0xff] %v5592_v43  ;;  %v2656_v59 = vpop.xlane.xlu0 %2655  ;;  %v2927_v29 = vadd.f32 %v5592_v43, %v5590_v56 }
 0x403   : > { %3881 = vpow2.f32 %v2840_v44  ;;  %v2720_v3 = vsub.f32 %v5362_v61, %v2656_v59  ;;  %v2721_v41 = vsub.f32 %v6188_v9, %v2656_v59  ;;  %v6191_v44 = vld [vmem:[#allocation77_spill] sm:$0xff] }
 0x404   : > { %v5598_v22 = vpop.eup %3869  ;;  %3883 = vpow2.f32 %v2842_v31  ;;  %2928 = vadd.xlane.f32.xlu1 %v2927_v29 }
 0x405   : > { %6189 = vst [vmem:[#allocation72_spill] sm:$0xff] %v5598_v22  ;;  %v5600_v0 = vpop.eup %3871  ;;  %v2844_v28 = vmul.f32 1.442695, %v2720_v3  ;;  %v2846_v55 = vmul.f32 1.442695, %v2721_v41 }
 0x406   : > { %6190 = vst [vmem:[#allocation73_spill] sm:$0xff] %v5600_v0  ;;  %v2659_v17 = vpop.xlane.xlu1 %2658  ;;  %v2930_v37 = vadd.f32 %v5600_v0, %v5598_v22  ;;  %v6207_v0 = vld [vmem:[#allocation7_spill] sm:$0xff] }
 0x407   : > { %3885 = vpow2.f32 %v2844_v28  ;;  %v2722_v33 = vsub.f32 %v5372_v20, %v2659_v17  ;;  %v2723_v43 = vsub.f32 %v6191_v44, %v2659_v17 }
 0x408   : > { %v5606_v61 = vpop.eup %3873  ;;  %3887 = vpow2.f32 %v2846_v55  ;;  %2931 = vadd.xlane.f32.xlu0 %v2930_v37 }
 0x409   : > { %6192 = vst [vmem:[#allocation74_spill] sm:$0xff] %v5606_v61  ;;  %v5608_v59 = vpop.eup %3875  ;;  %v2848_v31 = vmul.f32 1.442695, %v2722_v33  ;;  %v2850_v29 = vmul.f32 1.442695, %v2723_v43 }
 0x40a   : > { %6193 = vst [vmem:[#allocation75_spill] sm:$0xff] %v5608_v59  ;;  %v2933_v41 = vadd.f32 %v5608_v59, %v5606_v61 }
 0x40b   : > { %3889 = vpow2.f32 %v2848_v31 }
 0x40c   : > { %v5612_v3 = vpop.eup %3877  ;;  %3891 = vpow2.f32 %v2850_v29  ;;  %2934 = vadd.xlane.f32.xlu1 %v2933_v41 }
 0x40d   : > { %6194 = vst [vmem:[#allocation76_spill] sm:$0xff] %v5612_v3  ;;  %v5614_v9 = vpop.eup %3879 }
 0x40e   : > { %6195 = vst [vmem:[#allocation77_spill] sm:$0xff] %v5614_v9  ;;  %v2936_v20 = vadd.f32 %v5614_v9, %v5612_v3  ;;  %v6204_v9 = vld [vmem:[#allocation4_spill] sm:$0xff] }
 0x410   : > { %v5618_v28 = vpop.eup %3881  ;;  %2937 = vadd.xlane.f32.xlu0 %v2936_v20  ;;  %v390_v20 = vld [vmem:[%s5882_s3 + $0x2] sm:$0x3] }
 0x411   : > { %6196 = vst [vmem:[#allocation84_spill] sm:$0xff] %v5618_v28  ;;  %v5620_v55 = vpop.eup %3883 }
 0x412   : > { %6197 = vst [vmem:[#allocation85_spill] sm:$0xff] %v5620_v55  ;;  %v2939_v43 = vadd.f32 %v5620_v55, %v5618_v28  ;;  %v6202_v55 = vld [vmem:[#allocation3_spill] sm:$0xff] }
 0x413   : > { %v5640_v28 = vrot.slane %v390_v20, %v6202_v55 }
 0x414   : > { %v5624_v17 = vpop.eup %3885  ;;  %2940 = vadd.xlane.f32.xlu1 %v2939_v43 }
 0x415   : > { %6198 = vst [vmem:[#allocation86_spill] sm:$0xff] %v5624_v17  ;;  %v5626_v37 = vpop.eup %3887 }
 0x416   : > { %6199 = vst [vmem:[#allocation87_spill] sm:$0xff] %v5626_v37  ;;  %v2942_v33 = vadd.f32 %v5626_v37, %v5624_v17  ;;  %v6203_v37 = vld [vmem:[#allocation2_spill] sm:$0xff] }
 0x417   : > { %v5643_v17 = vrot.slane %v390_v20, %v6203_v37 }
 0x418   : > { %v5630_v44 = vpop.eup %3889  ;;  %2943 = vadd.xlane.f32.xlu0 %v2942_v33 }
 0x419   : > { %6200 = vst [vmem:[#allocation88_spill] sm:$0xff] %v5630_v44  ;;  %v5632_v31 = vpop.eup %3891  ;;  %v1225_v37 = vadd.f32 %v6207_v0, %v5643_v17 }
 0x41a   : > { %6201 = vst [vmem:[#allocation89_spill] sm:$0xff] %v5632_v31  ;;  %v2945_v29 = vadd.f32 %v5632_v31, %v5630_v44  ;;  %v1219_v31 = vadd.f32 %v6204_v9, %v5640_v28 }
 0x41c   : > { %2946 = vadd.xlane.f32.xlu1 %v2945_v29  ;;  %v6205_v29 = vld [vmem:[#allocation5_spill] sm:$0xff]  ;;  %v1377_v59 = vmax.f32 %v1219_v31, 0.0 }
 0x429   : > { %v2854_v41 = vpop.xlane.xlu0 %2853 }
 0x42a   : > { %3893 = vrcp.f32 %v2854_v41  ;;  %v1221_v41 = vadd.f32 %v6205_v29, %v5643_v17 }
 0x42c   : > { %v1378_v55 = vmax.f32 %v1221_v41, 0.0  ;;  %v1380_v41 = vmax.f32 %v1225_v37, 0.0 }
 0x42d   : > { %v2857_v43 = vpop.xlane.xlu1 %2856 }
 0x42e   : > { %3895 = vrcp.f32 %v2857_v43  ;;  %v6206_v43 = vld [vmem:[#allocation6_spill] sm:$0xff] }
 0x42f   : > { %v1223_v61 = vadd.f32 %v6206_v43, %v5640_v28  ;;  %v1231_v43 = vadd.f32 %v6209_v46, %v5643_v17 }
 0x431   : > { %v2860_v33 = vpop.xlane.xlu0 %2859  ;;  %v1379_v18 = vmax.f32 %v1223_v61, 0.0  ;;  %v1382_v61 = vmax.f32 %v1231_v43, 0.0 }
 0x432   : > { %3897 = vrcp.f32 %v2860_v33 }
 0x435   : > { %v2863_v44 = vpop.xlane.xlu1 %2862 }
 0x436   : > { %3899 = vrcp.f32 %v2863_v44  ;;  %v6208_v44 = vld [vmem:[#allocation8_spill] sm:$0xff] }
 0x437   : > { %v3894_v3 = vpop.eup %3893  ;;  %v1229_v31 = vadd.f32 %v6208_v44, %v5640_v28 }
 0x438   : > { %v2949_v20 = vmul.f32 %v3894_v3, %v5390_v48  ;;  %v2950_v33 = vmul.f32 %v3894_v3, %v5392_v47 }
 0x439   : > { %v2866_v22 = vpop.xlane.xlu0 %2865  ;;  %v1381_v3 = vmax.f32 %v1229_v31, 0.0  ;;  %v6213_v31 = vld [vmem:[#allocation13_spill] sm:$0xff] }
 0x43a   : > { %3901 = vrcp.f32 %v2866_v22  ;;  %v3044_v9 = vmul.f32 %v2949_v20, %v1377_v59  ;;  %v3045_v56 = vmul.f32 %v2950_v33, %v1378_v55  ;;  %v6210_v55 = vld [vmem:[#allocation10_spill] sm:$0xff]  ;;  %v6211_v33 = vld [vmem:[#allocation11_spill] sm:$0xff]  ;;  %v1241_v43 = vadd.f32 %v6213_v31, %v5643_v17 }
 0x43b   : > { %v3896_v29 = vpop.eup %3895  ;;  %v1233_v20 = vadd.f32 %v6210_v55, %v5640_v28  ;;  %v1235_v46 = vadd.f32 %v6211_v33, %v5643_v17  ;;  %v6214_v55 = vld [vmem:[#allocation14_spill] sm:$0xff]  ;;  %v6215_v33 = vld [vmem:[#allocation15_spill] sm:$0xff] }
 0x43c   : > { %v3108_v23 = vadd.f32 %v3045_v56, %v3044_v9  ;;  %v2952_v0 = vmul.f32 %v3896_v29, %v5398_v34  ;;  %v2953_v48 = vmul.f32 %v3896_v29, %v5400_v25  ;;  %v6212_v29 = vld [vmem:[#allocation12_spill] sm:$0xff] }
 0x43d   : > { %v2869_v45 = vpop.xlane.xlu1 %2868  ;;  %v1383_v9 = vmax.f32 %v1233_v20, 0.0  ;;  %v1239_v44 = vadd.f32 %v6212_v29, %v5640_v28  ;;  %v1243_v20 = vadd.f32 %v6214_v55, %v5640_v28  ;;  %v6217_v29 = vld [vmem:[#allocation17_spill] sm:$0xff] }
 0x43e   : > { %3903 = vrcp.f32 %v2869_v45  ;;  %3109 = vadd.xlane.f32.xlu0 %v3108_v23  ;;  %v3046_v47 = vmul.f32 %v2952_v0, %v1379_v18  ;;  %v3047_v22 = vmul.f32 %v2953_v48, %v1380_v41  ;;  %v1384_v41 = vmax.f32 %v1235_v46, 0.0 }
 0x43f   : > { %v3898_v59 = vpop.eup %3897 }
 0x440   : > { %v3111_v37 = vadd.f32 %v3047_v22, %v3046_v47  ;;  %v2955_v56 = vmul.f32 %v3898_v59, %v5406_v14  ;;  %v2956_v34 = vmul.f32 %v3898_v59, %v5408_v26 }
 0x441   : > { %v2872_v25 = vpop.xlane.xlu0 %2871 }
 0x442   : > { %3905 = vrcp.f32 %v2872_v25  ;;  %3112 = vadd.xlane.f32.xlu1 %v3111_v37  ;;  %v3048_v45 = vmul.f32 %v2955_v56, %v1381_v3  ;;  %v3049_v23 = vmul.f32 %v2956_v34, %v1382_v61  ;;  %v1385_v3 = vmax.f32 %v1239_v44, 0.0 }
 0x443   : > { %v3900_v18 = vpop.eup %3899  ;;  %v1386_v61 = vmax.f32 %v1241_v43, 0.0  ;;  %v1245_v37 = vadd.f32 %v6215_v33, %v5643_v17  ;;  %v1251_v44 = vadd.f32 %v6217_v29, %v5643_v17 }
 0x444   : > { %v3114_v0 = vadd.f32 %v3049_v23, %v3048_v45  ;;  %v2958_v48 = vmul.f32 %v3900_v18, %v5414_v35  ;;  %v2959_v14 = vmul.f32 %v3900_v18, %v5416_v15  ;;  %v1387_v23 = vmax.f32 %v1243_v20, 0.0  ;;  %v6216_v18 = vld [vmem:[#allocation16_spill] sm:$0xff] }
 0x445   : > { %v2875_v26 = vpop.xlane.xlu1 %2874  ;;  %v1388_v31 = vmax.f32 %v1245_v37, 0.0 }
 0x446   : > { %3907 = vrcp.f32 %v2875_v26  ;;  %3115 = vadd.xlane.f32.xlu0 %v3114_v0  ;;  %v3050_v47 = vmul.f32 %v2958_v48, %v1383_v9  ;;  %v3051_v22 = vmul.f32 %v2959_v14, %v1384_v41  ;;  %v1249_v9 = vadd.f32 %v6216_v18, %v5640_v28 }
 0x447   : > { %v3902_v59 = vpop.eup %3901 }
 0x448   : > { %v3117_v46 = vadd.f32 %v3051_v22, %v3050_v47  ;;  %v2961_v56 = vmul.f32 %v3902_v59, %v5422_v38  ;;  %v2962_v35 = vmul.f32 %v3902_v59, %v5424_v39  ;;  %v1389_v26 = vmax.f32 %v1249_v9, 0.0  ;;  %v6218_v22 = vld [vmem:[#allocation18_spill] sm:$0xff] }
 0x449   : > { %v2878_v15 = vpop.xlane.xlu0 %2877  ;;  %v1390_v47 = vmax.f32 %v1251_v44, 0.0  ;;  %v1253_v59 = vadd.f32 %v6218_v22, %v5640_v28 }
 0x44a   : > { %3909 = vrcp.f32 %v2878_v15  ;;  %3118 = vadd.xlane.f32.xlu1 %v3117_v46  ;;  %v3052_v34 = vmul.f32 %v2961_v56, %v1385_v3  ;;  %v3053_v25 = vmul.f32 %v2962_v35, %v1386_v61  ;;  %v6219_v3 = vld [vmem:[#allocation19_spill] sm:$0xff]  ;;  %v6220_v35 = vld [vmem:[#allocation20_spill] sm:$0xff] }
 0x44b   : > { %v3904_v45 = vpop.eup %3903  ;;  %v1255_v61 = vadd.f32 %v6219_v3, %v5643_v17  ;;  %v1391_v56 = vmax.f32 %v1253_v59, 0.0  ;;  %v1259_v15 = vadd.f32 %v6220_v35, %v5640_v28  ;;  %v6224_v3 = vld [vmem:[#allocation24_spill] sm:$0xff] }
 0x44c   : > { %v3120_v43 = vadd.f32 %v3053_v25, %v3052_v34  ;;  %v2964_v41 = vmul.f32 %v3904_v45, %v5430_v40  ;;  %v2965_v38 = vmul.f32 %v3904_v45, %v5432_v32  ;;  %v6221_v34 = vld [vmem:[#allocation21_spill] sm:$0xff] }
 0x44d   : > { %v2881_v39 = vpop.xlane.xlu1 %2880  ;;  %v1261_v25 = vadd.f32 %v6221_v34, %v5643_v17  ;;  %v1392_v45 = vmax.f32 %v1255_v61, 0.0  ;;  %v1269_v61 = vadd.f32 %v6224_v3, %v5640_v28  ;;  %v6226_v34 = vld [vmem:[#allocation26_spill] sm:$0xff]  ;;  %v6231_v3 = vld [vmem:[#allocation31_spill] sm:$0xff] }
 0x44e   : > { %3911 = vrcp.f32 %v2881_v39  ;;  %3121 = vadd.xlane.f32.xlu0 %v3120_v43  ;;  %v3054_v0 = vmul.f32 %v2964_v41, %v1387_v23  ;;  %v3055_v48 = vmul.f32 %v2965_v38, %v1388_v31  ;;  %v1393_v31 = vmax.f32 %v1259_v15, 0.0  ;;  %v6222_v41 = vld [vmem:[#allocation22_spill] sm:$0xff]  ;;  %v6223_v39 = vld [vmem:[#allocation23_spill] sm:$0xff] }
 0x44f   : > { %v3906_v14 = vpop.eup %3905  ;;  %v1394_v43 = vmax.f32 %v1261_v25, 0.0  ;;  %v1263_v38 = vadd.f32 %v6222_v41, %v5640_v28  ;;  %v1397_v35 = vmax.f32 %v1269_v61, 0.0  ;;  %v1273_v25 = vadd.f32 %v6226_v34, %v5640_v28  ;;  %v6229_v41 = vld [vmem:[#allocation29_spill] sm:$0xff] }
 0x450   : > { %v3123_v55 = vadd.f32 %v3055_v48, %v3054_v0  ;;  %v2967_v20 = vmul.f32 %v3906_v14, %v5438_v21  ;;  %v2968_v40 = vmul.f32 %v3906_v14, %v5440_v30  ;;  %v1265_v0 = vadd.f32 %v6223_v39, %v5643_v17 }
 0x451   : > { %v2884_v32 = vpop.xlane.xlu0 %2883  ;;  %v1395_v59 = vmax.f32 %v1263_v38, 0.0  ;;  %v1281_v38 = vadd.f32 %v6229_v41, %v5643_v17  ;;  %v1285_v61 = vadd.f32 %v6231_v3, %v5643_v17  ;;  %v6238_v3 = vld [vmem:[#allocation38_spill] sm:$0xff] }
 0x452   : > { %3913 = vrcp.f32 %v2884_v32  ;;  %3124 = vadd.xlane.f32.xlu1 %v3123_v55  ;;  %v3056_v33 = vmul.f32 %v2967_v20, %v1389_v26  ;;  %v3057_v37 = vmul.f32 %v2968_v40, %v1390_v47  ;;  %v6225_v55 = vld [vmem:[#allocation25_spill] sm:$0xff]  ;;  %v1396_v40 = vmax.f32 %v1265_v0, 0.0 }
 0x453   : > { %v3908_v46 = vpop.eup %3907  ;;  %v1271_v20 = vadd.f32 %v6225_v55, %v5643_v17 }
 0x454   : > { %v3126_v23 = vadd.f32 %v3057_v37, %v3056_v33  ;;  %v2970_v18 = vmul.f32 %v3908_v46, %v5446_v16  ;;  %v2971_v21 = vmul.f32 %v3908_v46, %v5448_v19 }
 0x455   : > { %v2887_v30 = vpop.xlane.xlu1 %2886  ;;  %v1398_v15 = vmax.f32 %v1271_v20, 0.0 }
 0x456   : > { %3915 = vrcp.f32 %v2887_v30  ;;  %3127 = vadd.xlane.f32.xlu0 %v3126_v23  ;;  %v3058_v9 = vmul.f32 %v2970_v18, %v1391_v56  ;;  %v3059_v29 = vmul.f32 %v2971_v21, %v1392_v45  ;;  %v6227_v45 = vld [vmem:[#allocation27_spill] sm:$0xff] }
 0x457   : > { %v3910_v44 = vpop.eup %3909  ;;  %v1275_v23 = vadd.f32 %v6227_v45, %v5643_v17 }
 0x458   : > { %v3129_v48 = vadd.f32 %v3059_v29, %v3058_v9  ;;  %v2973_v14 = vmul.f32 %v3910_v44, %v5454_v52  ;;  %v2974_v16 = vmul.f32 %v3910_v44, %v5456_v13  ;;  %v1399_v44 = vmax.f32 %v1273_v25, 0.0 }
 0x459   : > { %v2890_v19 = vpop.xlane.xlu0 %2889  ;;  %v1400_v39 = vmax.f32 %v1275_v23, 0.0 }
 0x45a   : > { %3917 = vrcp.f32 %v2890_v19  ;;  %3130 = vadd.xlane.f32.xlu1 %v3129_v48  ;;  %v3060_v26 = vmul.f32 %v2973_v14, %v1393_v31  ;;  %v3061_v47 = vmul.f32 %v2974_v16, %v1394_v43  ;;  %v6228_v31 = vld [vmem:[#allocation28_spill] sm:$0xff] }
 0x45b   : > { %v3912_v22 = vpop.eup %3911  ;;  %v1279_v43 = vadd.f32 %v6228_v31, %v5640_v28 }
 0x45c   : > { %v3132_v32 = vadd.f32 %v3061_v47, %v3060_v26  ;;  %v2976_v33 = vmul.f32 %v3912_v22, %v5462_v7  ;;  %v2977_v52 = vmul.f32 %v3912_v22, %v5464_v11  ;;  %v1402_v47 = vmax.f32 %v1281_v38, 0.0  ;;  %v6230_v22 = vld [vmem:[#allocation30_spill] sm:$0xff] }
 0x45d   : > { %v2893_v13 = vpop.xlane.xlu1 %2892  ;;  %v1401_v26 = vmax.f32 %v1279_v43, 0.0 }
 0x45e   : > { %3919 = vrcp.f32 %v2893_v13  ;;  %3133 = vadd.xlane.f32.xlu0 %v3132_v32  ;;  %v3062_v37 = vmul.f32 %v2976_v33, %v1395_v59  ;;  %v3063_v46 = vmul.f32 %v2977_v52, %v1396_v40  ;;  %v1283_v59 = vadd.f32 %v6230_v22, %v5640_v28  ;;  %v6232_v13 = vld [vmem:[#allocation32_spill] sm:$0xff] }
 0x45f   : > { %v3914_v56 = vpop.eup %3913 }
 0x460   : > { %v3135_v18 = vadd.f32 %v3063_v46, %v3062_v37  ;;  %v2979_v21 = vmul.f32 %v3914_v56, %v5470_v5  ;;  %v2980_v7 = vmul.f32 %v3914_v56, %v5472_v6  ;;  %v1403_v52 = vmax.f32 %v1283_v59, 0.0  ;;  %v6233_v46 = vld [vmem:[#allocation33_spill] sm:$0xff] }
 0x461   : > { %v2896_v11 = vpop.xlane.xlu0 %2895  ;;  %v1289_v37 = vadd.f32 %v6232_v13, %v5640_v28  ;;  %v1291_v56 = vadd.f32 %v6233_v46, %v5643_v17  ;;  %v6240_v13 = vld [vmem:[#allocation40_spill] sm:$0xff]  ;;  %v6241_v46 = vld [vmem:[#allocation41_spill] sm:$0xff] }
 0x462   : > { %3921 = vrcp.f32 %v2896_v11  ;;  %3136 = vadd.xlane.f32.xlu1 %v3135_v18  ;;  %v3064_v30 = vmul.f32 %v2979_v21, %v1397_v35  ;;  %v3065_v9 = vmul.f32 %v2980_v7, %v1398_v15  ;;  %v1404_v35 = vmax.f32 %v1285_v61, 0.0  ;;  %v6234_v7 = vld [vmem:[#allocation34_spill] sm:$0xff] }
 0x463   : > { %v3916_v29 = vpop.eup %3915  ;;  %v1405_v18 = vmax.f32 %v1289_v37, 0.0  ;;  %v1406_v21 = vmax.f32 %v1291_v56, 0.0  ;;  %v1293_v11 = vadd.f32 %v6234_v7, %v5640_v28  ;;  %v1303_v61 = vadd.f32 %v6238_v3, %v5640_v28  ;;  %v6243_v7 = vld [vmem:[#allocation43_spill] sm:$0xff] }
 0x464   : > { %v3138_v0 = vadd.f32 %v3065_v9, %v3064_v30  ;;  %v2982_v48 = vmul.f32 %v3916_v29, %v5478_v1  ;;  %v2983_v5 = vmul.f32 %v3916_v29, %v5480_v2  ;;  %v6235_v30 = vld [vmem:[#allocation35_spill] sm:$0xff]  ;;  %v1309_v37 = vadd.f32 %v6240_v13, %v5640_v28 }
 0x465   : > { %v2899_v6 = vpop.xlane.xlu1 %2898  ;;  %v1295_v9 = vadd.f32 %v6235_v30, %v5643_v17  ;;  %v1407_v38 = vmax.f32 %v1293_v11, 0.0  ;;  %v1311_v56 = vadd.f32 %v6241_v46, %v5643_v17  ;;  %v1315_v11 = vadd.f32 %v6243_v7, %v5643_v17 }
 0x466   : > { %3923 = vrcp.f32 %v2899_v6  ;;  %3139 = vadd.xlane.f32.xlu0 %v3138_v0  ;;  %v3066_v14 = vmul.f32 %v2982_v48, %v1399_v44  ;;  %v3067_v16 = vmul.f32 %v2983_v5, %v1400_v39  ;;  %v6236_v39 = vld [vmem:[#allocation36_spill] sm:$0xff]  ;;  %v6237_v48 = vld [vmem:[#allocation37_spill] sm:$0xff] }
 0x467   : > { %v3918_v19 = vpop.eup %3917  ;;  %v1299_v0 = vadd.f32 %v6236_v39, %v5640_v28  ;;  %v1301_v5 = vadd.f32 %v6237_v48, %v5643_v17  ;;  %v1408_v6 = vmax.f32 %v1295_v9, 0.0  ;;  %v1416_v39 = vmax.f32 %v1315_v11, 0.0 }
 0x468   : > { %v3141_v55 = vadd.f32 %v3067_v16, %v3066_v14  ;;  %v2985_v20 = vmul.f32 %v3918_v19, %v5486_v62  ;;  %v2986_v1 = vmul.f32 %v3918_v19, %v5488_v63 }
 0x469   : > { %v2902_v2 = vpop.xlane.xlu0 %2901  ;;  %v1409_v22 = vmax.f32 %v1299_v0, 0.0  ;;  %v1410_v59 = vmax.f32 %v1301_v5, 0.0 }
 0x46a   : > { %3925 = vrcp.f32 %v2902_v2  ;;  %3142 = vadd.xlane.f32.xlu1 %v3141_v55  ;;  %v3068_v40 = vmul.f32 %v2985_v20, %v1401_v26  ;;  %v3069_v32 = vmul.f32 %v2986_v1, %v1402_v47  ;;  %v6239_v55 = vld [vmem:[#allocation39_spill] sm:$0xff] }
 0x46b   : > { %v3920_v33 = vpop.eup %3919  ;;  %v1305_v20 = vadd.f32 %v6239_v55, %v5643_v17 }
 0x46c   : > { %v3144_v15 = vadd.f32 %v3069_v32, %v3068_v40  ;;  %v2988_v34 = vmul.f32 %v3920_v33, %v5494_v58  ;;  %v2989_v62 = vmul.f32 %v3920_v33, %v5496_v60 }
 0x46d   : > { %v2905_v63 = vpop.xlane.xlu1 %2904 }
 0x46e   : > { %3927 = vrcp.f32 %v2905_v63  ;;  %3145 = vadd.xlane.f32.xlu0 %v3144_v15  ;;  %v3070_v25 = vmul.f32 %v2988_v34, %v1403_v52  ;;  %v3071_v45 = vmul.f32 %v2989_v62, %v1404_v35  ;;  %v1411_v52 = vmax.f32 %v1303_v61, 0.0 }
 0x46f   : > { %v3922_v23 = vpop.eup %3921  ;;  %v1412_v35 = vmax.f32 %v1305_v20, 0.0 }
 0x470   : > { %v3147_v29 = vadd.f32 %v3071_v45, %v3070_v25  ;;  %v2991_v44 = vmul.f32 %v3922_v23, %v5502_v54  ;;  %v2992_v58 = vmul.f32 %v3922_v23, %v5504_v57  ;;  %v1413_v45 = vmax.f32 %v1309_v37, 0.0 }
 0x471   : > { %v2908_v60 = vpop.xlane.xlu0 %2907  ;;  %v1414_v23 = vmax.f32 %v1311_v56, 0.0 }
 0x472   : > { %3929 = vrcp.f32 %v2908_v60  ;;  %3148 = vadd.xlane.f32.xlu1 %v3147_v29  ;;  %v3072_v31 = vmul.f32 %v2991_v44, %v1405_v18  ;;  %v3073_v43 = vmul.f32 %v2992_v58, %v1406_v21  ;;  %v6242_v18 = vld [vmem:[#allocation42_spill] sm:$0xff] }
 0x473   : > { %v3924_v41 = vpop.eup %3923  ;;  %v1313_v21 = vadd.f32 %v6242_v18, %v5640_v28 }
 0x474   : > { %v3150_v14 = vadd.f32 %v3073_v43, %v3072_v31  ;;  %v2994_v16 = vmul.f32 %v3924_v41, %v5510_v53  ;;  %v2995_v54 = vmul.f32 %v3924_v41, %v5512_v10  ;;  %v6244_v31 = vld [vmem:[#allocation44_spill] sm:$0xff]  ;;  %v6245_v41 = vld [vmem:[#allocation45_spill] sm:$0xff] }
 0x475   : > { %v2911_v57 = vpop.xlane.xlu1 %2910  ;;  %v1415_v60 = vmax.f32 %v1313_v21, 0.0  ;;  %v1319_v43 = vadd.f32 %v6244_v31, %v5640_v28  ;;  %v6258_v31 = vld [vmem:[#allocation82_spill] sm:$0xff] }
 0x476   : > { %3931 = vrcp.f32 %v2911_v57  ;;  %3151 = vadd.xlane.f32.xlu0 %v3150_v14  ;;  %v3074_v19 = vmul.f32 %v2994_v16, %v1407_v38  ;;  %v3075_v26 = vmul.f32 %v2995_v54, %v1408_v6  ;;  %v1321_v38 = vadd.f32 %v6245_v41, %v5643_v17  ;;  %v6246_v57 = vld [vmem:[#allocation46_spill] sm:$0xff]  ;;  %v6259_v41 = vld [vmem:[#allocation83_spill] sm:$0xff] }
 0x477   : > { %v3926_v47 = vpop.eup %3925  ;;  %v1417_v16 = vmax.f32 %v1319_v43, 0.0 }
 0x478   : > { %v3153_v1 = vadd.f32 %v3075_v26, %v3074_v19  ;;  %v2997_v2 = vmul.f32 %v3926_v47, %v5518_v12  ;;  %v2998_v53 = vmul.f32 %v3926_v47, %v5520_v50  ;;  %v1418_v54 = vmax.f32 %v1321_v38, 0.0  ;;  %v6247_v26 = vld [vmem:[#allocation47_spill] sm:$0xff] }
 0x479   : > { %v2914_v10 = vpop.xlane.xlu0 %2913  ;;  %v1323_v19 = vadd.f32 %v6246_v57, %v5640_v28  ;;  %v1325_v47 = vadd.f32 %v6247_v26, %v5643_v17 }
 0x47a   : > { %3933 = vrcp.f32 %v2914_v10  ;;  %3154 = vadd.xlane.f32.xlu1 %v3153_v1  ;;  %v3076_v40 = vmul.f32 %v2997_v2, %v1409_v22  ;;  %v3077_v32 = vmul.f32 %v2998_v53, %v1410_v59  ;;  %v6249_v2 = vld [vmem:[#allocation48_spill] sm:$0xff]  ;;  %v6250_v10 = vld [vmem:[#allocation49_spill] sm:$0xff] }
 0x47b   : > { %v3928_v33 = vpop.eup %3927  ;;  %v1419_v1 = vmax.f32 %v1323_v19, 0.0  ;;  %v1329_v53 = vadd.f32 %v6249_v2, %v5640_v28  ;;  %v6262_v19 = vld [vmem:[#allocation68_spill] sm:$0xff] }
 0x47c   : > { %v3156_v15 = vadd.f32 %v3077_v32, %v3076_v40  ;;  %v3000_v34 = vmul.f32 %v3928_v33, %v5526_v42  ;;  %v3001_v12 = vmul.f32 %v3928_v33, %v5528_v49  ;;  %v1331_v40 = vadd.f32 %v6250_v10, %v5643_v17 }
 0x47d   : > { %v2917_v50 = vpop.xlane.xlu1 %2916  ;;  %v1420_v32 = vmax.f32 %v1325_v47, 0.0  ;;  %v6263_v47 = vld [vmem:[#allocation69_spill] sm:$0xff] }
 0x47e   : > { %3935 = vrcp.f32 %v2917_v50  ;;  %3157 = vadd.xlane.f32.xlu0 %v3156_v15  ;;  %v3078_v62 = vmul.f32 %v3000_v34, %v1411_v52  ;;  %v3079_v63 = vmul.f32 %v3001_v12, %v1412_v35  ;;  %v1421_v15 = vmax.f32 %v1329_v53, 0.0  ;;  %v6252_v12 = vld [vmem:[#allocation50_spill] sm:$0xff] }
 0x47f   : > { %v3930_v25 = vpop.eup %3929  ;;  %v1422_v34 = vmax.f32 %v1331_v40, 0.0  ;;  %v1333_v50 = vadd.f32 %v6252_v12, %v5640_v28  ;;  %v6266_v40 = vld [vmem:[#allocation70_spill] sm:$0xff]  ;;  %v6269_v12 = vld [vmem:[#allocation59_spill] sm:$0xff] }
 0x480   : > { %v3159_v30 = vadd.f32 %v3079_v63, %v3078_v62  ;;  %v3003_v9 = vmul.f32 %v3930_v25, %v5534_v27  ;;  %v3004_v42 = vmul.f32 %v3930_v25, %v5536_v36  ;;  %v6253_v62 = vld [vmem:[#allocation51_spill] sm:$0xff] }
 0x481   : > { %v2920_v49 = vpop.xlane.xlu0 %2919  ;;  %v1335_v63 = vadd.f32 %v6253_v62, %v5643_v17 }
 0x482   : > { %3937 = vrcp.f32 %v2920_v49  ;;  %3160 = vadd.xlane.f32.xlu1 %v3159_v30  ;;  %v3080_v29 = vmul.f32 %v3003_v9, %v1413_v45  ;;  %v3081_v44 = vmul.f32 %v3004_v42, %v1414_v23  ;;  %v6254_v45 = vld [vmem:[#allocation80_spill] sm:$0xff]  ;;  %v1423_v9 = vmax.f32 %v1333_v50, 0.0 }
 0x483   : > { %v3932_v58 = vpop.eup %3931  ;;  %v6256_v42 = vld [vmem:[#allocation52_spill] sm:$0xff]  ;;  %v1355_v50 = vadd.f32 %v6269_v12, %v5643_v17 }
 0x484   : > { %v3162_v0 = vadd.f32 %v3081_v44, %v3080_v29  ;;  %v3006_v48 = vmul.f32 %v3932_v58, %v5542_v51  ;;  %v3007_v27 = vmul.f32 %v3932_v58, %v5544_v24  ;;  %v6248_v51 = vld [vmem:[#allocation78_spill] sm:$0xff]  ;;  %v1339_v49 = vadd.f32 %v6256_v42, %v5640_v28  ;;  %v6257_v29 = vld [vmem:[#allocation53_spill] sm:$0xff] }
 0x485   : > { %v2923_v36 = vpop.xlane.xlu1 %2922  ;;  %v1341_v44 = vadd.f32 %v6257_v29, %v5643_v17  ;;  %v1424_v58 = vmax.f32 %v1335_v63, 0.0  ;;  %v6270_v63 = vld [vmem:[#allocation72_spill] sm:$0xff]  ;;  %v6273_v42 = vld [vmem:[#allocation61_spill] sm:$0xff]  ;;  %v1432_v29 = vmax.f32 %v1355_v50, 0.0  ;;  %v6287_v50 = vld [vmem:[#allocation87_spill] sm:$0xff] }
 0x486   : > { %3939 = vrcp.f32 %v2923_v36  ;;  %3163 = vadd.xlane.f32.xlu0 %v3162_v0  ;;  %v3082_v5 = vmul.f32 %v3006_v48, %v1415_v60  ;;  %v3083_v6 = vmul.f32 %v3007_v27, %v1416_v39  ;;  %v1425_v36 = vmax.f32 %v1339_v49, 0.0 }
 0x487   : > { %v3934_v14 = vpop.eup %3933  ;;  %v1361_v49 = vadd.f32 %v6273_v42, %v5643_v17 }
 0x488   : > { %v3165_v22 = vadd.f32 %v3083_v6, %v3082_v5  ;;  %v3009_v59 = vmul.f32 %v3934_v14, %v5550_v8  ;;  %v3010_v3 = vmul.f32 %v3934_v14, %v6248_v51  ;;  %v6251_v8 = vld [vmem:[#allocation79_spill] sm:$0xff]  ;;  %v1426_v5 = vmax.f32 %v1341_v44, 0.0  ;;  %v6260_v6 = vld [vmem:[#allocation54_spill] sm:$0xff] }
 0x489   : > { %v2926_v24 = vpop.xlane.xlu0 %2925  ;;  %v1343_v14 = vadd.f32 %v6260_v6, %v5640_v28  ;;  %v6277_v6 = vld [vmem:[#allocation63_spill] sm:$0xff] }
 0x48a   : > { %3941 = vrcp.f32 %v2926_v24  ;;  %3166 = vadd.xlane.f32.xlu1 %v3165_v22  ;;  %v3084_v61 = vmul.f32 %v3009_v59, %v1417_v16  ;;  %v3085_v55 = vmul.f32 %v3010_v3, %v1418_v54  ;;  %v6261_v16 = vld [vmem:[#allocation55_spill] sm:$0xff] }
 0x48b   : > { %v3936_v20 = vpop.eup %3935  ;;  %v1345_v54 = vadd.f32 %v6261_v16, %v5643_v17 }
 0x48c   : > { %v3168_v33 = vadd.f32 %v3085_v55, %v3084_v61  ;;  %v3012_v52 = vmul.f32 %v3936_v20, %v5558_v4  ;;  %v3013_v13 = vmul.f32 %v3936_v20, %v6251_v8  ;;  %v6255_v4 = vld [vmem:[#allocation81_spill] sm:$0xff]  ;;  %v1427_v61 = vmax.f32 %v1343_v14, 0.0  ;;  %v6264_v55 = vld [vmem:[#allocation56_spill] sm:$0xff] }
 0x48d   : > { %v2929_v37 = vpop.xlane.xlu1 %2928  ;;  %v1349_v20 = vadd.f32 %v6264_v55, %v5640_v28  ;;  %v1428_v53 = vmax.f32 %v1345_v54, 0.0  ;;  %v1365_v14 = vadd.f32 %v6277_v6, %v5643_v17  ;;  %v6278_v54 = vld [vmem:[#allocation76_spill] sm:$0xff] }
 0x48e   : > { %3943 = vrcp.f32 %v2929_v37  ;;  %3169 = vadd.xlane.f32.xlu0 %v3168_v33  ;;  %v3086_v46 = vmul.f32 %v3012_v52, %v1419_v1  ;;  %v3087_v56 = vmul.f32 %v3013_v13, %v1420_v32  ;;  %v6265_v1 = vld [vmem:[#allocation57_spill] sm:$0xff]  ;;  %v6267_v33 = vld [vmem:[#allocation71_spill] sm:$0xff] }
 0x48f   : > { %v3938_v35 = vpop.eup %3937  ;;  %v1351_v2 = vadd.f32 %v6265_v1, %v5643_v17 }
 0x490   : > { %v3171_v25 = vadd.f32 %v3087_v56, %v3086_v46  ;;  %v3015_v23 = vmul.f32 %v3938_v35, %v6254_v45  ;;  %v3016_v18 = vmul.f32 %v3938_v35, %v6255_v4  ;;  %v1429_v56 = vmax.f32 %v1349_v20, 0.0  ;;  %v6271_v45 = vld [vmem:[#allocation73_spill] sm:$0xff] }
 0x491   : > { %v2932_v21 = vpop.xlane.xlu0 %2931  ;;  %v1430_v35 = vmax.f32 %v1351_v2, 0.0  ;;  %v1436_v20 = vmax.f32 %v1365_v14, 0.0  ;;  %v6282_v2 = vld [vmem:[#allocation84_spill] sm:$0xff] }
 0x492   : > { %3945 = vrcp.f32 %v2932_v21  ;;  %3172 = vadd.xlane.f32.xlu1 %v3171_v25  ;;  %v3088_v7 = vmul.f32 %v3015_v23, %v1421_v15  ;;  %v3089_v11 = vmul.f32 %v3016_v18, %v1422_v34  ;;  %v6268_v15 = vld [vmem:[#allocation58_spill] sm:$0xff] }
 0x493   : > { %v3940_v30 = vpop.eup %3939  ;;  %v1353_v34 = vadd.f32 %v6268_v15, %v5640_v28 }
 0x494   : > { %v3174_v60 = vadd.f32 %v3089_v11, %v3088_v7  ;;  %v3018_v43 = vmul.f32 %v3940_v30, %v6258_v31  ;;  %v3019_v38 = vmul.f32 %v3940_v30, %v6259_v41  ;;  %v6272_v30 = vld [vmem:[#allocation60_spill] sm:$0xff]  ;;  %v6275_v31 = vld [vmem:[#allocation75_spill] sm:$0xff] }
 0x495   : > { %v2935_v39 = vpop.xlane.xlu1 %2934  ;;  %v1431_v11 = vmax.f32 %v1353_v34, 0.0  ;;  %v6286_v34 = vld [vmem:[#allocation86_spill] sm:$0xff] }
 0x496   : > { %3947 = vrcp.f32 %v2935_v39  ;;  %3175 = vadd.xlane.f32.xlu0 %v3174_v60  ;;  %v3090_v0 = vmul.f32 %v3018_v43, %v1423_v9  ;;  %v3091_v48 = vmul.f32 %v3019_v38, %v1424_v58  ;;  %v1359_v9 = vadd.f32 %v6272_v30, %v5640_v28  ;;  %v6274_v58 = vld [vmem:[#allocation74_spill] sm:$0xff] }
 0x497   : > { %v3942_v27 = vpop.eup %3941 }
 0x498   : > { %v3177_v57 = vadd.f32 %v3091_v48, %v3090_v0  ;;  %v3021_v26 = vmul.f32 %v3942_v27, %v6262_v19  ;;  %v3022_v22 = vmul.f32 %v3942_v27, %v6263_v47  ;;  %v1433_v48 = vmax.f32 %v1359_v9, 0.0  ;;  %v6279_v19 = vld [vmem:[#allocation77_spill] sm:$0xff] }
 0x499   : > { %v2938_v59 = vpop.xlane.xlu0 %2937  ;;  %v1434_v27 = vmax.f32 %v1361_v49, 0.0 }
 0x49a   : > { %3949 = vrcp.f32 %v2938_v59  ;;  %3178 = vadd.xlane.f32.xlu1 %v3177_v57  ;;  %v3092_v51 = vmul.f32 %v3021_v26, %v1425_v36  ;;  %v3093_v3 = vmul.f32 %v3022_v22, %v1426_v5  ;;  %v6276_v36 = vld [vmem:[#allocation62_spill] sm:$0xff] }
 0x49b   : > { %v3944_v24 = vpop.eup %3943  ;;  %v1363_v5 = vadd.f32 %v6276_v36, %v5640_v28 }
 0x49c   : > { %v3180_v10 = vadd.f32 %v3093_v3, %v3092_v51  ;;  %v3024_v32 = vmul.f32 %v3944_v24, %v6266_v40  ;;  %v3025_v52 = vmul.f32 %v3944_v24, %v6267_v33  ;;  %v6280_v3 = vld [vmem:[#allocation64_spill] sm:$0xff] }
 0x49d   : > { %v2941_v8 = vpop.xlane.xlu1 %2940  ;;  %v1435_v51 = vmax.f32 %v1363_v5, 0.0  ;;  %v1369_v24 = vadd.f32 %v6280_v3, %v5640_v28 }
 0x49e   : > { %3951 = vrcp.f32 %v2941_v8  ;;  %3181 = vadd.xlane.f32.xlu0 %v3180_v10  ;;  %v3094_v13 = vmul.f32 %v3024_v32, %v1427_v61  ;;  %v3095_v37 = vmul.f32 %v3025_v52, %v1428_v53  ;;  %v6281_v61 = vld [vmem:[#allocation65_spill] sm:$0xff] }
 0x49f   : > { %v3946_v46 = vpop.eup %3945  ;;  %v1371_v55 = vadd.f32 %v6281_v61, %v5643_v17  ;;  %v6283_v10 = vld [vmem:[#allocation85_spill] sm:$0xff]  ;;  %v1437_v8 = vmax.f32 %v1369_v24, 0.0 }
 0x4a0   : > { %v3183_v62 = vadd.f32 %v3095_v37, %v3094_v13  ;;  %v3027_v25 = vmul.f32 %v3946_v46, %v6270_v63  ;;  %v3028_v23 = vmul.f32 %v3946_v46, %v6271_v45  ;;  %v6284_v37 = vld [vmem:[#allocation66_spill] sm:$0xff] }
 0x4a1   : > { %v2944_v4 = vpop.xlane.xlu0 %2943  ;;  %v1438_v13 = vmax.f32 %v1371_v55, 0.0  ;;  %v1373_v46 = vadd.f32 %v6284_v37, %v5640_v28 }
 0x4a2   : > { %3953 = vrcp.f32 %v2944_v4  ;;  %3184 = vadd.xlane.f32.xlu1 %v3183_v62  ;;  %v3096_v18 = vmul.f32 %v3027_v25, %v1429_v56  ;;  %v3097_v21 = vmul.f32 %v3028_v23, %v1430_v35  ;;  %v6285_v56 = vld [vmem:[#allocation67_spill] sm:$0xff] }
 0x4a3   : > { %v3948_v7 = vpop.eup %3947  ;;  %v1375_v35 = vadd.f32 %v6285_v56, %v5643_v17  ;;  %v1439_v23 = vmax.f32 %v1373_v46, 0.0 }
 0x4a4   : > { %v3186_v44 = vadd.f32 %v3097_v21, %v3096_v18  ;;  %v3030_v60 = vmul.f32 %v3948_v7, %v6274_v58  ;;  %v3031_v43 = vmul.f32 %v3948_v7, %v6275_v31  ;;  %v6288_v21 = vld [vmem:[#allocation88_spill] sm:$0xff] }
 0x4a5   : > { %v2947_v41 = vpop.xlane.xlu1 %2946  ;;  %v1440_v4 = vmax.f32 %v1375_v35, 0.0 }
 0x4a6   : > { %3955 = vrcp.f32 %v2947_v41  ;;  %3187 = vadd.xlane.f32.xlu0 %v3186_v44  ;;  %v3098_v38 = vmul.f32 %v3030_v60, %v1431_v11  ;;  %v3099_v39 = vmul.f32 %v3031_v43, %v1432_v29  ;;  %v6289_v11 = vld [vmem:[#allocation89_spill] sm:$0xff] }
 0x4a7   : > { %v3950_v0 = vpop.eup %3949 }
 0x4a8   : > { %v3189_v16 = vadd.f32 %v3099_v39, %v3098_v38  ;;  %v3033_v57 = vmul.f32 %v3950_v0, %v6278_v54  ;;  %v3034_v26 = vmul.f32 %v3950_v0, %v6279_v19 }
 0x4aa   : > { %3190 = vadd.xlane.f32.xlu1 %v3189_v16  ;;  %v3100_v47 = vmul.f32 %v3033_v57, %v1433_v48  ;;  %v3101_v22 = vmul.f32 %v3034_v26, %v1434_v27 }
 0x4ab   : > { %v3952_v59 = vpop.eup %3951 }
 0x4ac   : > { %v3192_v1 = vadd.f32 %v3101_v22, %v3100_v47  ;;  %v3036_v53 = vmul.f32 %v3952_v59, %v6282_v2  ;;  %v3037_v40 = vmul.f32 %v3952_v59, %v6283_v10 }
 0x4ae   : > { %3193 = vadd.xlane.f32.xlu0 %v3192_v1  ;;  %v3102_v32 = vmul.f32 %v3036_v53, %v1435_v51  ;;  %v3103_v33 = vmul.f32 %v3037_v40, %v1436_v20 }
 0x4af   : > { %v3954_v52 = vpop.eup %3953 }
 0x4b0   : > { %v3195_v15 = vadd.f32 %v3103_v33, %v3102_v32  ;;  %v3039_v12 = vmul.f32 %v3954_v52, %v6286_v34  ;;  %v3040_v62 = vmul.f32 %v3954_v52, %v6287_v50 }
 0x4b2   : > { %3196 = vadd.xlane.f32.xlu1 %v3195_v15  ;;  %v3104_v63 = vmul.f32 %v3039_v12, %v1437_v8  ;;  %v3105_v25 = vmul.f32 %v3040_v62, %v1438_v13 }
 0x4b3   : > { %v3956_v45 = vpop.eup %3955 }
 0x4b4   : > { %v3198_v18 = vadd.f32 %v3105_v25, %v3104_v63  ;;  %v3042_v7 = vmul.f32 %v3956_v45, %v6288_v21  ;;  %v3043_v28 = vmul.f32 %v3956_v45, %v6289_v11 }
 0x4b6   : > { %3199 = vadd.xlane.f32.xlu0 %v3198_v18  ;;  %v3106_v30 = vmul.f32 %v3042_v7, %v1439_v23  ;;  %v3107_v17 = vmul.f32 %v3043_v28, %v1440_v4 }
 0x4b8   : > { %v3201_v9 = vadd.f32 %v3107_v17, %v3106_v30 }
 0x4ba   : > { %3202 = vadd.xlane.f32.xlu1 %v3201_v9 }
 0x4c7   : > { %v3110_v42 = vpop.xlane.xlu0 %3109 }
 0x4c8   : > { %3204 = vst [vmem:[%s5842_s7] sm:$0xff] %v3110_v42 }
 0x4cb   : > { %v3113_v49 = vpop.xlane.xlu1 %3112 }
 0x4cc   : > { %3205 = vst [vmem:[%s5842_s7 + $0x8] sm:$0xff] %v3113_v49 }
 0x4cf   : > { %v3116_v29 = vpop.xlane.xlu0 %3115 }
 0x4d0   : > { %3206 = vst [vmem:[%s5842_s7 + $0x10] sm:$0xff] %v3116_v29 }
 0x4d3   : > { %v3119_v44 = vpop.xlane.xlu1 %3118 }
 0x4d4   : > { %3207 = vst [vmem:[%s5842_s7 + $0x18] sm:$0xff] %v3119_v44 }
 0x4d7   : > { %v3122_v58 = vpop.xlane.xlu0 %3121 }
 0x4d8   : > { %3208 = vst [vmem:[%s5842_s7 + $0x20] sm:$0xff] %v3122_v58 }
 0x4db   : > { %v3125_v60 = vpop.xlane.xlu1 %3124 }
 0x4dc   : > { %3209 = vst [vmem:[%s5842_s7 + $0x28] sm:$0xff] %v3125_v60 }
 0x4df   : > { %v3128_v31 = vpop.xlane.xlu0 %3127 }
 0x4e0   : > { %3210 = vst [vmem:[%s5842_s7 + $0x30] sm:$0xff] %v3128_v31 }
 0x4e3   : > { %v3131_v43 = vpop.xlane.xlu1 %3130 }
 0x4e4   : > { %3211 = vst [vmem:[%s5842_s7 + $0x38] sm:$0xff] %v3131_v43 }
 0x4e7   : > { %v3134_v41 = vpop.xlane.xlu0 %3133 }
 0x4e8   : > { %3212 = vst [vmem:[%s5842_s7 + $0x40] sm:$0xff] %v3134_v41 }
 0x4eb   : > { %v3137_v38 = vpop.xlane.xlu1 %3136 }
 0x4ec   : > { %3213 = vst [vmem:[%s5842_s7 + $0x48] sm:$0xff] %v3137_v38 }
 0x4ef   : > { %v3140_v39 = vpop.xlane.xlu0 %3139 }
 0x4f0   : > { %3214 = vst [vmem:[%s5842_s7 + $0x50] sm:$0xff] %v3140_v39 }
 0x4f3   : > { %v3143_v0 = vpop.xlane.xlu1 %3142 }
 0x4f4   : > { %3215 = vst [vmem:[%s5842_s7 + $0x58] sm:$0xff] %v3143_v0 }
 0x4f7   : > { %v3146_v48 = vpop.xlane.xlu0 %3145 }
 0x4f8   : > { %3216 = vst [vmem:[%s5842_s7 + $0x60] sm:$0xff] %v3146_v48 }
 0x4fb   : > { %v3149_v27 = vpop.xlane.xlu1 %3148 }
 0x4fc   : > { %3217 = vst [vmem:[%s5842_s7 + $0x68] sm:$0xff] %v3149_v27 }
 0x4ff   : > { %v3152_v36 = vpop.xlane.xlu0 %3151 }
 0x500   : > { %3218 = vst [vmem:[%s5842_s7 + $0x70] sm:$0xff] %v3152_v36 }
 0x503   : > { %v3155_v5 = vpop.xlane.xlu1 %3154 }
 0x504   : > { %3219 = vst [vmem:[%s5842_s7 + $0x78] sm:$0xff] %v3155_v5 }
 0x507   : > { %v3158_v6 = vpop.xlane.xlu0 %3157 }
 0x508   : > { %3220 = vst [vmem:[%s5842_s7 + $0x80] sm:$0xff] %v3158_v6 }
 0x50b   : > { %v3161_v14 = vpop.xlane.xlu1 %3160 }
 0x50c   : > { %3221 = vst [vmem:[%s5842_s7 + $0x88] sm:$0xff] %v3161_v14 }
 0x50f   : > { %v3164_v16 = vpop.xlane.xlu0 %3163 }
 0x510   : > { %3222 = vst [vmem:[%s5842_s7 + $0x90] sm:$0xff] %v3164_v16 }
 0x513   : > { %v3167_v54 = vpop.xlane.xlu1 %3166 }
 0x514   : > { %3223 = vst [vmem:[%s5842_s7 + $0x98] sm:$0xff] %v3167_v54 }
 0x517   : > { %v3170_v57 = vpop.xlane.xlu0 %3169 }
 0x518   : > { %3224 = vst [vmem:[%s5842_s7 + $0xa0] sm:$0xff] %v3170_v57 }
 0x51b   : > { %v3173_v19 = vpop.xlane.xlu1 %3172 }
 0x51c   : > { %3225 = vst [vmem:[%s5842_s7 + $0xa8] sm:$0xff] %v3173_v19 }
 0x51f   : > { %v3176_v26 = vpop.xlane.xlu0 %3175 }
 0x520   : > { %3226 = vst [vmem:[%s5842_s7 + $0xb0] sm:$0xff] %v3176_v26 }
 0x523   : > { %v3179_v47 = vpop.xlane.xlu1 %3178 }
 0x524   : > { %3227 = vst [vmem:[%s5842_s7 + $0xb8] sm:$0xff] %v3179_v47 }
 0x527   : > { %v3182_v22 = vpop.xlane.xlu0 %3181 }
 0x528   : > { %3228 = vst [vmem:[%s5842_s7 + $0xc0] sm:$0xff] %v3182_v22 }
 0x52b   : > { %v3185_v59 = vpop.xlane.xlu1 %3184 }
 0x52c   : > { %3229 = vst [vmem:[%s5842_s7 + $0xc8] sm:$0xff] %v3185_v59 }
 0x52f   : > { %v3188_v51 = vpop.xlane.xlu0 %3187 }
 0x530   : > { %3230 = vst [vmem:[%s5842_s7 + $0xd0] sm:$0xff] %v3188_v51 }
 0x533   : > { %v3191_v3 = vpop.xlane.xlu1 %3190 }
 0x534   : > { %3231 = vst [vmem:[%s5842_s7 + $0xd8] sm:$0xff] %v3191_v3 }
 0x537   : > { %v3194_v24 = vpop.xlane.xlu0 %3193 }
 0x538   : > { %3232 = vst [vmem:[%s5842_s7 + $0xe0] sm:$0xff] %v3194_v24 }
 0x53b   : > { %v3197_v61 = vpop.xlane.xlu1 %3196 }
 0x53c   : > { %3233 = vst [vmem:[%s5842_s7 + $0xe8] sm:$0xff] %v3197_v61 }
 0x53f   : > { %v3200_v55 = vpop.xlane.xlu0 %3199 }
 0x540   : > { %3234 = vst [vmem:[%s5842_s7 + $0xf0] sm:$0xff] %v3200_v55 }
 0x543   : > { %v3203_v20 = vpop.xlane.xlu1 %3202 }
 0x544   : > { %3235 = vst [vmem:[%s5842_s7 + $0xf8] sm:$0xff] %v3203_v20 }
 0x545 PF: > { %s14_s15 = sadd.s32 1, %s3963_s15  }
 0x546   : > { %p11_p4 = scmp.ge.s32.totalorder %s14_s15, 4  }
 0x548   :  { %13 = sbr.rel (!%p11_p4) target bundleno = 1 (0x1), region = 69 }

</bundles_post_ra>
